<compile_context>
chip_gen: v7x
topology: tpu7x:2x2x1
jax: 0.10.0
libtpu: 0.0.40
codegen_flags: <defaults>
</compile_context>

<pallas_src>
import math
from functools import partial

import jax
import jax.numpy as jnp
from jax import lax
from jax.experimental import pallas as pl
from jax.experimental.pallas import tpu as pltpu


# ---------------- in-kernel helpers (traced inside the Pallas bodies) ----------------

def _ln_normalize(x, eps=1e-5):
    # Un-affine LayerNorm; gamma/beta are folded into the projection weights host-side.
    mu = jnp.mean(x, axis=-1, keepdims=True)
    xc = x - mu
    var = jnp.mean(xc * xc, axis=-1, keepdims=True)
    return xc * lax.rsqrt(var + eps)


def _gelu_exact(x):
    # PyTorch nn.GELU default (erf form).  (tanh approx would move work to the EUP on
    # v5e if bit-exactness vs erf-GELU is not required.)
    return 0.5 * x * (1.0 + lax.erf(x * (1.0 / math.sqrt(2.0))))


def _split_heads(y, heads, hd):
    # (T, heads*hd) -> (heads, T, hd)
    t = y.shape[0]
    return jnp.transpose(y.reshape(t, heads, hd), (1, 0, 2))


# ------------------------------ attention-stage kernel -------------------------------
# grid = (B, num_q_tiles, num_kv_tiles); kv axis is the (arbitrary) reduction axis.
# Scratch holds per-branch, per-head online-softmax state across kv steps.

def _attn_kernel(
    xq_ref,            # (1, tq, C)  bf16 query-rows tile of x
    xkv_ref,           # (1, tk, C)  bf16 key/value-rows tile of x
    qw_ref, qb_ref,    # (C, P*C) bf16, (1, P*C) f32    (LN1 affine + scale folded)
    kvw_ref, kvb_ref,  # (C, P*2C) bf16, (1, P*2C) f32  (LN1 affine folded)
    pw_ref, pb_ref,    # (P, C, C) bf16, (1, C) f32     (sum of branch proj biases)
    o_ref,             # (1, tq, C)  bf16
    q_sc,              # (P, heads, tq, hd) bf16
    m_sc,              # (P, heads, tq, 1)  f32
    l_sc,              # (P, heads, tq, 1)  f32
    acc_sc,            # (P, heads, tq, hd) f32
    *, num_heads: int, num_parallel: int, n_true: int, mask_kv: bool,
):
    ki = pl.program_id(2)
    nk = pl.num_programs(2)

    tq, C = xq_ref.shape[1], xq_ref.shape[2]
    tk = xkv_ref.shape[1]
    heads, P = num_heads, num_parallel
    hd = C // heads

    x_q = xq_ref[0].astype(jnp.float32)     # (tq, C) residual + LN input
    x_kv = xkv_ref[0].astype(jnp.float32)   # (tk, C)

    # ---- init: reset softmax state, project q (both branches in ONE wide matmul) ----
    @pl.when(ki == 0)
    def _init():
        m_sc[...] = jnp.full_like(m_sc, -jnp.inf)
        l_sc[...] = jnp.zeros_like(l_sc)
        acc_sc[...] = jnp.zeros_like(acc_sc)
        xn_q = _ln_normalize(x_q).astype(jnp.bfloat16)
        q_all = (jnp.dot(xn_q, qw_ref[...], preferred_element_type=jnp.float32)
                 + qb_ref[...]).astype(jnp.bfloat16)                 # (tq, P*C)
        for p in range(P):
            q_sc[p] = _split_heads(q_all[:, p * C:(p + 1) * C], heads, hd)

    # ---- one kv step: fused k/v projection + online-softmax update per branch ----
    xn_kv = _ln_normalize(x_kv).astype(jnp.bfloat16)
    kv_all = (jnp.dot(xn_kv, kvw_ref[...], preferred_element_type=jnp.float32)
              + kvb_ref[...]).astype(jnp.bfloat16)                    # (tk, P*2*C)

    if mask_kv:
        kv_pos = ki * tk + lax.broadcasted_iota(jnp.int32, (1, 1, tk), 2)
        kv_valid = kv_pos < n_true                                    # (1, 1, tk)

    for p in range(P):
        k = _split_heads(kv_all[:, (2 * p) * C:(2 * p + 1) * C], heads, hd)      # (h,tk,hd)
        v = _split_heads(kv_all[:, (2 * p + 1) * C:(2 * p + 2) * C], heads, hd)  # (h,tk,hd)
        q = q_sc[p]                                                               # (h,tq,hd)
        s = jnp.einsum('hqd,hkd->hqk', q, k,
                       preferred_element_type=jnp.float32)                        # (h,tq,tk)
        if mask_kv:
            s = jnp.where(kv_valid, s, jnp.float32(-1e30))

        m_prev = m_sc[p]
        m_new = jnp.maximum(m_prev, jnp.max(s, axis=-1, keepdims=True))
        alpha = jnp.exp(m_prev - m_new)
        # bf16 exp: EUP bf16 path + half-size pmat; accumulation stays f32.
        pmat = jnp.exp((s - m_new).astype(jnp.bfloat16))
        l_sc[p] = alpha * l_sc[p] + jnp.sum(pmat, axis=-1, keepdims=True,
                                            dtype=jnp.float32)
        acc_sc[p] = alpha * acc_sc[p] + jnp.einsum(
            'hqk,hkd->hqd', pmat, v, preferred_element_type=jnp.float32)
        m_sc[p] = m_new

    # ---- finalize: normalize, merge heads, full-width output projection, residual ----
    @pl.when(ki == nk - 1)
    def _finalize():
        out = x_q
        for p in range(P):
            inv_l = pl.reciprocal(l_sc[p], approx=True)                # (h, tq, 1)
            o_h = (acc_sc[p] * inv_l).astype(jnp.bfloat16)             # (h, tq, hd)
            o_m = jnp.transpose(o_h, (1, 0, 2)).reshape(tq, C)         # (tq, C) [heads,hd]
            out = out + jnp.dot(o_m, pw_ref[p],
                                preferred_element_type=jnp.float32)    # K = C
        out = out + pb_ref[...]
        o_ref[0] = out.astype(o_ref.dtype)


# --------------------------------- MLP-stage kernel ----------------------------------
# grid = (B, num_token_tiles); both parallel branches fused into two wide matmuls:
#   fc1 of both branches is one (tn,C)@(C,P*H) matmul, fc2 is one (tn,P*H)@(P*H,C)
#   matmul (branch sum folded into the contraction).

def _mlp_kernel(
    x_ref,                         # (1, tn, C)  bf16
    f1w_ref, f1b_ref,              # (C, P*H) bf16, (1, P*H) f32  (LN2 affine folded)
    f2w_ref, f2b_ref,              # (P*H, C) bf16, (1, C) f32    (sum of branch biases)
    o_ref,                         # (1, tn, C)
):
    x = x_ref[0].astype(jnp.float32)                      # (tn, C)
    xn = _ln_normalize(x).astype(jnp.bfloat16)
    h = jnp.dot(xn, f1w_ref[...], preferred_element_type=jnp.float32) + f1b_ref[...]
    h = _gelu_exact(h).astype(jnp.bfloat16)               # (tn, P*H)
    out = x + jnp.dot(h, f2w_ref[...], preferred_element_type=jnp.float32) + f2b_ref[...]
    o_ref[0] = out.astype(o_ref.dtype)


# ------------------------------------ wrappers ----------------------------------------

def _vmem_limit_bytes():
    """~3/4 of physical VMEM per core (48 MiB on v7x, 96 MiB on v5e/v6e)."""
    cap = None
    try:
        info = pltpu.get_tpu_info()
        for name in ("vmem_capacity_bytes", "vmem_size_bytes", "vmem_bytes"):
            v = getattr(info, name, None)
            if v:
                cap = int(v)
                break
    except Exception:
        cap = None
    if cap is None:
        return 64 * 1024 * 1024        # conservative, proven-safe default
    return max(32 * 1024 * 1024, (cap * 3) // 4)


def _make_weight_spec(shape, index_map):
    """Constant-index weight block; single-buffered when supported (halves weight VMEM)."""
    try:
        return pl.BlockSpec(shape, index_map, pipeline_mode=pl.Buffered(1))
    except (AttributeError, TypeError):
        return pl.BlockSpec(shape, index_map)


def _padded_len(n):
    """Pad the token axis: multiple of 8 for short sequences, 128 for long ones."""
    if n <= 256:
        return ((n + 7) // 8) * 8
    return ((n + 127) // 128) * 128


def _pick_tile(n, target):
    """Largest multiple-of-8 divisor of n not exceeding target (else full axis)."""
    if n <= target:
        return n
    for t in range(target, 7, -1):
        if n % t == 0 and t % 8 == 0:
            return t
    return n


def prepare_params(params, *, num_heads):
    """One-time host-side weight re-layout:
       * LN1/LN2 affine (gamma, beta) and the softmax scale are folded into the
         projection weights (bf16) and precomputed f32 biases,
       * both parallel branches are concatenated so q, k+v and fc1 are single wide
         matmuls; fc2 / proj contract over merged heads / branch-concatenated hidden,
       * proj and fc2 biases are pre-summed over branches."""
    P, C, _ = params["qkvw"].shape
    assert C % num_heads == 0
    hd = C // num_heads
    scale = hd ** -0.5
    f32, bf16 = jnp.float32, jnp.bfloat16

    g1, b1 = params["n1w"].astype(f32), params["n1b"].astype(f32)     # (P, C)
    g2, b2 = params["n2w"].astype(f32), params["n2b"].astype(f32)

    qkv = params["qkvw"].astype(f32).reshape(P, C, 3, C)              # out cols [3][heads,hd]
    qw, kw, vw = qkv[:, :, 0, :], qkv[:, :, 1, :], qkv[:, :, 2, :]    # (P, C, C) each

    # LN(x) @ W = xn @ (gamma[:,None] * W) + beta @ W
    qw_eff = g1[:, :, None] * qw * scale
    qb_eff = jnp.einsum('pc,pcd->pd', b1, qw) * scale
    kw_eff = g1[:, :, None] * kw
    kb_eff = jnp.einsum('pc,pcd->pd', b1, kw)
    vw_eff = g1[:, :, None] * vw
    vb_eff = jnp.einsum('pc,pcd->pd', b1, vw)

    qw_all = qw_eff.transpose(1, 0, 2).reshape(C, P * C)              # cols [p][heads,hd]
    qb_all = qb_eff.reshape(1, P * C)
    kvw_all = jnp.stack([kw_eff, vw_eff], axis=1).transpose(2, 0, 1, 3).reshape(C, P * 2 * C)
    kvb_all = jnp.stack([kb_eff, vb_eff], axis=1).reshape(1, P * 2 * C)

    projw = params["projw"].astype(f32)                               # (P, C, C) rows [heads,hd]
    projb_sum = params["projb"].astype(f32).sum(axis=0).reshape(1, C)

    f1w = params["f1w"].astype(f32)                                   # (P, C, H)
    H = f1w.shape[-1]
    f1w_eff = g2[:, :, None] * f1w
    f1b_eff = jnp.einsum('pc,pch->ph', b2, f1w) + params["f1b"].astype(f32)
    f1w_all = f1w_eff.transpose(1, 0, 2).reshape(C, P * H)            # cols [p][H]
    f1b_all = f1b_eff.reshape(1, P * H)
    f2w_all = params["f2w"].astype(f32).reshape(P * H, C)             # rows [p][H]
    f2b_sum = params["f2b"].astype(f32).sum(axis=0).reshape(1, C)

    return {
        "qw_all": qw_all.astype(bf16), "qb_all": qb_all,
        "kvw_all": kvw_all.astype(bf16), "kvb_all": kvb_all,
        "projw": projw.astype(bf16), "projb_sum": projb_sum,
        "f1w_all": f1w_all.astype(bf16), "f1b_all": f1b_all,
        "f2w_all": f2w_all.astype(bf16), "f2b_sum": f2b_sum,
    }


def _attention_stage(x, p, *, num_heads, n_true, q_tile=256, kv_tile=256):
    B, N, C = x.shape
    P = p["projw"].shape[0]
    hd = C // num_heads
    tq = _pick_tile(N, q_tile)
    tk = _pick_tile(N, kv_tile)
    nq, nk = N // tq, N // tk

    def wspec(arr):
        return _make_weight_spec(
            arr.shape, lambda b, qi, ki, _n=arr.ndim: (0,) * _n)

    in_specs = [
        pl.BlockSpec((1, tq, C), lambda b, qi, ki: (b, qi, 0)),   # x (query rows)
        pl.BlockSpec((1, tk, C), lambda b, qi, ki: (b, ki, 0)),   # x (key/value rows)
        wspec(p["qw_all"]), wspec(p["qb_all"]),
        wspec(p["kvw_all"]), wspec(p["kvb_all"]),
        wspec(p["projw"]), wspec(p["projb_sum"]),
    ]

    kernel = partial(_attn_kernel, num_heads=num_heads, num_parallel=P,
                     n_true=n_true, mask_kv=(n_true != N))

    return pl.pallas_call(
        kernel,
        out_shape=jax.ShapeDtypeStruct((B, N, C), jnp.bfloat16),
        grid_spec=pltpu.PrefetchScalarGridSpec(
            num_scalar_prefetch=0,
            grid=(B, nq, nk),
            in_specs=in_specs,
            out_specs=pl.BlockSpec((1, tq, C), lambda b, qi, ki: (b, qi, 0)),
            scratch_shapes=[
                pltpu.VMEM((P, num_heads, tq, hd), jnp.bfloat16),   # q
                pltpu.VMEM((P, num_heads, tq, 1), jnp.float32),     # running max
                pltpu.VMEM((P, num_heads, tq, 1), jnp.float32),     # running sum
                pltpu.VMEM((P, num_heads, tq, hd), jnp.float32),    # accumulator
            ],
        ),
        compiler_params=pltpu.CompilerParams(
            dimension_semantics=("parallel", "parallel", "arbitrary"),
            vmem_limit_bytes=_vmem_limit_bytes(),
        ),
    )(x, x, p["qw_all"], p["qb_all"], p["kvw_all"], p["kvb_all"],
      p["projw"], p["projb_sum"])


def _mlp_stage(x, p, *, out_dtype, token_tile=256):
    B, N, C = x.shape
    tn = _pick_tile(N, token_tile)
    nt = N // tn

    def wspec(arr):
        return _make_weight_spec(
            arr.shape, lambda b, ti, _n=arr.ndim: (0,) * _n)

    in_specs = [
        pl.BlockSpec((1, tn, C), lambda b, ti: (b, ti, 0)),
        wspec(p["f1w_all"]), wspec(p["f1b_all"]),
        wspec(p["f2w_all"]), wspec(p["f2b_sum"]),
    ]

    return pl.pallas_call(
        _mlp_kernel,
        out_shape=jax.ShapeDtypeStruct((B, N, C), out_dtype),
        grid_spec=pltpu.PrefetchScalarGridSpec(
            num_scalar_prefetch=0,
            grid=(B, nt),
            in_specs=in_specs,
            out_specs=pl.BlockSpec((1, tn, C), lambda b, ti: (b, ti, 0)),
        ),
        compiler_params=pltpu.CompilerParams(
            dimension_semantics=("parallel", "parallel"),
            vmem_limit_bytes=_vmem_limit_bytes(),
        ),
    )(x, p["f1w_all"], p["f1b_all"], p["f2w_all"], p["f2b_sum"])


def parallel_things_block(x, prepared_params, *, num_heads,
                          q_tile=256, kv_tile=256, token_tile=256):
    """x: (B, N, C) float.  prepared_params: output of prepare_params().
       (v6e users can raise kv_tile / token_tile to 512.)"""
    B, N, C = x.shape
    n_pad = _padded_len(N)
    xb = x.astype(jnp.bfloat16)
    if n_pad != N:
        xb = jnp.pad(xb, ((0, 0), (0, n_pad - N), (0, 0)))
    x1 = _attention_stage(xb, prepared_params, num_heads=num_heads, n_true=N,
                          q_tile=q_tile, kv_tile=kv_tile)             # bf16, padded
    out = _mlp_stage(x1, prepared_params, out_dtype=x.dtype,
                     token_tile=token_tile)                            # orig dtype, padded
    if n_pad != N:
        out = out[:, :N, :]
    return out


# --------------------------- pure-JAX fp32 reference (for checking) -------------------

def reference(x, params, *, num_heads):
    B, N, C = x.shape
    P = params["n1w"].shape[0]
    hd = C // num_heads
    scale = hd ** -0.5

    def ln(v, w, b):
        mu = jnp.mean(v, axis=-1, keepdims=True)
        vc = v - mu
        var = jnp.mean(vc * vc, axis=-1, keepdims=True)
        return vc * lax.rsqrt(var + 1e-5) * w + b

    attn_sum = jnp.zeros_like(x)
    for p in range(P):
        h = ln(x, params["n1w"][p], params["n1b"][p])
        qkv = h @ params["qkvw"][p]                               # (B, N, 3C)
        qkv = qkv.reshape(B, N, 3, num_heads, hd).transpose(2, 0, 3, 1, 4)
        q, k, v = qkv[0], qkv[1], qkv[2]                          # (B, heads, N, hd)
        a = jax.nn.softmax((q * scale) @ jnp.swapaxes(k, -1, -2), axis=-1)
        o = (a @ v).transpose(0, 2, 1, 3).reshape(B, N, C)
        attn_sum = attn_sum + o @ params["projw"][p] + params["projb"][p]
    x1 = x + attn_sum

    ffn_sum = jnp.zeros_like(x1)
    for p in range(P):
        h = ln(x1, params["n2w"][p], params["n2b"][p])
        h = _gelu_exact(h @ params["f1w"][p] + params["f1b"][p])
        ffn_sum = ffn_sum + h @ params["f2w"][p] + params["f2b"][p]
    return x1 + ffn_sum


# ------------------------------------ main ---------------------------------------------

if __name__ == "__main__":
    # N=10 deliberately not a multiple of 8: exercises the padding + kv-masking path.
    B, N, C = 2, 10, 32
    num_heads = 4
    num_parallel = 2
    mlp_ratio = 4.0
    H = int(C * mlp_ratio)

    key = jax.random.PRNGKey(0)
    keys = jax.random.split(key, 16)

    def w(k, shape, std=0.02):
        return (std * jax.random.normal(k, shape)).astype(jnp.float32)

    params = {
        # LayerNorm params like PyTorch (ones / zeros) but perturbed so the test
        # exercises the affine folding.
        "n1w": 1.0 + w(keys[0], (num_parallel, C)),
        "n1b": w(keys[1], (num_parallel, C)),
        "qkvw": w(keys[2], (num_parallel, C, 3 * C)),
        "projw": w(keys[3], (num_parallel, C, C)),
        "projb": w(keys[4], (num_parallel, C)),
        "n2w": 1.0 + w(keys[5], (num_parallel, C)),
        "n2b": w(keys[6], (num_parallel, C)),
        "f1w": w(keys[7], (num_parallel, C, H)),
        "f1b": w(keys[8], (num_parallel, H)),
        "f2w": w(keys[9], (num_parallel, H, C)),
        "f2b": w(keys[10], (num_parallel, C)),
    }

    x = jax.random.normal(keys[11], (B, N, C), dtype=jnp.float32)

    prepared = prepare_params(params, num_heads=num_heads)
    out = parallel_things_block(x, prepared, num_heads=num_heads)
    out = jax.block_until_ready(out)

    ref = reference(x, params, num_heads=num_heads)
    assert out.shape == (B, N, C)
    # bf16 activations/weights, bf16 exp and approx reciprocal => loose tolerance vs fp32.
    assert jnp.allclose(out, ref, atol=3e-2, rtol=3e-2), "mismatch vs JAX reference"

    print("KERNEL_OK")
</pallas_src>

<mosaic_0001>
module attributes {stable_mosaic.version = 11 : i64} {
  func.func @_attn_kernel(%arg0: i32, %arg1: i32, %arg2: i32, %arg3: memref<1x16x32xbf16, #tpu.memory_space<vmem>>, %arg4: memref<1x16x32xbf16, #tpu.memory_space<vmem>>, %arg5: memref<32x64xbf16, #tpu.memory_space<vmem>>, %arg6: memref<1x64xf32, #tpu.memory_space<vmem>>, %arg7: memref<32x128xbf16, #tpu.memory_space<vmem>>, %arg8: memref<1x128xf32, #tpu.memory_space<vmem>>, %arg9: memref<2x32x32xbf16, #tpu.memory_space<vmem>>, %arg10: memref<1x32xf32, #tpu.memory_space<vmem>>, %arg11: memref<1x16x32xbf16, #tpu.memory_space<vmem>>, %arg12: memref<2x4x16x8xbf16, #tpu.memory_space<vmem>>, %arg13: memref<2x4x16x1xf32, #tpu.memory_space<vmem>>, %arg14: memref<2x4x16x1xf32, #tpu.memory_space<vmem>>, %arg15: memref<2x4x16x8xf32, #tpu.memory_space<vmem>>) attributes {dimension_semantics = [#tpu.dimension_semantics<parallel>, #tpu.dimension_semantics<parallel>, #tpu.dimension_semantics<arbitrary>], iteration_bounds = array<i64: 2, 1, 1>, scalar_prefetch = 0 : i64, scratch_operands = 4 : i64, tpu.core_type = #tpu.core_type<tc>, window_params = [{transform_indices = @transform_0, window_bounds = array<i64: 1, 16, 32>}, {transform_indices = @transform_1, window_bounds = array<i64: 1, 16, 32>}, {pipeline_mode = #tpu.pipeline_mode<synchronous>, transform_indices = @transform_2, window_bounds = array<i64: 32, 64>}, {pipeline_mode = #tpu.pipeline_mode<synchronous>, transform_indices = @transform_3, window_bounds = array<i64: 1, 64>}, {pipeline_mode = #tpu.pipeline_mode<synchronous>, transform_indices = @transform_4, window_bounds = array<i64: 32, 128>}, {pipeline_mode = #tpu.pipeline_mode<synchronous>, transform_indices = @transform_5, window_bounds = array<i64: 1, 128>}, {pipeline_mode = #tpu.pipeline_mode<synchronous>, transform_indices = @transform_6, window_bounds = array<i64: 2, 32, 32>}, {pipeline_mode = #tpu.pipeline_mode<synchronous>, transform_indices = @transform_7, window_bounds = array<i64: 1, 32>}, {transform_indices = @transform_8, window_bounds = array<i64: 1, 16, 32>}]} {
    %c0 = arith.constant 0 : index
    %c0_0 = arith.constant 0 : index
    %c0_1 = arith.constant 0 : index
    %0 = vector.load %arg3[%c0, %c0_0, %c0_1] : memref<1x16x32xbf16, #tpu.memory_space<vmem>>, vector<1x16x32xbf16>
    %1 = vector.shape_cast %0 : vector<1x16x32xbf16> to vector<16x32xbf16>
    %2 = arith.extf %1 : vector<16x32xbf16> to vector<16x32xf32>
    %c0_2 = arith.constant 0 : index
    %c0_3 = arith.constant 0 : index
    %c0_4 = arith.constant 0 : index
    %3 = vector.load %arg4[%c0_2, %c0_3, %c0_4] : memref<1x16x32xbf16, #tpu.memory_space<vmem>>, vector<1x16x32xbf16>
    %4 = vector.shape_cast %3 : vector<1x16x32xbf16> to vector<16x32xbf16>
    %5 = arith.extf %4 : vector<16x32xbf16> to vector<16x32xf32>
    %c0_i32 = arith.constant 0 : i32
    %6 = arith.cmpi eq, %arg2, %c0_i32 : i32
    %7 = arith.extui %6 : i1 to i32
    %c0_i32_5 = arith.constant 0 : i32
    %8 = arith.cmpi ne, %7, %c0_i32_5 : i32
    scf.if %8 {
      %cst_82 = arith.constant 0xFF800000 : f32
      %133 = vector.broadcast %cst_82 : f32 to vector<2x4x16x1xf32>
      %c0_83 = arith.constant 0 : index
      %c0_84 = arith.constant 0 : index
      %c0_85 = arith.constant 0 : index
      %c0_86 = arith.constant 0 : index
      %134 = vector.load %arg13[%c0_83, %c0_84, %c0_85, %c0_86] : memref<2x4x16x1xf32, #tpu.memory_space<vmem>>, vector<2x4x16x1xf32>
      tpu.vector_store %arg13[%c0_83, %c0_84, %c0_85, %c0_86], %133 {strides = array<i32>} : memref<2x4x16x1xf32, #tpu.memory_space<vmem>>, vector<2x4x16x1xf32>,
      %cst_87 = arith.constant 0.000000e+00 : f32
      %135 = vector.broadcast %cst_87 : f32 to vector<2x4x16x1xf32>
      %c0_88 = arith.constant 0 : index
      %c0_89 = arith.constant 0 : index
      %c0_90 = arith.constant 0 : index
      %c0_91 = arith.constant 0 : index
      %136 = vector.load %arg14[%c0_88, %c0_89, %c0_90, %c0_91] : memref<2x4x16x1xf32, #tpu.memory_space<vmem>>, vector<2x4x16x1xf32>
      tpu.vector_store %arg14[%c0_88, %c0_89, %c0_90, %c0_91], %135 {strides = array<i32>} : memref<2x4x16x1xf32, #tpu.memory_space<vmem>>, vector<2x4x16x1xf32>,
      %cst_92 = arith.constant 0.000000e+00 : f32
      %137 = vector.broadcast %cst_92 : f32 to vector<2x4x16x8xf32>
      %c0_93 = arith.constant 0 : index
      %c0_94 = arith.constant 0 : index
      %c0_95 = arith.constant 0 : index
      %c0_96 = arith.constant 0 : index
      %138 = vector.load %arg15[%c0_93, %c0_94, %c0_95, %c0_96] : memref<2x4x16x8xf32, #tpu.memory_space<vmem>>, vector<2x4x16x8xf32>
      tpu.vector_store %arg15[%c0_93, %c0_94, %c0_95, %c0_96], %137 {strides = array<i32>} : memref<2x4x16x8xf32, #tpu.memory_space<vmem>>, vector<2x4x16x8xf32>,
      %cst_97 = arith.constant dense<0.000000e+00> : vector<16xf32>
      %139 = vector.multi_reduction <add>, %2, %cst_97 [1] : vector<16x32xf32> to vector<16xf32>
      %140 = vector.shape_cast %139 : vector<16xf32> to vector<16x1xf32>
      %cst_98 = arith.constant 3.200000e+01 : f32
      %141 = vector.broadcast %cst_98 : f32 to vector<16x1xf32>
      %142 = arith.divf %140, %141 : vector<16x1xf32>
      %143 = vector.broadcast %142 : vector<16x1xf32> to vector<16x32xf32>
      %144 = arith.subf %2, %143 : vector<16x32xf32>
      %145 = arith.mulf %144, %144 : vector<16x32xf32>
      %cst_99 = arith.constant dense<0.000000e+00> : vector<16xf32>
      %146 = vector.multi_reduction <add>, %145, %cst_99 [1] : vector<16x32xf32> to vector<16xf32>
      %147 = vector.shape_cast %146 : vector<16xf32> to vector<16x1xf32>
      %cst_100 = arith.constant 3.200000e+01 : f32
      %148 = vector.broadcast %cst_100 : f32 to vector<16x1xf32>
      %149 = arith.divf %147, %148 : vector<16x1xf32>
      %cst_101 = arith.constant 9.99999974E-6 : f32
      %150 = vector.broadcast %cst_101 : f32 to vector<16x1xf32>
      %151 = arith.addf %149, %150 : vector<16x1xf32>
      %152 = math.rsqrt %151 : vector<16x1xf32>
      %153 = vector.broadcast %152 : vector<16x1xf32> to vector<16x32xf32>
      %154 = arith.mulf %144, %153 : vector<16x32xf32>
      %155 = arith.truncf %154 : vector<16x32xf32> to vector<16x32xbf16>
      %c0_102 = arith.constant 0 : index
      %c0_103 = arith.constant 0 : index
      %156 = vector.load %arg5[%c0_102, %c0_103] : memref<32x64xbf16, #tpu.memory_space<vmem>>, vector<32x64xbf16>
      %cst_104 = arith.constant dense<0.000000e+00> : vector<16x64xf32>
      %157 = tpu.matmul %155, %156, %cst_104 {dimension_numbers = #tpu.dot_dimension_numbers<[1], [0], [0], [1], [0, 0, 1, 1], [], []>} : vector<16x32xbf16>, vector<32x64xbf16>, vector<16x64xf32> -> vector<16x64xf32>
      %c0_105 = arith.constant 0 : index
      %c0_106 = arith.constant 0 : index
      %158 = vector.load %arg6[%c0_105, %c0_106] : memref<1x64xf32, #tpu.memory_space<vmem>>, vector<1x64xf32>
      %159 = vector.broadcast %158 : vector<1x64xf32> to vector<16x64xf32>
      %160 = arith.addf %157, %159 : vector<16x64xf32>
      %161 = arith.truncf %160 : vector<16x64xf32> to vector<16x64xbf16>
      %162 = vector.extract_strided_slice %161 {offsets = [0, 0], sizes = [16, 32], strides = [1, 1]} : vector<16x64xbf16> to vector<16x32xbf16>
      %163 = vector.shape_cast %162 : vector<16x32xbf16> to vector<16x4x8xbf16>
      %164 = tpu.transpose %163, [1, 0, 2] : vector<16x4x8xbf16> -> vector<4x16x8xbf16>
      %c0_107 = arith.constant 0 : index
      %c0_108 = arith.constant 0 : index
      %c0_109 = arith.constant 0 : index
      %c0_110 = arith.constant 0 : index
      %165 = vector.load %arg12[%c0_107, %c0_108, %c0_109, %c0_110] : memref<2x4x16x8xbf16, #tpu.memory_space<vmem>>, vector<1x4x16x8xbf16>
      %166 = vector.shape_cast %165 : vector<1x4x16x8xbf16> to vector<4x16x8xbf16>
      %167 = vector.shape_cast %164 : vector<4x16x8xbf16> to vector<1x4x16x8xbf16>
      tpu.vector_store %arg12[%c0_107, %c0_108, %c0_109, %c0_110], %167 {strides = array<i32>} : memref<2x4x16x8xbf16, #tpu.memory_space<vmem>>, vector<1x4x16x8xbf16>,
      %168 = vector.extract_strided_slice %161 {offsets = [0, 32], sizes = [16, 32], strides = [1, 1]} : vector<16x64xbf16> to vector<16x32xbf16>
      %169 = vector.shape_cast %168 : vector<16x32xbf16> to vector<16x4x8xbf16>
      %170 = tpu.transpose %169, [1, 0, 2] : vector<16x4x8xbf16> -> vector<4x16x8xbf16>
      %c1_111 = arith.constant 1 : index
      %c0_112 = arith.constant 0 : index
      %c0_113 = arith.constant 0 : index
      %c0_114 = arith.constant 0 : index
      %171 = vector.load %arg12[%c1_111, %c0_112, %c0_113, %c0_114] : memref<2x4x16x8xbf16, #tpu.memory_space<vmem>>, vector<1x4x16x8xbf16>
      %172 = vector.shape_cast %171 : vector<1x4x16x8xbf16> to vector<4x16x8xbf16>
      %173 = vector.shape_cast %170 : vector<4x16x8xbf16> to vector<1x4x16x8xbf16>
      tpu.vector_store %arg12[%c1_111, %c0_112, %c0_113, %c0_114], %173 {strides = array<i32>} : memref<2x4x16x8xbf16, #tpu.memory_space<vmem>>, vector<1x4x16x8xbf16>,
    } else {
    }
    %cst = arith.constant dense<0.000000e+00> : vector<16xf32>
    %9 = vector.multi_reduction <add>, %5, %cst [1] : vector<16x32xf32> to vector<16xf32>
    %10 = vector.shape_cast %9 : vector<16xf32> to vector<16x1xf32>
    %cst_6 = arith.constant 3.200000e+01 : f32
    %11 = vector.broadcast %cst_6 : f32 to vector<16x1xf32>
    %12 = arith.divf %10, %11 : vector<16x1xf32>
    %13 = vector.broadcast %12 : vector<16x1xf32> to vector<16x32xf32>
    %14 = arith.subf %5, %13 : vector<16x32xf32>
    %15 = arith.mulf %14, %14 : vector<16x32xf32>
    %cst_7 = arith.constant dense<0.000000e+00> : vector<16xf32>
    %16 = vector.multi_reduction <add>, %15, %cst_7 [1] : vector<16x32xf32> to vector<16xf32>
    %17 = vector.shape_cast %16 : vector<16xf32> to vector<16x1xf32>
    %cst_8 = arith.constant 3.200000e+01 : f32
    %18 = vector.broadcast %cst_8 : f32 to vector<16x1xf32>
    %19 = arith.divf %17, %18 : vector<16x1xf32>
    %cst_9 = arith.constant 9.99999974E-6 : f32
    %20 = vector.broadcast %cst_9 : f32 to vector<16x1xf32>
    %21 = arith.addf %19, %20 : vector<16x1xf32>
    %22 = math.rsqrt %21 : vector<16x1xf32>
    %23 = vector.broadcast %22 : vector<16x1xf32> to vector<16x32xf32>
    %24 = arith.mulf %14, %23 : vector<16x32xf32>
    %25 = arith.truncf %24 : vector<16x32xf32> to vector<16x32xbf16>
    %c0_10 = arith.constant 0 : index
    %c0_11 = arith.constant 0 : index
    %26 = vector.load %arg7[%c0_10, %c0_11] : memref<32x128xbf16, #tpu.memory_space<vmem>>, vector<32x128xbf16>
    %cst_12 = arith.constant dense<0.000000e+00> : vector<16x128xf32>
    %27 = tpu.matmul %25, %26, %cst_12 {dimension_numbers = #tpu.dot_dimension_numbers<[1], [0], [0], [1], [0, 0, 1, 1], [], []>} : vector<16x32xbf16>, vector<32x128xbf16>, vector<16x128xf32> -> vector<16x128xf32>
    %c0_13 = arith.constant 0 : index
    %c0_14 = arith.constant 0 : index
    %28 = vector.load %arg8[%c0_13, %c0_14] : memref<1x128xf32, #tpu.memory_space<vmem>>, vector<1x128xf32>
    %29 = vector.broadcast %28 : vector<1x128xf32> to vector<16x128xf32>
    %30 = arith.addf %27, %29 : vector<16x128xf32>
    %31 = arith.truncf %30 : vector<16x128xf32> to vector<16x128xbf16>
    %c16_i32 = arith.constant 16 : i32
    %32 = arith.muli %arg2, %c16_i32 : i32
    %33 = tpu.iota {dimensions = array<i32: 2>} : vector<1x1x16xi32>
    %34 = vector.broadcast %32 : i32 to vector<1x1x16xi32>
    %35 = arith.addi %34, %33 : vector<1x1x16xi32>
    %c10_i32 = arith.constant 10 : i32
    %36 = vector.broadcast %c10_i32 : i32 to vector<1x1x16xi32>
    %37 = arith.cmpi slt, %35, %36 : vector<1x1x16xi32>
    %38 = vector.extract_strided_slice %31 {offsets = [0, 0], sizes = [16, 32], strides = [1, 1]} : vector<16x128xbf16> to vector<16x32xbf16>
    %39 = vector.shape_cast %38 : vector<16x32xbf16> to vector<16x4x8xbf16>
    %40 = tpu.transpose %39, [1, 0, 2] : vector<16x4x8xbf16> -> vector<4x16x8xbf16>
    %41 = vector.extract_strided_slice %31 {offsets = [0, 32], sizes = [16, 32], strides = [1, 1]} : vector<16x128xbf16> to vector<16x32xbf16>
    %42 = vector.shape_cast %41 : vector<16x32xbf16> to vector<16x4x8xbf16>
    %43 = tpu.transpose %42, [1, 0, 2] : vector<16x4x8xbf16> -> vector<4x16x8xbf16>
    %c0_15 = arith.constant 0 : index
    %c0_16 = arith.constant 0 : index
    %c0_17 = arith.constant 0 : index
    %c0_18 = arith.constant 0 : index
    %44 = vector.load %arg12[%c0_15, %c0_16, %c0_17, %c0_18] : memref<2x4x16x8xbf16, #tpu.memory_space<vmem>>, vector<1x4x16x8xbf16>
    %45 = vector.shape_cast %44 : vector<1x4x16x8xbf16> to vector<4x16x8xbf16>
    "tpu.trace_start"() <{level = 10 : i32, message = "hqd,hkd->hqk"}> : () -> ()
    %cst_19 = arith.constant dense<0.000000e+00> : vector<4x16x16xf32>
    %46 = tpu.matmul %45, %40, %cst_19 {dimension_numbers = #tpu.dot_dimension_numbers<[2], [2], [1], [1], [0, 0, 0, 1, 1, 1], [0], [0]>} : vector<4x16x8xbf16>, vector<4x16x8xbf16>, vector<4x16x16xf32> -> vector<4x16x16xf32>
    %cst_20 = arith.constant -1.000000e+30 : f32
    "tpu.trace_stop"() : () -> ()
    %47 = vector.shape_cast %37 : vector<1x1x16xi1> to vector<1x1x16xi1>
    %48 = vector.broadcast %47 : vector<1x1x16xi1> to vector<4x16x16xi1>
    %49 = vector.broadcast %cst_20 : f32 to vector<4x16x16xf32>
    %50 = arith.select %48, %46, %49 : vector<4x16x16xi1>, vector<4x16x16xf32>
    %c0_21 = arith.constant 0 : index
    %c0_22 = arith.constant 0 : index
    %c0_23 = arith.constant 0 : index
    %c0_24 = arith.constant 0 : index
    %51 = vector.load %arg13[%c0_21, %c0_22, %c0_23, %c0_24] : memref<2x4x16x1xf32, #tpu.memory_space<vmem>>, vector<1x4x16x1xf32>
    %52 = vector.shape_cast %51 : vector<1x4x16x1xf32> to vector<4x16x1xf32>
    %cst_25 = arith.constant dense<0xFF800000> : vector<4x16xf32>
    %53 = vector.multi_reduction <maximumf>, %50, %cst_25 [2] : vector<4x16x16xf32> to vector<4x16xf32>
    %54 = vector.shape_cast %53 : vector<4x16xf32> to vector<4x16x1xf32>
    %55 = arith.maximumf %52, %54 : vector<4x16x1xf32>
    %56 = arith.subf %52, %55 : vector<4x16x1xf32>
    %57 = math.exp %56 : vector<4x16x1xf32>
    %58 = vector.broadcast %55 : vector<4x16x1xf32> to vector<4x16x16xf32>
    %59 = arith.subf %50, %58 : vector<4x16x16xf32>
    %60 = arith.truncf %59 : vector<4x16x16xf32> to vector<4x16x16xbf16>
    %61 = math.exp %60 : vector<4x16x16xbf16>
    %c0_26 = arith.constant 0 : index
    %c0_27 = arith.constant 0 : index
    %c0_28 = arith.constant 0 : index
    %c0_29 = arith.constant 0 : index
    %62 = vector.load %arg14[%c0_26, %c0_27, %c0_28, %c0_29] : memref<2x4x16x1xf32, #tpu.memory_space<vmem>>, vector<1x4x16x1xf32>
    %63 = vector.shape_cast %62 : vector<1x4x16x1xf32> to vector<4x16x1xf32>
    %64 = arith.mulf %57, %63 : vector<4x16x1xf32>
    %65 = arith.extf %61 : vector<4x16x16xbf16> to vector<4x16x16xf32>
    %cst_30 = arith.constant dense<0.000000e+00> : vector<4x16xf32>
    %66 = vector.multi_reduction <add>, %65, %cst_30 [2] : vector<4x16x16xf32> to vector<4x16xf32>
    %67 = vector.shape_cast %66 : vector<4x16xf32> to vector<4x16x1xf32>
    %68 = arith.addf %64, %67 : vector<4x16x1xf32>
    %c0_31 = arith.constant 0 : index
    %c0_32 = arith.constant 0 : index
    %c0_33 = arith.constant 0 : index
    %c0_34 = arith.constant 0 : index
    %69 = vector.load %arg14[%c0_31, %c0_32, %c0_33, %c0_34] : memref<2x4x16x1xf32, #tpu.memory_space<vmem>>, vector<1x4x16x1xf32>
    %70 = vector.shape_cast %69 : vector<1x4x16x1xf32> to vector<4x16x1xf32>
    %71 = vector.shape_cast %68 : vector<4x16x1xf32> to vector<1x4x16x1xf32>
    tpu.vector_store %arg14[%c0_31, %c0_32, %c0_33, %c0_34], %71 {strides = array<i32>} : memref<2x4x16x1xf32, #tpu.memory_space<vmem>>, vector<1x4x16x1xf32>,
    %c0_35 = arith.constant 0 : index
    %c0_36 = arith.constant 0 : index
    %c0_37 = arith.constant 0 : index
    %c0_38 = arith.constant 0 : index
    %72 = vector.load %arg15[%c0_35, %c0_36, %c0_37, %c0_38] : memref<2x4x16x8xf32, #tpu.memory_space<vmem>>, vector<1x4x16x8xf32>
    %73 = vector.shape_cast %72 : vector<1x4x16x8xf32> to vector<4x16x8xf32>
    %74 = vector.broadcast %57 : vector<4x16x1xf32> to vector<4x16x8xf32>
    %75 = arith.mulf %74, %73 : vector<4x16x8xf32>
    "tpu.trace_start"() <{level = 10 : i32, message = "hqk,hkd->hqd"}> : () -> ()
    %cst_39 = arith.constant dense<0.000000e+00> : vector<4x16x8xf32>
    %76 = tpu.matmul %61, %43, %cst_39 {dimension_numbers = #tpu.dot_dimension_numbers<[2], [1], [1], [2], [0, 0, 0, 1, 1, 2], [0], [0]>} : vector<4x16x16xbf16>, vector<4x16x8xbf16>, vector<4x16x8xf32> -> vector<4x16x8xf32>
    "tpu.trace_stop"() : () -> ()
    %77 = arith.addf %75, %76 : vector<4x16x8xf32>
    %c0_40 = arith.constant 0 : index
    %c0_41 = arith.constant 0 : index
    %c0_42 = arith.constant 0 : index
    %c0_43 = arith.constant 0 : index
    %78 = vector.load %arg15[%c0_40, %c0_41, %c0_42, %c0_43] : memref<2x4x16x8xf32, #tpu.memory_space<vmem>>, vector<1x4x16x8xf32>
    %79 = vector.shape_cast %78 : vector<1x4x16x8xf32> to vector<4x16x8xf32>
    %80 = vector.shape_cast %77 : vector<4x16x8xf32> to vector<1x4x16x8xf32>
    tpu.vector_store %arg15[%c0_40, %c0_41, %c0_42, %c0_43], %80 {strides = array<i32>} : memref<2x4x16x8xf32, #tpu.memory_space<vmem>>, vector<1x4x16x8xf32>,
    %c0_44 = arith.constant 0 : index
    %c0_45 = arith.constant 0 : index
    %c0_46 = arith.constant 0 : index
    %c0_47 = arith.constant 0 : index
    %81 = vector.load %arg13[%c0_44, %c0_45, %c0_46, %c0_47] : memref<2x4x16x1xf32, #tpu.memory_space<vmem>>, vector<1x4x16x1xf32>
    %82 = vector.shape_cast %81 : vector<1x4x16x1xf32> to vector<4x16x1xf32>
    %83 = vector.shape_cast %55 : vector<4x16x1xf32> to vector<1x4x16x1xf32>
    tpu.vector_store %arg13[%c0_44, %c0_45, %c0_46, %c0_47], %83 {strides = array<i32>} : memref<2x4x16x1xf32, #tpu.memory_space<vmem>>, vector<1x4x16x1xf32>,
    %84 = vector.extract_strided_slice %31 {offsets = [0, 64], sizes = [16, 32], strides = [1, 1]} : vector<16x128xbf16> to vector<16x32xbf16>
    %85 = vector.shape_cast %84 : vector<16x32xbf16> to vector<16x4x8xbf16>
    %86 = tpu.transpose %85, [1, 0, 2] : vector<16x4x8xbf16> -> vector<4x16x8xbf16>
    %87 = vector.extract_strided_slice %31 {offsets = [0, 96], sizes = [16, 32], strides = [1, 1]} : vector<16x128xbf16> to vector<16x32xbf16>
    %88 = vector.shape_cast %87 : vector<16x32xbf16> to vector<16x4x8xbf16>
    %89 = tpu.transpose %88, [1, 0, 2] : vector<16x4x8xbf16> -> vector<4x16x8xbf16>
    %c1 = arith.constant 1 : index
    %c0_48 = arith.constant 0 : index
    %c0_49 = arith.constant 0 : index
    %c0_50 = arith.constant 0 : index
    %90 = vector.load %arg12[%c1, %c0_48, %c0_49, %c0_50] : memref<2x4x16x8xbf16, #tpu.memory_space<vmem>>, vector<1x4x16x8xbf16>
    %91 = vector.shape_cast %90 : vector<1x4x16x8xbf16> to vector<4x16x8xbf16>
    "tpu.trace_start"() <{level = 10 : i32, message = "hqd,hkd->hqk"}> : () -> ()
    %cst_51 = arith.constant dense<0.000000e+00> : vector<4x16x16xf32>
    %92 = tpu.matmul %91, %86, %cst_51 {dimension_numbers = #tpu.dot_dimension_numbers<[2], [2], [1], [1], [0, 0, 0, 1, 1, 1], [0], [0]>} : vector<4x16x8xbf16>, vector<4x16x8xbf16>, vector<4x16x16xf32> -> vector<4x16x16xf32>
    %cst_52 = arith.constant -1.000000e+30 : f32
    "tpu.trace_stop"() : () -> ()
    %93 = vector.shape_cast %37 : vector<1x1x16xi1> to vector<1x1x16xi1>
    %94 = vector.broadcast %93 : vector<1x1x16xi1> to vector<4x16x16xi1>
    %95 = vector.broadcast %cst_52 : f32 to vector<4x16x16xf32>
    %96 = arith.select %94, %92, %95 : vector<4x16x16xi1>, vector<4x16x16xf32>
    %c1_53 = arith.constant 1 : index
    %c0_54 = arith.constant 0 : index
    %c0_55 = arith.constant 0 : index
    %c0_56 = arith.constant 0 : index
    %97 = vector.load %arg13[%c1_53, %c0_54, %c0_55, %c0_56] : memref<2x4x16x1xf32, #tpu.memory_space<vmem>>, vector<1x4x16x1xf32>
    %98 = vector.shape_cast %97 : vector<1x4x16x1xf32> to vector<4x16x1xf32>
    %cst_57 = arith.constant dense<0xFF800000> : vector<4x16xf32>
    %99 = vector.multi_reduction <maximumf>, %96, %cst_57 [2] : vector<4x16x16xf32> to vector<4x16xf32>
    %100 = vector.shape_cast %99 : vector<4x16xf32> to vector<4x16x1xf32>
    %101 = arith.maximumf %98, %100 : vector<4x16x1xf32>
    %102 = arith.subf %98, %101 : vector<4x16x1xf32>
    %103 = math.exp %102 : vector<4x16x1xf32>
    %104 = vector.broadcast %101 : vector<4x16x1xf32> to vector<4x16x16xf32>
    %105 = arith.subf %96, %104 : vector<4x16x16xf32>
    %106 = arith.truncf %105 : vector<4x16x16xf32> to vector<4x16x16xbf16>
    %107 = math.exp %106 : vector<4x16x16xbf16>
    %c1_58 = arith.constant 1 : index
    %c0_59 = arith.constant 0 : index
    %c0_60 = arith.constant 0 : index
    %c0_61 = arith.constant 0 : index
    %108 = vector.load %arg14[%c1_58, %c0_59, %c0_60, %c0_61] : memref<2x4x16x1xf32, #tpu.memory_space<vmem>>, vector<1x4x16x1xf32>
    %109 = vector.shape_cast %108 : vector<1x4x16x1xf32> to vector<4x16x1xf32>
    %110 = arith.mulf %103, %109 : vector<4x16x1xf32>
    %111 = arith.extf %107 : vector<4x16x16xbf16> to vector<4x16x16xf32>
    %cst_62 = arith.constant dense<0.000000e+00> : vector<4x16xf32>
    %112 = vector.multi_reduction <add>, %111, %cst_62 [2] : vector<4x16x16xf32> to vector<4x16xf32>
    %113 = vector.shape_cast %112 : vector<4x16xf32> to vector<4x16x1xf32>
    %114 = arith.addf %110, %113 : vector<4x16x1xf32>
    %c1_63 = arith.constant 1 : index
    %c0_64 = arith.constant 0 : index
    %c0_65 = arith.constant 0 : index
    %c0_66 = arith.constant 0 : index
    %115 = vector.load %arg14[%c1_63, %c0_64, %c0_65, %c0_66] : memref<2x4x16x1xf32, #tpu.memory_space<vmem>>, vector<1x4x16x1xf32>
    %116 = vector.shape_cast %115 : vector<1x4x16x1xf32> to vector<4x16x1xf32>
    %117 = vector.shape_cast %114 : vector<4x16x1xf32> to vector<1x4x16x1xf32>
    tpu.vector_store %arg14[%c1_63, %c0_64, %c0_65, %c0_66], %117 {strides = array<i32>} : memref<2x4x16x1xf32, #tpu.memory_space<vmem>>, vector<1x4x16x1xf32>,
    %c1_67 = arith.constant 1 : index
    %c0_68 = arith.constant 0 : index
    %c0_69 = arith.constant 0 : index
    %c0_70 = arith.constant 0 : index
    %118 = vector.load %arg15[%c1_67, %c0_68, %c0_69, %c0_70] : memref<2x4x16x8xf32, #tpu.memory_space<vmem>>, vector<1x4x16x8xf32>
    %119 = vector.shape_cast %118 : vector<1x4x16x8xf32> to vector<4x16x8xf32>
    %120 = vector.broadcast %103 : vector<4x16x1xf32> to vector<4x16x8xf32>
    %121 = arith.mulf %120, %119 : vector<4x16x8xf32>
    "tpu.trace_start"() <{level = 10 : i32, message = "hqk,hkd->hqd"}> : () -> ()
    %cst_71 = arith.constant dense<0.000000e+00> : vector<4x16x8xf32>
    %122 = tpu.matmul %107, %89, %cst_71 {dimension_numbers = #tpu.dot_dimension_numbers<[2], [1], [1], [2], [0, 0, 0, 1, 1, 2], [0], [0]>} : vector<4x16x16xbf16>, vector<4x16x8xbf16>, vector<4x16x8xf32> -> vector<4x16x8xf32>
    "tpu.trace_stop"() : () -> ()
    %123 = arith.addf %121, %122 : vector<4x16x8xf32>
    %c1_72 = arith.constant 1 : index
    %c0_73 = arith.constant 0 : index
    %c0_74 = arith.constant 0 : index
    %c0_75 = arith.constant 0 : index
    %124 = vector.load %arg15[%c1_72, %c0_73, %c0_74, %c0_75] : memref<2x4x16x8xf32, #tpu.memory_space<vmem>>, vector<1x4x16x8xf32>
    %125 = vector.shape_cast %124 : vector<1x4x16x8xf32> to vector<4x16x8xf32>
    %126 = vector.shape_cast %123 : vector<4x16x8xf32> to vector<1x4x16x8xf32>
    tpu.vector_store %arg15[%c1_72, %c0_73, %c0_74, %c0_75], %126 {strides = array<i32>} : memref<2x4x16x8xf32, #tpu.memory_space<vmem>>, vector<1x4x16x8xf32>,
    %c1_76 = arith.constant 1 : index
    %c0_77 = arith.constant 0 : index
    %c0_78 = arith.constant 0 : index
    %c0_79 = arith.constant 0 : index
    %127 = vector.load %arg13[%c1_76, %c0_77, %c0_78, %c0_79] : memref<2x4x16x1xf32, #tpu.memory_space<vmem>>, vector<1x4x16x1xf32>
    %128 = vector.shape_cast %127 : vector<1x4x16x1xf32> to vector<4x16x1xf32>
    %129 = vector.shape_cast %101 : vector<4x16x1xf32> to vector<1x4x16x1xf32>
    tpu.vector_store %arg13[%c1_76, %c0_77, %c0_78, %c0_79], %129 {strides = array<i32>} : memref<2x4x16x1xf32, #tpu.memory_space<vmem>>, vector<1x4x16x1xf32>,
    %c0_i32_80 = arith.constant 0 : i32
    %130 = arith.cmpi eq, %arg2, %c0_i32_80 : i32
    %131 = arith.extui %130 : i1 to i32
    %c0_i32_81 = arith.constant 0 : i32
    %132 = arith.cmpi ne, %131, %c0_i32_81 : i32
    scf.if %132 {
      %c0_82 = arith.constant 0 : index
      %c0_83 = arith.constant 0 : index
      %c0_84 = arith.constant 0 : index
      %c0_85 = arith.constant 0 : index
      %133 = vector.load %arg14[%c0_82, %c0_83, %c0_84, %c0_85] : memref<2x4x16x1xf32, #tpu.memory_space<vmem>>, vector<1x4x16x1xf32>
      %134 = vector.shape_cast %133 : vector<1x4x16x1xf32> to vector<4x16x1xf32>
      %135 = tpu.reciprocal %134 {approx = true} : vector<4x16x1xf32> -> vector<4x16x1xf32>
      %c0_86 = arith.constant 0 : index
      %c0_87 = arith.constant 0 : index
      %c0_88 = arith.constant 0 : index
      %c0_89 = arith.constant 0 : index
      %136 = vector.load %arg15[%c0_86, %c0_87, %c0_88, %c0_89] : memref<2x4x16x8xf32, #tpu.memory_space<vmem>>, vector<1x4x16x8xf32>
      %137 = vector.shape_cast %136 : vector<1x4x16x8xf32> to vector<4x16x8xf32>
      %138 = vector.broadcast %135 : vector<4x16x1xf32> to vector<4x16x8xf32>
      %139 = arith.mulf %137, %138 : vector<4x16x8xf32>
      %140 = arith.truncf %139 : vector<4x16x8xf32> to vector<4x16x8xbf16>
      %141 = tpu.transpose %140, [1, 0, 2] : vector<4x16x8xbf16> -> vector<16x4x8xbf16>
      %142 = vector.shape_cast %141 : vector<16x4x8xbf16> to vector<16x32xbf16>
      %c0_90 = arith.constant 0 : index
      %c0_91 = arith.constant 0 : index
      %c0_92 = arith.constant 0 : index
      %143 = vector.load %arg9[%c0_90, %c0_91, %c0_92] : memref<2x32x32xbf16, #tpu.memory_space<vmem>>, vector<1x32x32xbf16>
      %144 = vector.shape_cast %143 : vector<1x32x32xbf16> to vector<32x32xbf16>
      %cst_93 = arith.constant dense<0.000000e+00> : vector<16x32xf32>
      %145 = tpu.matmul %142, %144, %cst_93 {dimension_numbers = #tpu.dot_dimension_numbers<[1], [0], [0], [1], [0, 0, 1, 1], [], []>} : vector<16x32xbf16>, vector<32x32xbf16>, vector<16x32xf32> -> vector<16x32xf32>
      %146 = arith.addf %2, %145 : vector<16x32xf32>
      %c1_94 = arith.constant 1 : index
      %c0_95 = arith.constant 0 : index
      %c0_96 = arith.constant 0 : index
      %c0_97 = arith.constant 0 : index
      %147 = vector.load %arg14[%c1_94, %c0_95, %c0_96, %c0_97] : memref<2x4x16x1xf32, #tpu.memory_space<vmem>>, vector<1x4x16x1xf32>
      %148 = vector.shape_cast %147 : vector<1x4x16x1xf32> to vector<4x16x1xf32>
      %149 = tpu.reciprocal %148 {approx = true} : vector<4x16x1xf32> -> vector<4x16x1xf32>
      %c1_98 = arith.constant 1 : index
      %c0_99 = arith.constant 0 : index
      %c0_100 = arith.constant 0 : index
      %c0_101 = arith.constant 0 : index
      %150 = vector.load %arg15[%c1_98, %c0_99, %c0_100, %c0_101] : memref<2x4x16x8xf32, #tpu.memory_space<vmem>>, vector<1x4x16x8xf32>
      %151 = vector.shape_cast %150 : vector<1x4x16x8xf32> to vector<4x16x8xf32>
      %152 = vector.broadcast %149 : vector<4x16x1xf32> to vector<4x16x8xf32>
      %153 = arith.mulf %151, %152 : vector<4x16x8xf32>
      %154 = arith.truncf %153 : vector<4x16x8xf32> to vector<4x16x8xbf16>
      %155 = tpu.transpose %154, [1, 0, 2] : vector<4x16x8xbf16> -> vector<16x4x8xbf16>
      %156 = vector.shape_cast %155 : vector<16x4x8xbf16> to vector<16x32xbf16>
      %c1_102 = arith.constant 1 : index
      %c0_103 = arith.constant 0 : index
      %c0_104 = arith.constant 0 : index
      %157 = vector.load %arg9[%c1_102, %c0_103, %c0_104] : memref<2x32x32xbf16, #tpu.memory_space<vmem>>, vector<1x32x32xbf16>
      %158 = vector.shape_cast %157 : vector<1x32x32xbf16> to vector<32x32xbf16>
      %cst_105 = arith.constant dense<0.000000e+00> : vector<16x32xf32>
      %159 = tpu.matmul %156, %158, %cst_105 {dimension_numbers = #tpu.dot_dimension_numbers<[1], [0], [0], [1], [0, 0, 1, 1], [], []>} : vector<16x32xbf16>, vector<32x32xbf16>, vector<16x32xf32> -> vector<16x32xf32>
      %160 = arith.addf %146, %159 : vector<16x32xf32>
      %c0_106 = arith.constant 0 : index
      %c0_107 = arith.constant 0 : index
      %161 = vector.load %arg10[%c0_106, %c0_107] : memref<1x32xf32, #tpu.memory_space<vmem>>, vector<1x32xf32>
      %162 = vector.broadcast %161 : vector<1x32xf32> to vector<16x32xf32>
      %163 = arith.addf %160, %162 : vector<16x32xf32>
      %164 = arith.truncf %163 : vector<16x32xf32> to vector<16x32xbf16>
      %c0_108 = arith.constant 0 : index
      %c0_109 = arith.constant 0 : index
      %c0_110 = arith.constant 0 : index
      %165 = vector.load %arg11[%c0_108, %c0_109, %c0_110] : memref<1x16x32xbf16, #tpu.memory_space<vmem>>, vector<1x16x32xbf16>
      %166 = vector.shape_cast %165 : vector<1x16x32xbf16> to vector<16x32xbf16>
      %167 = vector.shape_cast %164 : vector<16x32xbf16> to vector<1x16x32xbf16>
      tpu.vector_store %arg11[%c0_108, %c0_109, %c0_110], %167 {strides = array<i32>} : memref<1x16x32xbf16, #tpu.memory_space<vmem>>, vector<1x16x32xbf16>,
    } else {
    }
    return
  }
  func.func @transform_0(%arg0: i32, %arg1: i32, %arg2: i32) -> (i32, i32, i32) {
    %c0_i32 = arith.constant 0 : i32
    %c0_i32_0 = arith.constant 0 : i32
    return %arg0, %arg1, %c0_i32 : i32, i32, i32
  }
  func.func @transform_1(%arg0: i32, %arg1: i32, %arg2: i32) -> (i32, i32, i32) {
    %c0_i32 = arith.constant 0 : i32
    %c0_i32_0 = arith.constant 0 : i32
    return %arg0, %arg2, %c0_i32 : i32, i32, i32
  }
  func.func @transform_2(%arg0: i32, %arg1: i32, %arg2: i32) -> (i32, i32) {
    %c0_i32 = arith.constant 0 : i32
    %c0_i32_0 = arith.constant 0 : i32
    %c0_i32_1 = arith.constant 0 : i32
    return %c0_i32, %c0_i32_0 : i32, i32
  }
  func.func @transform_3(%arg0: i32, %arg1: i32, %arg2: i32) -> (i32, i32) {
    %c0_i32 = arith.constant 0 : i32
    %c0_i32_0 = arith.constant 0 : i32
    %c0_i32_1 = arith.constant 0 : i32
    return %c0_i32, %c0_i32_0 : i32, i32
  }
  func.func @transform_4(%arg0: i32, %arg1: i32, %arg2: i32) -> (i32, i32) {
    %c0_i32 = arith.constant 0 : i32
    %c0_i32_0 = arith.constant 0 : i32
    %c0_i32_1 = arith.constant 0 : i32
    return %c0_i32, %c0_i32_0 : i32, i32
  }
  func.func @transform_5(%arg0: i32, %arg1: i32, %arg2: i32) -> (i32, i32) {
    %c0_i32 = arith.constant 0 : i32
    %c0_i32_0 = arith.constant 0 : i32
    %c0_i32_1 = arith.constant 0 : i32
    return %c0_i32, %c0_i32_0 : i32, i32
  }
  func.func @transform_6(%arg0: i32, %arg1: i32, %arg2: i32) -> (i32, i32, i32) {
    %c0_i32 = arith.constant 0 : i32
    %c0_i32_0 = arith.constant 0 : i32
    %c0_i32_1 = arith.constant 0 : i32
    %c0_i32_2 = arith.constant 0 : i32
    return %c0_i32, %c0_i32_0, %c0_i32_1 : i32, i32, i32
  }
  func.func @transform_7(%arg0: i32, %arg1: i32, %arg2: i32) -> (i32, i32) {
    %c0_i32 = arith.constant 0 : i32
    %c0_i32_0 = arith.constant 0 : i32
    %c0_i32_1 = arith.constant 0 : i32
    return %c0_i32, %c0_i32_0 : i32, i32
  }
  func.func @transform_8(%arg0: i32, %arg1: i32, %arg2: i32) -> (i32, i32, i32) {
    %c0_i32 = arith.constant 0 : i32
    %c0_i32_0 = arith.constant 0 : i32
    return %arg0, %arg1, %c0_i32 : i32, i32, i32
  }
}

</mosaic_0001>

<bundles_post_ra>
// kernel: tpu_custom_call.1
= control target key start
LH: loop header
LB: loop body
LE: loop exit
PB: predicated region body
PF: predicated region fallthrough
CT: control target
= control target key end

     0   :  { %s7087_s0 = inlined_call_operand.hbm [shape: bf16[2,16,32], index: 0, kind: input, shape index: {}]   ;;  %s7088_s1 = inlined_call_operand.hbm [shape: bf16[2,16,32], index: 1, kind: input, shape index: {}]   ;;  %s7089_s2 = inlined_call_operand.hbm [shape: bf16[32,64], index: 2, kind: input, shape index: {}]   ;;  %s7090_s3 = inlined_call_operand.hbm [shape: f32[1,64], index: 3, kind: input, shape index: {}]   ;;  %s7091_s4 = inlined_call_operand.hbm [shape: bf16[32,128], index: 4, kind: input, shape index: {}]   ;;  %s7092_s5 = inlined_call_operand.hbm [shape: f32[1,128], index: 5, kind: input, shape index: {}]   ;;  %s7093_s6 = inlined_call_operand.hbm [shape: bf16[2,32,32], index: 6, kind: input, shape index: {}]   ;;  %s7094_s7 = inlined_call_operand.hbm [shape: f32[1,32], index: 7, kind: input, shape index: {}]   ;;  %s7095_s8 = inlined_call_operand.hbm [shape: bf16[2,16,32], index: 8, kind: output, shape index: {}]  }
   0x1   :  { %7115 = sst [smem:[#allocation45_spill]] %s7087_s0 }
   0x2   :  { %7116 = sst [smem:[#allocation46_spill]] %s7089_s2 }
   0x3   :  { %7117 = sst [smem:[#allocation47_spill]] %s7090_s3 }
   0x4   :  { %7118 = sst [smem:[#allocation48_spill]] %s7091_s4 }
   0x5   :  { %7119 = sst [smem:[#allocation49_spill]] %s7092_s5 }
   0x6   :  { %7120 = sst [smem:[#allocation50_spill]] %s7093_s6 }
   0x7   :  { %7121 = sst [smem:[#allocation51_spill]] %s7094_s7 }
   0x8   :  { %7122 = sst [smem:[#allocation52_spill]] %s7095_s8 }
   0x9   :  { %13 = vsyncpa [#allocation7], 0 }
   0xa   :  { %15 = vsyncpa [#allocation7 + $0x1], 0 }
   0xb   :  { %16 = vsyncpa [#allocation10], 0 }
   0xc   :  { %18 = vsyncpa [#allocation10 + $0x1], 0 }
   0xd   :  { %19 = vsyncpa [#allocation13], 0 }
   0xe   :  { %20 = vsyncpa [#allocation16], 0 }
   0xf   :  { %21 = vsyncpa [#allocation19], 0 }
  0x10   :  { %22 = vsyncpa [#allocation8], 0 }
  0x11   :  { %24 = vsyncpa [#allocation8 + $0x1], 0  ;;  %s5651_s27 = smov 0   ;;  %s5653_s28 = smov 0  }
  0x12   :  { %s5655_s29 = smov 0   ;;  %s5657_s30 = smov 0  }
  0x13   :  { %s5659_s9 = smov 0   ;;  %s5661_s10 = smov 0  }
  0x14 LB: > { %7123 = sst [smem:[#allocation28_spill]] %s5569_s30  ;;  %s5682_s11 = sadd.s32 4294967295, %s5577_s10   ;;  %s5577_s10 = sphi %s5661_s10, %s30_s10   ;;  %s5573_s9 = sphi %s5659_s9, %s7209_s9   ;;  %s5569_s30 = sphi %s5657_s30, %s7208_s30   ;;  %s5565_s29 = sphi %s5655_s29, %s7207_s29   ;;  %s5561_s28 = sphi %s5653_s28, %s7206_s28   ;;  %s5557_s27 = sphi %s5651_s27, %s7205_s27  }
  0x15   : > { %p4724_p0 = scmp.ge.s32.totalorder %s5577_s10, 1  ;;  %p7097_p1 = scmp.eq.s32.totalorder %s5682_s11, 0 }
  0x16   : > { %p264_p2 = scmp.lt.s32.totalorder %s5577_s10, 3  ;;  %s5579_s13 = smov [#allocation11]  }
  0x17   : > { %s276_s14 = sshll.u32 %s5579_s13, 4  ;;  %s5580_s16 = smov [#allocation12]   ;;  %s5691_s14 = int_to_ptr.vmem [resolvable:$true] %s276_s14 }
  0x18   : > { %p5687_p3 = pnand %p4724_p0, %p264_p2  ;;  %s290_s17 = sshll.u32 %s5580_s16, 4  ;;  %s5702_s17 = int_to_ptr.vmem [resolvable:$true] %s290_s17 }
  0x19   : > { %s5581_s18 = smov [#allocation15]   ;;  %s7126_s2 = sld [smem:[#allocation46_spill]] }
  0x1a   : > { %s7124_s12 = scalar_select %p5687_p3, 1, 0 }
  0x1b   : > { %p5033_p4 = pneg %p5687_p3  ;;  %s5704_s19 = sshll.u32 %s5581_s18, 4  ;;  %s315_s19 = int_to_ptr.vmem [resolvable:$true] %s5704_s19 }
  0x1d   : > { %p5698_p6 = pnand %p5033_p4, %p7097_p1 }
  0x1f   : > { %s5247_s22 = scalar_lea.hbm %s7126_s2, 256  ;;  %p5714_p8 = pneg %p5698_p6 }
  0x20   : > { %p5248_p7 = scmp.ne.s32.totalorder %s7126_s2, %s5247_s22  ;;  %p5254_p11 = scmp.lt.u32.totalorder %s5247_s22, %s7126_s2 }
  0x22   : > { %p5250_p9 = pnand %p5714_p8, %p5248_p7 }
  0x24   : > { %p5251_p10 = pneg %p5250_p9 }
  0x26   : > { %p5256_p12 = pnand %p5254_p11, %p5251_p10 }
  0x28   : > { %5259 = shalt.err (!%p5256_p12)
}
  0x29   : > { %s5260_s16 = scalar_lea.vmem %s5691_s14, 256  ;;  %p5268_p4 = scmp.lt.s32.totalorder %s5691_s14, %s5691_s14 }
  0x2a   : > { %p5261_p13 = scmp.ne.s32.totalorder %s5691_s14, %s5260_s16  ;;  %p5269_p5 = scmp.lt.s32.totalorder %s5260_s16, %s5260_s16 }
  0x2c   : > { %p5263_p0 = pnand %p5261_p13, %p5714_p8  ;;  %p5270_p7 = por %p5269_p5, %p5268_p4 }
  0x2e   : > { %p5264_p2 = pneg %p5263_p0 }
  0x30   : > { %p5271_p9 = pnand %p5270_p7, %p5264_p2 }
  0x32   : > { %5274 = shalt.err (!%p5271_p9)
}
  0x33   : > { %s7099_s18 = smov 64   ;;  %s7101_s20 = smov 4  }
  0x34   : > { %5036 = dma.hbm_to_vmem [thread:$0]  (!%p5698_p6), %s7126_s2, 256, %s5691_s14, [#allocation10], %s7099_s18, %s7099_s18, %s7101_s20  }
  0x35   : > { %s7128_s3 = sld [smem:[#allocation47_spill]] }
  0x3b   : > { %s5275_s26 = scalar_lea.hbm %s7128_s3, 16 }
  0x3c   : > { %p5276_p5 = scmp.ne.s32.totalorder %s7128_s3, %s5275_s26  ;;  %p5282_p12 = scmp.lt.u32.totalorder %s5275_s26, %s7128_s3 }
  0x3e   : > { %p5278_p10 = pnand %p5276_p5, %p5714_p8 }
  0x40   : > { %p5279_p11 = pneg %p5278_p10 }
  0x42   : > { %p5284_p13 = pnand %p5282_p12, %p5279_p11 }
  0x44   : > { %5287 = shalt.err (!%p5284_p13)
}
  0x45   : > { %s5288_s14 = scalar_lea.vmem %s5702_s17, 16  ;;  %s5295_s21 = scalar_lea.vmem %s5702_s17, 32 }
  0x46   : > { %p5289_p0 = scmp.ne.s32.totalorder %s5702_s17, %s5288_s14  ;;  %p5296_p7 = scmp.lt.s32.totalorder %s5702_s17, %s5702_s17 }
  0x47   : > { %p5297_p9 = scmp.lt.s32.totalorder %s5295_s21, %s5288_s14 }
  0x48   : > { %p5291_p2 = pnand %p5289_p0, %p5714_p8 }
  0x49   : > { %p5298_p5 = por %p5297_p9, %p5296_p7 }
  0x4a   : > { %p5292_p4 = pneg %p5291_p2 }
  0x4c   : > { %p5299_p10 = pnand %p5298_p5, %p5292_p4 }
  0x4e   : > { %5302 = shalt.err (!%p5299_p10)
}
  0x4f   : > { %5039 = dma.hbm_to_vmem [thread:$0]  (!%p5698_p6), %s7128_s3, 16, %s5702_s17, [#allocation13]  }
  0x50   : > { %s7129_s5 = sld [smem:[#allocation49_spill]] }
  0x56   : > { %s5303_s24 = scalar_lea.hbm %s7129_s5, 16 }
  0x57   : > { %p5304_p11 = scmp.ne.s32.totalorder %s7129_s5, %s5303_s24  ;;  %p5310_p0 = scmp.lt.u32.totalorder %s5303_s24, %s7129_s5 }
  0x59   : > { %p5306_p12 = pnand %p5304_p11, %p5714_p8 }
  0x5b   : > { %p5307_p13 = pneg %p5306_p12 }
  0x5d   : > { %p5312_p2 = pnand %p5310_p0, %p5307_p13 }
  0x5f   : > { %5315 = shalt.err (!%p5312_p2)
}
  0x60   : > { %s5316_s21 = scalar_lea.vmem %s315_s19, 16  ;;  %s5323_s17 = scalar_lea.vmem %s315_s19, 32 }
  0x61   : > { %p5317_p4 = scmp.ne.s32.totalorder %s315_s19, %s5316_s21  ;;  %p5324_p5 = scmp.lt.s32.totalorder %s315_s19, %s315_s19 }
  0x62   : > { %p5325_p10 = scmp.lt.s32.totalorder %s5323_s17, %s5316_s21 }
  0x63   : > { %p5319_p7 = pnand %p5317_p4, %p5714_p8 }
  0x64   : > { %p5326_p1 = por %p5325_p10, %p5324_p5 }
  0x65   : > { %p5320_p9 = pneg %p5319_p7 }
  0x67   : > { %p5327_p3 = pnand %p5326_p1, %p5320_p9 }
  0x69   : > { %5330 = shalt.err (!%p5327_p3)
}
  0x6a   : > { %5045 = dma.hbm_to_vmem [thread:$0]  (!%p5698_p6), %s7129_s5, 16, %s315_s19, [#allocation16]  }
  0x6b   : > { %s5584_s22 = smov [#allocation14]   ;;  %s5585_s24 = smov [#allocation17]  }
  0x6c   : > { %s300_s23 = sshll.u32 %s5584_s22, 4  ;;  %s324_s26 = sshll.u32 %s5585_s24, 4  ;;  %s301_s23 = int_to_ptr.vmem [resolvable:$true] %s300_s23  ;;  %s325_s26 = int_to_ptr.vmem [resolvable:$true] %s324_s26 }
  0x6d   : > { %s7130_s4 = sld [smem:[#allocation48_spill]] }
  0x73   : > { %s5331_s14 = scalar_lea.hbm %s7130_s4, 256 }
  0x74   : > { %p5332_p1 = scmp.ne.s32.totalorder %s7130_s4, %s5331_s14  ;;  %p5338_p12 = scmp.lt.u32.totalorder %s5331_s14, %s7130_s4 }
  0x76   : > { %p5334_p3 = pnand %p5332_p1, %p5714_p8 }
  0x78   : > { %p5335_p11 = pneg %p5334_p3 }
  0x7a   : > { %p5340_p13 = pnand %p5338_p12, %p5335_p11 }
  0x7c   : > { %5343 = shalt.err (!%p5340_p13)
}
  0x7d   : > { %s5344_s19 = scalar_lea.vmem %s301_s23, 256  ;;  %p5352_p7 = scmp.lt.s32.totalorder %s301_s23, %s301_s23 }
  0x7e   : > { %p5345_p0 = scmp.ne.s32.totalorder %s301_s23, %s5344_s19  ;;  %p5353_p9 = scmp.lt.s32.totalorder %s5344_s19, %s5344_s19 }
  0x80   : > { %p5347_p2 = pnand %p5345_p0, %p5714_p8  ;;  %p5354_p5 = por %p5353_p9, %p5352_p7 }
  0x82   : > { %p5348_p4 = pneg %p5347_p2 }
  0x84   : > { %p5355_p10 = pnand %p5354_p5, %p5348_p4 }
  0x86   : > { %5358 = shalt.err (!%p5355_p10)
}
  0x87   : > { %s7131_s30 = smov 64   ;;  %s7132_s6 = sld [smem:[#allocation50_spill]] }
  0x88   : > { %5042 = dma.hbm_to_vmem [thread:$0]  (!%p5698_p6), %s7130_s4, 256, %s301_s23, [#allocation13], %s7131_s30, %s7131_s30, %s7101_s20  }
  0x8d   : > { %s5359_s16 = scalar_lea.hbm %s7132_s6, 512 }
  0x8e   : > { %p5360_p1 = scmp.ne.s32.totalorder %s7132_s6, %s5359_s16  ;;  %p5366_p12 = scmp.lt.u32.totalorder %s5359_s16, %s7132_s6 }
  0x90   : > { %p5362_p3 = pnand %p5360_p1, %p5714_p8 }
  0x92   : > { %p5363_p11 = pneg %p5362_p3 }
  0x94   : > { %p5368_p13 = pnand %p5366_p12, %p5363_p11 }
  0x96   : > { %5371 = shalt.err (!%p5368_p13)
}
  0x97   : > { %s5372_s19 = scalar_lea.vmem %s325_s26, 512  ;;  %p5380_p7 = scmp.lt.s32.totalorder %s325_s26, %s325_s26 }
  0x98   : > { %p5373_p0 = scmp.ne.s32.totalorder %s325_s26, %s5372_s19  ;;  %p5381_p9 = scmp.lt.s32.totalorder %s5372_s19, %s5372_s19 }
  0x9a   : > { %p5375_p2 = pnand %p5373_p0, %p5714_p8  ;;  %p5382_p5 = por %p5381_p9, %p5380_p7 }
  0x9c   : > { %p5376_p4 = pneg %p5375_p2 }
  0x9e   : > { %p5383_p10 = pnand %p5382_p5, %p5376_p4 }
  0xa0   : > { %5386 = shalt.err (!%p5383_p10)
}
  0xa1   : > { %5048 = dma.hbm_to_vmem [thread:$0]  (!%p5698_p6), %s7132_s6, 512, %s325_s26, [#allocation16], %s7131_s30, %s7131_s30, %s7101_s20  }
  0xa2   : > { %s5586_s22 = smov [#allocation18]   ;;  %s7133_s7 = sld [smem:[#allocation51_spill]] }
  0xa3   : > { %s338_s24 = sshll.u32 %s5586_s22, 4  ;;  %s339_s24 = int_to_ptr.vmem [resolvable:$true] %s338_s24 }
  0xa8   : > { %s5387_s14 = scalar_lea.hbm %s7133_s7, 16 }
  0xa9   : > { %p5388_p1 = scmp.ne.s32.totalorder %s7133_s7, %s5387_s14  ;;  %p5394_p12 = scmp.lt.u32.totalorder %s5387_s14, %s7133_s7 }
  0xab   : > { %p5390_p3 = pnand %p5388_p1, %p5714_p8 }
  0xad   : > { %p5391_p11 = pneg %p5390_p3 }
  0xaf   : > { %p5396_p13 = pnand %p5394_p12, %p5391_p11 }
  0xb1   : > { %5399 = shalt.err (!%p5396_p13)
}
  0xb2   : > { %s5400_s26 = scalar_lea.vmem %s339_s24, 16  ;;  %s5407_s23 = scalar_lea.vmem %s339_s24, 32 }
  0xb3   : > { %p5401_p0 = scmp.ne.s32.totalorder %s339_s24, %s5400_s26  ;;  %p5408_p7 = scmp.lt.s32.totalorder %s339_s24, %s339_s24 }
  0xb4   : > { %p5409_p9 = scmp.lt.s32.totalorder %s5407_s23, %s5400_s26 }
  0xb5   : > { %p5403_p2 = pnand %p5401_p0, %p5714_p8 }
  0xb6   : > { %p5410_p5 = por %p5409_p9, %p5408_p7 }
  0xb7   : > { %p5404_p4 = pneg %p5403_p2 }
  0xb9   : > { %p5411_p10 = pnand %p5410_p5, %p5404_p4 }
  0xbb   : > { %5414 = shalt.err (!%p5411_p10)
}
  0xbc   : > { %5051 = dma.hbm_to_vmem [thread:$0]  (!%p5698_p6), %s7133_s7, 16, %s339_s24, [#allocation19]  }
  0xbd   : > { %s4723_s25 = sadd.s32 4294967294, %s5577_s10   ;;  %s49_s13 = sadd.s32 1, %s5573_s9 }
  0xbe   : > { %p51_p8 = scmp.ge.s32.totalorder %s49_s13, 2  ;;  %s58_s15 = sadd.s32 1, %s5565_s29 }
  0xbf   : > { %p65_p1 = scmp.ne.s32.totalorder %s5565_s29, %s5561_s28  ;;  %p66_p3 = scmp.eq.s32.totalorder %s5577_s10, 0 }
  0xc0   : > { %s7211_s13 = smov (%p51_p8, %s49_s13), 0  ;;  %p71_p12 = scmp.ne.s32.totalorder %s5561_s28, %s5557_s27 }
  0xc1   : > { %p5849_p11 = por %p66_p3, %p65_p1  ;;  %s53_s24 = ssub.s32 %s5573_s9, %s7211_s13 }
  0xc2   : > { %p251_p6 = scmp.eq.s32.totalorder %s5682_s11, 1  ;;  %p56_p13 = scmp.eq.s32.totalorder %s53_s24, 0 }
  0xc3   : > { %p7135_p0 = scmp.eq.s32.totalorder %s5682_s11, 0  ;;  %p257_p7 = scmp.eq.s32.totalorder %s4723_s25, 1 }
  0xc4   : > { %p5864_p4 = por %p251_p6, %p65_p1  ;;  %p5069_p5 = scmp.lt.s32.totalorder %s5577_s10, 2 }
  0xc5   : > { %p5860_p2 = por %p7135_p0, %p71_p12  ;;  %p5871_p9 = por %p257_p7, %p71_p12 }
  0xc6   : > { %s7137_s21 = scalar_select %p5864_p4, 1, 0 }
  0xc7   : > { %s5869_s17 = scalar_select %p56_p13, %s5565_s29, %s58_s15  }
  0xc8   : > { %s7138_s8 = scalar_select %p5871_p9, 1, 0 }
  0xc9   : > { %s349_s19 = sand.u32 1, %s5565_s29   ;;  %s4818_s26 = sshll.u32 %s5573_s9, 7 }
  0xca   : > { %s5878_s23 = sshll.u32 %s349_s19, 3  ;;  %s7139_s0 = sld [smem:[#allocation45_spill]] }
  0xcb   : > { %s353_s25 = scalar_lea.vmem [#allocation6], %s5878_s23  ;;  %p5888_p10 = pnand %p5069_p5, %p5849_p11 }
  0xcc   : > { %s362_s15 = sshll.u32 %s353_s25, 4  ;;  %s5897_s22 = scalar_lea.hbm %s7088_s1, %s4818_s26  ;;  %s5892_s15 = int_to_ptr.vmem [resolvable:$true] %s362_s15 }
  0xcd   : > { %s5899_s3 = scalar_lea.sflag [#allocation7], %s349_s19  ;;  %p5417_p1 = pneg %p5888_p10 }
  0xd0   : > { %s5883_s24 = scalar_lea.hbm %s7139_s0, %s4818_s26  ;;  %s5420_s5 = scalar_lea.hbm %s7139_s0, 256 }
  0xd1   : > { %s5415_s4 = scalar_lea.hbm %s5883_s24, 128  ;;  %p5421_p12 = scmp.lt.u32.totalorder %s5883_s24, %s7139_s0 }
  0xd2   : > { %p5416_p8 = scmp.ne.s32.totalorder %s5883_s24, %s5415_s4  ;;  %p5422_p6 = scmp.lt.u32.totalorder %s5420_s5, %s5415_s4 }
  0xd3   : > { %p5424_p0 = scmp.lt.u32.totalorder %s5415_s4, %s5883_s24 }
  0xd4   : > { %p5418_p3 = pnand %p5417_p1, %p5416_p8  ;;  %p5423_p13 = por %p5422_p6, %p5421_p12 }
  0xd6   : > { %p5419_p11 = pneg %p5418_p3  ;;  %p5425_p7 = por %p5424_p0, %p5423_p13 }
  0xd8   : > { %p5426_p5 = pnand %p5425_p7, %p5419_p11 }
  0xda   : > { %5429 = shalt.err (!%p5426_p5)
}
  0xdb   : > { %s5430_s2 = scalar_lea.vmem %s5892_s15, 128  ;;  %s5587_s19 = smov [#allocation6]  }
  0xdc   : > { %p5431_p8 = scmp.ne.s32.totalorder %s5892_s15, %s5430_s2  ;;  %s5435_s26 = sshll.u32 %s5587_s19, 4  ;;  %s5436_s26 = int_to_ptr.vmem [resolvable:$false] %s5435_s26 }
  0xdd   : > { %s5437_s6 = scalar_lea.vmem %s5436_s26, 256  ;;  %p5438_p4 = scmp.lt.s32.totalorder %s5892_s15, %s5436_s26 }
  0xde   : > { %p5433_p3 = pnand %p5431_p8, %p5417_p1  ;;  %p5439_p12 = scmp.lt.s32.totalorder %s5437_s6, %s5430_s2 }
  0xe0   : > { %p5434_p9 = pneg %p5433_p3  ;;  %p5440_p6 = por %p5439_p12, %p5438_p4 }
  0xe2   : > { %p5441_p13 = pnand %p5440_p6, %p5434_p9 }
  0xe4   : > { %5444 = shalt.err (!%p5441_p13)
}
  0xe5   : > { %s7141_s4 = smov 4   ;;  %s376_s5 = scalar_lea.vmem [#allocation9], %s5878_s23 }
  0xe6   : > { %5055 = dma.hbm_to_vmem [thread:$0]  (!%p5888_p10), %s5883_s24, 128, %s5892_s15, %s5899_s3, %s7131_s30, %s7131_s30, %s7141_s4  }
  0xe7   : > { %s385_s7 = sshll.u32 %s376_s5, 4  ;;  %s372_s18 = sand.u32 1, %s5577_s10   ;;  %s5932_s7 = int_to_ptr.vmem [resolvable:$true] %s385_s7 }
  0xe8   : > { %s5934_s16 = scalar_lea.sflag [#allocation10], %s372_s18  ;;  %s5445_s25 = scalar_lea.hbm %s5897_s22, 128 }
  0xe9   : > { %p5446_p4 = scmp.ne.s32.totalorder %s5897_s22, %s5445_s25  ;;  %s5450_s26 = scalar_lea.hbm %s7088_s1, 256 }
  0xea   : > { %p5451_p0 = scmp.lt.u32.totalorder %s5897_s22, %s7088_s1  ;;  %p5452_p7 = scmp.lt.u32.totalorder %s5450_s26, %s5445_s25 }
  0xeb   : > { %p5448_p9 = pnand %p5446_p4, %p5417_p1  ;;  %p5454_p8 = scmp.lt.u32.totalorder %s5445_s25, %s5897_s22 }
  0xec   : > { %p5453_p5 = por %p5452_p7, %p5451_p0 }
  0xed   : > { %p5449_p11 = pneg %p5448_p9 }
  0xee   : > { %p5455_p3 = por %p5454_p8, %p5453_p5 }
  0xf0   : > { %p5456_p12 = pnand %p5455_p3, %p5449_p11 }
  0xf2   : > { %5459 = shalt.err (!%p5456_p12)
}
  0xf3   : > { %s5460_s3 = scalar_lea.vmem %s5932_s7, 128  ;;  %s5588_s23 = smov [#allocation9]  }
  0xf4   : > { %p5461_p6 = scmp.ne.s32.totalorder %s5932_s7, %s5460_s3  ;;  %s5465_s24 = sshll.u32 %s5588_s23, 4  ;;  %s5466_s24 = int_to_ptr.vmem [resolvable:$false] %s5465_s24 }
  0xf5   : > { %s5467_s0 = scalar_lea.vmem %s5466_s24, 256  ;;  %p5468_p9 = scmp.lt.s32.totalorder %s5932_s7, %s5466_s24 }
  0xf6   : > { %p5463_p13 = pnand %p5461_p6, %p5417_p1  ;;  %p5469_p0 = scmp.lt.s32.totalorder %s5467_s0, %s5460_s3 }
  0xf8   : > { %p5464_p4 = pneg %p5463_p13  ;;  %p5470_p7 = por %p5469_p0, %p5468_p9 }
  0xfa   : > { %p5471_p5 = pnand %p5470_p7, %p5464_p4 }
  0xfc   : > { %5474 = shalt.err (!%p5471_p5)
}
  0xfd   : > { %5058 = dma.hbm_to_vmem [thread:$0]  (!%p5888_p10), %s5897_s22, 128, %s5932_s7, %s5934_s16, %s7131_s30, %s7131_s30, %s7141_s4  }
  0xfe   : > { %p7142_p1 = scmp.ne.s32.totalorder %s7124_s12, 0 }
 0x100   : > { %397 = sbr.rel (%p7142_p1) target bundleno = 2715 (0xa9b), region = 52 }
 0x107   : > { %s5966_s15 = sand.u32 1, %s5561_s28  }
 0x108   : > { %s5969_s5 = sshll.u32 %s5966_s15, 3  ;;  %s400_s20 = scalar_lea.sflag [#allocation7], %s5966_s15 }
 0x109   : > { %s403_s18 = scalar_lea.vmem [#allocation6], %s5969_s5 }
 0x10a   : > { %5528 = dma.done.wait (%p5860_p2), %s400_s20, 128  }
 0x10b   : > { %5530 = vsyncadd (%p5860_p2), %s400_s20, 4294967168  ;;  %s408_s12 = sand.u32 1, %s5682_s11   ;;  %s412_s22 = scalar_lea.vmem [#allocation9], %s5969_s5 }
 0x10c   : > { %s409_s30 = scalar_lea.sflag [#allocation10], %s408_s12 }
 0x10d   : > { %5532 = dma.done.wait (%p5860_p2), %s409_s30, 128  }
 0x10e   : > { %5534 = vsyncadd (%p5860_p2), %s409_s30, 4294967168  ;;  %p7143_p10 = scmp.eq.s32.totalorder %s5682_s11, 0 }
 0x110   : > { %5536 = dma.done.wait (%p7143_p10), [#allocation10], 256   ;;  %p7144_p11 = pmov %p7143_p10 }
 0x111   : > { %p7145_p8 = pmov %p7143_p10 }
 0x112   : > { %5538 = vsyncadd (%p7144_p11), [#allocation10], 4294967040 }
 0x113   : > { %5540 = dma.done.wait (%p7145_p8), [#allocation13], 272   ;;  %p7146_p3 = pmov %p7145_p8 }
 0x115   : > { %5542 = vsyncadd (%p7146_p3), [#allocation13], 4294967024  ;;  %p7147_p12 = pmov %p7146_p3 }
 0x116   : > { %p7148_p6 = pmov %p7146_p3 }
 0x117   : > { %5544 = dma.done.wait (%p7147_p12), [#allocation16], 528  }
 0x118   : > { %5546 = vsyncadd (%p7148_p6), [#allocation16], 4294966768  ;;  %p7149_p2 = pmov %p7146_p3 }
 0x11a   : > { %5548 = dma.done.wait (%p7149_p2), [#allocation19], 16   ;;  %p7150_p13 = pmov %p7149_p2 }
 0x11b   : > { %v4824_v0 = vld [vmem:[%s403_s18] sm:$0xff]   ;;  %vm540_vm0 = vcmask 261120   ;;  %v4828_v1 = vld [vmem:[%s412_s22] sm:$0xff]   ;;  %v7104_v32 = vmov 0.0   ;;  %vm5590_vm1 = vmmov 0   ;;  %v5591_v57 = vmov 0  }
 0x11c   : > { %5550 = vsyncadd (%p7150_p13), [#allocation19], 4294967280  ;;  %v5999_v2 = vunpack.c.l.bf16 %v4824_v0  ;;  %v4829_v3 = vunpack.c.l.bf16 %v4828_v1  ;;  %v6001_v4 = vunpack.c.h.bf16 %v4824_v0  ;;  %v4830_v5 = vunpack.c.h.bf16 %v4828_v1  ;;  %v5151_v30 = vld [vmem:[#allocation11] sm:$0xff]   ;;  %v5153_v31 = vld [vmem:[#allocation14] sm:$0xff]   ;;  %4875 = vmatprep.subr.bf16.mxu0 %v7104_v32  ;;  %4883 = vmatprep.subr.bf16.mxu1 %v7104_v32  ;;  %s5592_s11 = smov 112   ;;  %s5593_s14 = smov 120  }
 0x11d   : > { %4876 = vmatpush3.bf16.msra.mxu0 %v5151_v30  ;;  %v5152_v33 = vld [vmem:[#allocation11 + $0x8] sm:$0xff]   ;;  %4884 = vmatpush3.bf16.msra.mxu1 %v5153_v31  ;;  %v5154_v34 = vld [vmem:[#allocation14 + $0x8] sm:$0xff]   ;;  %v4748_v58 = vld [vmem:[#allocation12] ss:$0 sm:$0xff]  ;;  %vm523_vm2 = vcmask 64512   ;;  %s5594_s4 = smov 104  }
 0x11e   : > { %7151 = vst [vmem:[#allocation29_spill] sm:$0xff] %v5999_v2  ;;  %7152 = vst [vmem:[#allocation30_spill] sm:$0xff] %v6001_v4  ;;  %v541_v6 = vsel %vm540_vm0, %v5999_v2, 0.0  ;;  %v1196_v7 = vsel %vm540_vm0, %v4829_v3, 0.0  ;;  %v544_v8 = vsel %vm540_vm0, %v6001_v4, 0.0  ;;  %v1199_v9 = vsel %vm540_vm0, %v4830_v5, 0.0  ;;  %4877 = vmatprep.subr.bf16.mxu0 %v7104_v32  ;;  %4879 = vmatprep.mubr.msk.bf16.mxu0 %vm5590_vm1, %v7104_v32 }
 0x11f   : > { %542 = vadd.xlane.f32.xlu0 %v541_v6  ;;  %1197 = vadd.xlane.f32.xlu1 %v1196_v7  ;;  %524 = vst.msk [vmem:[#allocation5] sm:$0xff] %vm523_vm2, %v7104_v32  ;;  %525 = vst.msk [vmem:[#allocation5 + $0x8] sm:$0xff] %vm523_vm2, %v7104_v32  ;;  %v4760_v1 = vld [vmem:[#allocation15] ss:$0 sm:$0xff]  ;;  %vm490_vm3 = vcmask 7168   ;;  %vm2054_vm5 = vcmask 130048  }
 0x120   : > { %4885 = vmatprep.subr.bf16.mxu1 %v7104_v32  ;;  %4887 = vmatprep.mubr.msk.bf16.mxu1 %vm5590_vm1, %v7104_v32  ;;  %526 = vst.msk [vmem:[#allocation5 + $0x10] sm:$0xff] %vm523_vm2, %v7104_v32  ;;  %527 = vst.msk [vmem:[#allocation5 + $0x18] sm:$0xff] %vm523_vm2, %v7104_v32  ;;  %s5598_s7 = smov 96   ;;  %s5599_s16 = smov 64   ;;  %vm4038_vm6 = vcmask 195584   ;;  %vm4530_vm7 = vcmask 257024  }
 0x121   : > { %4878 = vmatpush3.bf16.msra.mxu0 %v5152_v33  ;;  %4886 = vmatpush3.bf16.msra.mxu1 %v5154_v34  ;;  %528 = vst.msk [vmem:[#allocation5 + $0x20] sm:$0xff] %vm523_vm2, %v7104_v32  ;;  %529 = vst.msk [vmem:[#allocation5 + $0x28] sm:$0xff] %vm523_vm2, %v7104_v32  ;;  %s5600_s25 = smov 32   ;;  %s5601_s2 = smov 16  }
 0x122   : > { %4891 = vmatprep.subr.bf16.mxu0 %v7104_v32  ;;  %4897 = vmatprep.subr.bf16.mxu1 %v7104_v32  ;;  %530 = vst.msk [vmem:[#allocation5 + $0x30] sm:$0xff] %vm523_vm2, %v7104_v32  ;;  %531 = vst.msk [vmem:[#allocation5 + $0x38] sm:$0xff] %vm523_vm2, %v7104_v32  ;;  %s5602_s19 = smov 8   ;;  %s5603_s26 = smov 24  }
 0x123   : > { %545 = vadd.xlane.f32.xlu0 %v544_v8  ;;  %1200 = vadd.xlane.f32.xlu1 %v1199_v9  ;;  %532 = vst.msk [vmem:[#allocation5 + $0x40] sm:$0xff] %vm523_vm2, %v7104_v32  ;;  %533 = vst.msk [vmem:[#allocation5 + $0x48] sm:$0xff] %vm523_vm2, %v7104_v32  ;;  %s7198_s6 = sld [smem:[#allocation28_spill]]  ;;  %s473_s23 = scalar_lea.vmem [#allocation20], %s5969_s5 }
 0x124   : > { %5149 = vset.pattern.permute.xlu0 %v5591_v57  ;;  %5150 = vset.pattern.permute.xlu1 %v5591_v57  ;;  %534 = vst.msk [vmem:[#allocation5 + $0x50] sm:$0xff] %vm523_vm2, %v7104_v32  ;;  %535 = vst.msk [vmem:[#allocation5 + $0x58] sm:$0xff] %vm523_vm2, %v7104_v32  ;;  %s4549_s24 = sshll.u32 %s473_s23, 4  ;;  %s7201_s18 = sld [smem:[#allocation52_spill]]  ;;  %s7036_s24 = int_to_ptr.vmem [resolvable:$true] %s4549_s24 }
 0x125   : > { %536 = vst.msk [vmem:[#allocation5 + $0x60] sm:$0xff] %vm523_vm2, %v7104_v32  ;;  %537 = vst.msk [vmem:[#allocation5 + $0x68] sm:$0xff] %vm523_vm2, %v7104_v32  ;;  %s4534_s30 = scalar_lea.sflag [#allocation8], %s5966_s15  ;;  %s5475_s22 = scalar_lea.vmem %s7036_s24, 128 }
 0x126   : > { %538 = vst.msk [vmem:[#allocation5 + $0x70] sm:$0xff] %vm523_vm2, %v7104_v32  ;;  %539 = vst.msk [vmem:[#allocation5 + $0x78] sm:$0xff] %vm523_vm2, %v7104_v32  ;;  %p5476_p4 = scmp.ne.s32.totalorder %s7036_s24, %s5475_s22  ;;  %p7202_p9 = scmp.ne.s32.totalorder %s7137_s21, 0 }
 0x127   : > { %507 = vst.msk [vmem:[#allocation4] sm:$0xff] %vm490_vm3, %v7104_v32  ;;  %508 = vst.msk [vmem:[#allocation4 + $0x8] sm:$0xff] %vm490_vm3, %v7104_v32  ;;  %s5604_s5 = smov [#allocation20]  }
 0x128   : > { %509 = vst.msk [vmem:[#allocation4 + $0x10] sm:$0xff] %vm490_vm3, %v7104_v32  ;;  %510 = vst.msk [vmem:[#allocation4 + $0x18] sm:$0xff] %vm490_vm3, %v7104_v32  ;;  %p5477_p0 = pnand %p5476_p4, %p7202_p9 }
 0x129   : > { %511 = vst.msk [vmem:[#allocation4 + $0x20] sm:$0xff] %vm490_vm3, %v7104_v32  ;;  %512 = vst.msk [vmem:[#allocation4 + $0x28] sm:$0xff] %vm490_vm3, %v7104_v32  ;;  %s4822_s3 = sshll.u32 %s7198_s6, 7 }
 0x12a   : > { %513 = vst.msk [vmem:[#allocation4 + $0x30] sm:$0xff] %vm490_vm3, %v7104_v32  ;;  %514 = vst.msk [vmem:[#allocation4 + $0x38] sm:$0xff] %vm490_vm3, %v7104_v32  ;;  %s7034_s12 = scalar_lea.hbm %s7201_s18, %s4822_s3  ;;  %p5478_p7 = pneg %p5477_p0 }
 0x12b   : > { %515 = vst.msk [vmem:[#allocation4 + $0x40] sm:$0xff] %vm490_vm3, %v7104_v32  ;;  %516 = vst.msk [vmem:[#allocation4 + $0x48] sm:$0xff] %vm490_vm3, %v7104_v32 }
 0x12c   : > { %517 = vst.msk [vmem:[#allocation4 + $0x50] sm:$0xff] %vm490_vm3, %v7104_v32  ;;  %518 = vst.msk [vmem:[#allocation4 + $0x58] sm:$0xff] %vm490_vm3, %v7104_v32 }
 0x12d   : > { %519 = vst.msk [vmem:[#allocation4 + $0x60] sm:$0xff] %vm490_vm3, %v7104_v32  ;;  %520 = vst.msk [vmem:[#allocation4 + $0x68] sm:$0xff] %vm490_vm3, %v7104_v32 }
 0x12e   : > { %521 = vst.msk [vmem:[#allocation4 + $0x70] sm:$0xff] %vm490_vm3, %v7104_v32  ;;  %522 = vst.msk [vmem:[#allocation4 + $0x78] sm:$0xff] %vm490_vm3, %v7104_v32 }
 0x1ac   : > { %v543_v10 = vpop.xlane.xlu0 %542  ;;  %v1198_v11 = vpop.xlane.xlu1 %1197 }
 0x1ad   : > { %v548_v12 = vmul.f32 0.03125, %v543_v10  ;;  %v1203_v13 = vmul.f32 0.03125, %v1198_v11 }
 0x1af   : > { %v550_v14 = vsub.f32 %v5999_v2, %v548_v12  ;;  %v1205_v15 = vsub.f32 %v4829_v3, %v1203_v13  ;;  %v5595_v12 = vmov 1983009808  }
 0x1b0   : > { %v546_v16 = vpop.xlane.xlu0 %545  ;;  %v1201_v17 = vpop.xlane.xlu1 %1200  ;;  %v668_v13 = vunpack.c.l.s4 %v5595_v12 }
 0x1b1   : > { %v549_v18 = vmul.f32 0.03125, %v546_v16  ;;  %v1204_v19 = vmul.f32 0.03125, %v1201_v17  ;;  %v552_v20 = vmul.f32 %v550_v14, %v550_v14  ;;  %v1207_v21 = vmul.f32 %v1205_v15, %v1205_v15 }
 0x1b2   : > { %v5596_v17 = vmov 1934713408  }
 0x1b3   : > { %v551_v22 = vsub.f32 %v6001_v4, %v549_v18  ;;  %v1206_v23 = vsub.f32 %v4830_v5, %v1204_v19  ;;  %v554_v24 = vsel %vm540_vm0, %v552_v20, 0.0  ;;  %v1209_v25 = vsel %vm540_vm0, %v1207_v21, 0.0 }
 0x1b4   : > { %555 = vadd.xlane.f32.xlu0 %v554_v24  ;;  %v699_v18 = vunpack.c.l.s4 %v5596_v17  ;;  %v6076_v20 = vpack.i.b16 %v5591_v57, %v5591_v57 }
 0x1b5   : > { %v553_v26 = vmul.f32 %v551_v22, %v551_v22  ;;  %v1208_v27 = vmul.f32 %v1206_v23, %v1206_v23 }
 0x1b6   : > { %7153 = vst [vmem:[#allocation31_spill] sm:$0xff] %v6076_v20 }
 0x1b7   : > { %v557_v28 = vsel %vm540_vm0, %v553_v26, 0.0  ;;  %v1212_v29 = vsel %vm540_vm0, %v1208_v27, 0.0  ;;  %v700_v27 = vunpack.c.0.s8 %v699_v18 }
 0x1b8   : > { %1210 = vadd.xlane.f32.xlu0 %v1209_v25  ;;  %558 = vadd.xlane.f32.xlu1 %v557_v28 }
 0x1bc   : > { %1213 = vadd.xlane.f32.xlu1 %v1212_v29 }
 0x241   : > { %v556_v35 = vpop.xlane.xlu0 %555 }
 0x242   : > { %v560_v36 = vmul.f32 0.03125, %v556_v35 }
 0x244   : > { %v562_v37 = vadd.f32 1e-05, %v560_v36 }
 0x245   : > { %v559_v38 = vpop.xlane.xlu1 %558  ;;  %v1211_v39 = vpop.xlane.xlu0 %1210 }
 0x246   : > { %v561_v40 = vmul.f32 0.03125, %v559_v38  ;;  %v1215_v41 = vmul.f32 0.03125, %v1211_v39  ;;  %5159 = vrsqrt.f32 %v562_v37 }
 0x248   : > { %v563_v42 = vadd.f32 1e-05, %v561_v40  ;;  %v1217_v43 = vadd.f32 1e-05, %v1215_v41 }
 0x249   : > { %v1214_v44 = vpop.xlane.xlu1 %1213 }
 0x24a   : > { %5161 = vrsqrt.f32 %v563_v42  ;;  %v1216_v45 = vmul.f32 0.03125, %v1214_v44 }
 0x24b   : > { %5163 = vrsqrt.f32 %v1217_v43 }
 0x24c   : > { %v1218_v46 = vadd.f32 1e-05, %v1216_v45 }
 0x24e   : > { %5165 = vrsqrt.f32 %v1218_v46 }
 0x250   : > { %v5160_v47 = vpop.eup %5159 }
 0x251   : > { %v566_v49 = vmul.f32 %v5160_v47, %v550_v14  ;;  %v670_v14 = vlaneseq }
 0x253   : > { %v671_v16 = vshrl.u32 %v670_v14, 7 }
 0x254   : > { %v5162_v48 = vpop.eup %5161 }
 0x255   : > { %v567_v50 = vmul.f32 %v5162_v48, %v551_v22  ;;  %v5164_v51 = vpop.eup %5163  ;;  %v6095_v36 = vsub.s32 %v700_v27, %v671_v16 }
 0x256   : > { %v1221_v54 = vmul.f32 %v5164_v51, %v1205_v15  ;;  %v669_v15 = vunpack.c.0.s8 %v668_v13 }
 0x257   : > { %v568_v52 = vpack.c.bf16 %v567_v50, %v566_v49 }
 0x258   : > { %v5166_v53 = vpop.eup %5165  ;;  %v6084_v25 = vsub.s32 %v669_v15, %v671_v16 }
 0x259   : > { %4880 = vmatmul.mubr.msk.bf16.vlgmr.msra.gmra.mrb[0].mxu0 %vm540_vm0, %v568_v52  ;;  %v1222_v55 = vmul.f32 %v5166_v53, %v1206_v23 }
 0x25a   : > { %4893 = vmatprep.mubr.msk.bf16.mxu0 %vm5590_vm1, %v7104_v32 }
 0x25b   : > { %v1223_v56 = vpack.c.bf16 %v1222_v55, %v1221_v54 }
 0x25d   : > { %4888 = vmatmul.mubr.msk.bf16.vlgmr.msra.gmra.mrb[0].mxu1 %vm540_vm0, %v1223_v56 }
 0x25e   : > { %4899 = vmatprep.mubr.msk.bf16.mxu1 %vm5590_vm1, %v7104_v32 }
 0x32c   : > { %v629_v59 = vpop.f32.mrb[0].mxu0 }
 0x32d   : > { %v4881_v60 = vpop.f32.mrb[1].mxu0  ;;  %v630_v62 = vadd.f32 %v4748_v58, %v629_v59 }
 0x32e   : > { %v632_v61 = vpop.f32.mrb[2].mxu0 }
 0x32f   : > { %v633_v63 = vadd.f32 %v4748_v58, %v632_v61  ;;  %v4882_v0 = vpop.f32.mrb[3].mxu0 }
 0x330   : > { %v1284_v3 = vpop.f32.mrb[0].mxu1 }
 0x331   : > { %v6063_v5 = vpack.c.bf16 %v633_v63, %v630_v62  ;;  %v4889_v6 = vpop.f32.mrb[1].mxu1  ;;  %v1285_v8 = vadd.f32 %v4760_v1, %v1284_v3 }
 0x332   : > { %v1287_v7 = vpop.f32.mrb[2].mxu1 }
 0x333   : > { %v1288_v9 = vadd.f32 %v4760_v1, %v1287_v7  ;;  %640 = vrot.lane.b32.xlu1 %v6063_v5, %s5592_s11  ;;  %638 = vrot.lane.b32.xlu0 %v6063_v5, %s5593_s14  ;;  %v4890_v10 = vpop.f32.mrb[3].mxu1  ;;  %v648_v22 = vshrl.u32 %v6063_v5, 16 }
 0x335   : > { %v6067_v11 = vpack.c.bf16 %v1288_v9, %v1285_v8 }
 0x337   : > { %642 = vrot.lane.b32.xlu1 %v6063_v5, %s5594_s4  ;;  %1301 = vrot.lane.b32.xlu0 %v6067_v11, %s5592_s11  ;;  %v1309_v43 = vshrl.u32 %v6067_v11, 16  ;;  %s5479_s11 = sshll.u32 %s5604_s5, 4  ;;  %s5480_s11 = int_to_ptr.vmem [resolvable:$false] %s5479_s11 }
 0x338   : > { %p5482_p5 = scmp.lt.s32.totalorder %s7036_s24, %s5480_s11 }
 0x33b   : > { %1299 = vrot.lane.b32.xlu1 %v6067_v11, %s5593_s14  ;;  %s5481_s14 = scalar_lea.vmem %s5480_s11, 256 }
 0x33c   : > { %p5483_p1 = scmp.lt.s32.totalorder %s5481_s14, %s5475_s22 }
 0x33e   : > { %p5484_p10 = por %p5483_p1, %p5482_p5 }
 0x33f   : > { %1303 = vrot.lane.b32.xlu1 %v6067_v11, %s5594_s4 }
 0x340   : > { %p5485_p11 = pnand %p5484_p10, %p5478_p7 }
 0x3a5   : > { %v6074_v19 = vpop.permute.xlu1 %640  ;;  %v6078_v21 = vpop.permute.xlu0 %638 }
 0x3a6   : > { %v646_v23 = vpack.i.b16 %v6078_v21, %v6063_v5  ;;  %v649_v24 = vshrl.u32 %v6078_v21, 16  ;;  %v656_v33 = vshrl.u32 %v6074_v19, 16 }
 0x3a8   : > { %v650_v26 = vpack.i.b16 %v649_v24, %v648_v22  ;;  %v666_v28 = vcombine.high %v646_v23, %v6076_v20  ;;  %v673_v35 = vrot.slane %v646_v23, %v6084_v25 }
 0x3a9   : > { %v6087_v29 = vpop.permute.xlu1 %642  ;;  %v6122_v17 = vpop.permute.xlu0 %1301 }
 0x3aa   : > { %v732_v30 = vcombine.high %v650_v26, %v6076_v20  ;;  %v654_v31 = vpack.i.b16 %v6087_v29, %v6074_v19  ;;  %v657_v34 = vshrl.u32 %v6087_v29, 16  ;;  %v680_v39 = vrot.slane %v666_v28, %v6084_v25 }
 0x3ab   : > { %v739_v40 = vrot.slane %v650_v26, %v6084_v25 }
 0x3ac   : > { %v681_v37 = vcombine.high %v654_v31, %v6076_v20  ;;  %v688_v38 = vrot.slane %v654_v31, %v6084_v25  ;;  %v658_v41 = vpack.i.b16 %v657_v34, %v656_v33  ;;  %v746_v44 = vrot.slane %v732_v30, %v6084_v25 }
 0x3ad   : > { %v6101_v42 = vpop.permute.xlu1 %1299  ;;  %v1317_v34 = vshrl.u32 %v6122_v17, 16 }
 0x3ae   : > { %v695_v45 = vrot.slane %v681_v37, %v6084_v25  ;;  %v696_v46 = vcombine.low %v673_v35, %v688_v38  ;;  %v697_v47 = vcombine.high %v673_v35, %v688_v38  ;;  %v747_v48 = vcombine.high %v658_v41, %v6076_v20 }
 0x3af   : > { %v754_v49 = vrot.slane %v658_v41, %v6084_v25  ;;  %v1307_v50 = vpack.i.b16 %v6101_v42, %v6067_v11  ;;  %v1310_v51 = vshrl.u32 %v6101_v42, 16 }
 0x3b0   : > { %v704_v52 = vrot.slane %v696_v46, %v6095_v36  ;;  %v711_v53 = vrot.slane %v697_v47, %v6095_v36  ;;  %v712_v54 = vcombine.low %v680_v39, %v695_v45  ;;  %v713_v55 = vcombine.high %v680_v39, %v695_v45 }
 0x3b1   : > { %v761_v56 = vrot.slane %v747_v48, %v6084_v25  ;;  %v762_v57 = vcombine.low %v739_v40, %v754_v49  ;;  %v763_v58 = vcombine.high %v739_v40, %v754_v49  ;;  %v1311_v59 = vpack.i.b16 %v1310_v51, %v1309_v43  ;;  %v6129_v31 = vpop.permute.xlu1 %1303 }
 0x3b2   : > { %v720_v60 = vrot.slane %v712_v54, %v6095_v36  ;;  %v727_v61 = vrot.slane %v713_v55, %v6095_v36  ;;  %v798_v62 = vcombine.low %v704_v52, %v711_v53  ;;  %v4752_v63 = vcombine.high %v704_v52, %v711_v53 }
 0x3b3   : > { %v770_v0 = vrot.slane %v762_v57, %v6095_v36  ;;  %v777_v1 = vrot.slane %v763_v58, %v6095_v36  ;;  %v778_v3 = vcombine.low %v746_v44, %v761_v56  ;;  %v779_v6 = vcombine.high %v746_v44, %v761_v56 }
 0x3b4   : > { %v805_v7 = vrot.slane %v798_v62, %v6084_v25  ;;  %v813_v8 = vrot.slane %v4752_v63, %v6084_v25  ;;  %v814_v9 = vcombine.low %v720_v60, %v727_v61  ;;  %v4753_v10 = vcombine.high %v720_v60, %v727_v61 }
 0x3b5   : > { %v786_v12 = vrot.slane %v778_v3, %v6095_v36  ;;  %v793_v13 = vrot.slane %v779_v6, %v6095_v36  ;;  %v848_v15 = vcombine.low %v770_v0, %v777_v1  ;;  %v4754_v16 = vcombine.high %v770_v0, %v777_v1 }
 0x3b6   : > { %v821_v18 = vrot.slane %v814_v9, %v6084_v25  ;;  %v829_v22 = vrot.slane %v4753_v10, %v6084_v25  ;;  %v830_v23 = vcombine.low %v805_v7, %v813_v8  ;;  %v1327_v24 = vcombine.high %v1307_v50, %v6076_v20 }
 0x3b7   : > { %v855_v26 = vrot.slane %v848_v15, %v6084_v25  ;;  %v863_v27 = vrot.slane %v4754_v16, %v6084_v25  ;;  %v864_v28 = vcombine.low %v786_v12, %v793_v13  ;;  %v4755_v30 = vcombine.high %v786_v12, %v793_v13 }
 0x3b8   : > { %v838_v33 = vcombine.low %v821_v18, %v829_v22  ;;  %v1393_v39 = vcombine.high %v1311_v59, %v6076_v20  ;;  %v837_v40 = vrot.slane %v830_v23, %v6095_v36  ;;  %v1315_v43 = vpack.i.b16 %v6129_v31, %v6122_v17 }
 0x3b9   : > { %v871_v35 = vrot.slane %v864_v28, %v6084_v25  ;;  %v879_v37 = vrot.slane %v4755_v30, %v6084_v25  ;;  %v880_v38 = vcombine.low %v855_v26, %v863_v27  ;;  %v1318_v44 = vshrl.u32 %v6129_v31, 16 }
 0x3ba   : > { %v845_v41 = vrot.slane %v838_v33, %v6095_v36  ;;  %v1334_v46 = vrot.slane %v1307_v50, %v6084_v25  ;;  %v1341_v47 = vrot.slane %v1327_v24, %v6084_v25  ;;  %v1400_v48 = vrot.slane %v1311_v59, %v6084_v25 }
 0x3bb   : > { %v888_v45 = vcombine.low %v871_v35, %v879_v37  ;;  %v1319_v52 = vpack.i.b16 %v1318_v44, %v1317_v34  ;;  %v1342_v53 = vcombine.high %v1315_v43, %v6076_v20  ;;  %v887_v54 = vrot.slane %v880_v38, %v6095_v36 }
 0x3bc   : > { %v846_v49 = vcombine.low %v837_v40, %v845_v41  ;;  %v847_v51 = vcombine.high %v837_v40, %v845_v41  ;;  %v1407_v56 = vrot.slane %v1393_v39, %v6084_v25  ;;  %v1349_v57 = vrot.slane %v1315_v43, %v6084_v25 }
 0x3bd   : > { %v895_v55 = vrot.slane %v888_v45, %v6095_v36  ;;  %v1356_v50 = vrot.slane %v1342_v53, %v6084_v25  ;;  %v1408_v61 = vcombine.high %v1319_v52, %v6076_v20  ;;  %v1415_v6 = vrot.slane %v1319_v52, %v6084_v25 }
 0x3be   : > { %v902_v58 = vshrl.u32 %v846_v49, 16  ;;  %v910_v60 = vshrl.u32 %v847_v51, 16  ;;  %v1357_v63 = vcombine.low %v1334_v46, %v1349_v57  ;;  %v1358_v0 = vcombine.high %v1334_v46, %v1349_v57 }
 0x3bf   : > { %v896_v59 = vcombine.low %v887_v54, %v895_v55  ;;  %v897_v62 = vcombine.high %v887_v54, %v895_v55  ;;  %v1373_v1 = vcombine.low %v1341_v47, %v1356_v50  ;;  %v1374_v3 = vcombine.high %v1341_v47, %v1356_v50 }
 0x3c0   : > { %v1422_v7 = vrot.slane %v1408_v61, %v6084_v25  ;;  %v1423_v13 = vcombine.low %v1400_v48, %v1415_v6  ;;  %v1424_v15 = vcombine.high %v1400_v48, %v1415_v6  ;;  %v1365_v16 = vrot.slane %v1357_v63, %v6095_v36 }
 0x3c1   : > { %v900_v8 = vpack.i.b16 %v896_v59, %v846_v49  ;;  %v903_v9 = vshrl.u32 %v896_v59, 16  ;;  %v908_v10 = vpack.i.b16 %v897_v62, %v847_v51  ;;  %v911_v12 = vshrl.u32 %v897_v62, 16 }
 0x3c2   : > { %v1372_v18 = vrot.slane %v1358_v0, %v6095_v36  ;;  %v1381_v24 = vrot.slane %v1373_v1, %v6095_v36  ;;  %v1388_v26 = vrot.slane %v1374_v3, %v6095_v36  ;;  %v1431_v27 = vrot.slane %v1423_v13, %v6095_v36 }
 0x3c3   : > { %v904_v22 = vpack.i.b16 %v903_v9, %v902_v58  ;;  %v912_v23 = vpack.i.b16 %v911_v12, %v910_v60  ;;  %914 = vst.msk [vmem:[#allocation2] sm:$0xff] %vm523_vm2, %v900_v8  ;;  %916 = vst.msk [vmem:[#allocation2 + $0x10] sm:$0xff] %vm523_vm2, %v908_v10  ;;  %v1438_v28 = vrot.slane %v1424_v15, %v6095_v36 }
 0x3c4   : > { %v1439_v30 = vcombine.low %v1407_v56, %v1422_v7  ;;  %v1440_v33 = vcombine.high %v1407_v56, %v1422_v7  ;;  %v1459_v34 = vcombine.low %v1365_v16, %v1372_v18  ;;  %v4764_v35 = vcombine.high %v1365_v16, %v1372_v18 }
 0x3c5   : > { %915 = vst.msk [vmem:[#allocation2 + $0x8] sm:$0xff] %vm523_vm2, %v904_v22  ;;  %917 = vst.msk [vmem:[#allocation2 + $0x18] sm:$0xff] %vm523_vm2, %v912_v23  ;;  %v1475_v37 = vcombine.low %v1381_v24, %v1388_v26  ;;  %v4765_v38 = vcombine.high %v1381_v24, %v1388_v26  ;;  %v1509_v41 = vcombine.low %v1431_v27, %v1438_v28 }
 0x3c6   : > { %v1447_v39 = vrot.slane %v1439_v30, %v6095_v36  ;;  %v1454_v40 = vrot.slane %v1440_v33, %v6095_v36  ;;  %v4766_v43 = vcombine.high %v1431_v27, %v1438_v28  ;;  %v1466_v44 = vrot.slane %v1459_v34, %v6084_v25 }
 0x3c7   : > { %v1474_v45 = vrot.slane %v4764_v35, %v6084_v25  ;;  %v1482_v46 = vrot.slane %v1475_v37, %v6084_v25  ;;  %v1490_v47 = vrot.slane %v4765_v38, %v6084_v25  ;;  %v1516_v48 = vrot.slane %v1509_v41, %v6084_v25 }
 0x3c8   : > { %v1524_v49 = vrot.slane %v4766_v43, %v6084_v25  ;;  %v1525_v51 = vcombine.low %v1447_v39, %v1454_v40  ;;  %v4767_v52 = vcombine.high %v1447_v39, %v1454_v40  ;;  %v5597_v28 = vmov -inf  }
 0x3c9   : > { %v1491_v53 = vcombine.low %v1466_v44, %v1474_v45  ;;  %v1499_v54 = vcombine.low %v1482_v46, %v1490_v47  ;;  %491 = vst.msk [vmem:[#allocation3] sm:$0xff] %vm490_vm3, %v5597_v28  ;;  %492 = vst.msk [vmem:[#allocation3 + $0x8] sm:$0xff] %vm490_vm3, %v5597_v28  ;;  %v6245_v30 = vand.u32 127, %v670_v14 }
 0x3ca   : > { %v1532_v55 = vrot.slane %v1525_v51, %v6084_v25  ;;  %v1540_v56 = vrot.slane %v4767_v52, %v6084_v25  ;;  %v1541_v57 = vcombine.low %v1516_v48, %v1524_v49  ;;  %v1843_v18 = vld [vmem:[#allocation2] sm:$0xff]  ;;  %v1845_v26 = vld [vmem:[#allocation2 + $0x10] sm:$0xff]  ;;  %493 = vst.msk [vmem:[#allocation3 + $0x10] sm:$0xff] %vm490_vm3, %v5597_v28  ;;  %494 = vst.msk [vmem:[#allocation3 + $0x18] sm:$0xff] %vm490_vm3, %v5597_v28 }
 0x3cb   : > { %v1506_v58 = vrot.slane %v1499_v54, %v6095_v36  ;;  %v1498_v60 = vrot.slane %v1491_v53, %v6095_v36  ;;  %495 = vst.msk [vmem:[#allocation3 + $0x20] sm:$0xff] %vm490_vm3, %v5597_v28  ;;  %496 = vst.msk [vmem:[#allocation3 + $0x28] sm:$0xff] %vm490_vm3, %v5597_v28  ;;  %vm1297_vm4 = vcmp.lt.s32.totalorder %v6245_v30, 10 }
 0x3cc   : > { %v1549_v50 = vcombine.low %v1532_v55, %v1540_v56  ;;  %v1548_v59 = vrot.slane %v1541_v57, %v6095_v36  ;;  %v1844_v23 = vld [vmem:[#allocation2 + $0x8] sm:$0xff]  ;;  %v1846_v27 = vld [vmem:[#allocation2 + $0x18] sm:$0xff]  ;;  %497 = vst.msk [vmem:[#allocation3 + $0x30] sm:$0xff] %vm490_vm3, %v5597_v28  ;;  %498 = vst.msk [vmem:[#allocation3 + $0x38] sm:$0xff] %vm490_vm3, %v5597_v28 }
 0x3cd   : > { %v1507_v61 = vcombine.low %v1498_v60, %v1506_v58  ;;  %v1508_v9 = vcombine.high %v1498_v60, %v1506_v58  ;;  %499 = vst.msk [vmem:[#allocation3 + $0x40] sm:$0xff] %vm490_vm3, %v5597_v28  ;;  %500 = vst.msk [vmem:[#allocation3 + $0x48] sm:$0xff] %vm490_vm3, %v5597_v28 }
 0x3ce   : > { %v1556_v62 = vrot.slane %v1549_v50, %v6095_v36  ;;  %501 = vst.msk [vmem:[#allocation3 + $0x50] sm:$0xff] %vm490_vm3, %v5597_v28  ;;  %502 = vst.msk [vmem:[#allocation3 + $0x58] sm:$0xff] %vm490_vm3, %v5597_v28 }
 0x3cf   : > { %v1562_v1 = vshrl.u32 %v1507_v61, 16  ;;  %v1568_v15 = vshrl.u32 %v1508_v9, 16  ;;  %503 = vst.msk [vmem:[#allocation3 + $0x60] sm:$0xff] %vm490_vm3, %v5597_v28  ;;  %504 = vst.msk [vmem:[#allocation3 + $0x68] sm:$0xff] %vm490_vm3, %v5597_v28 }
 0x3d0   : > { %v1557_v63 = vcombine.low %v1548_v59, %v1556_v62  ;;  %v1558_v6 = vcombine.high %v1548_v59, %v1556_v62  ;;  %505 = vst.msk [vmem:[#allocation3 + $0x70] sm:$0xff] %vm490_vm3, %v5597_v28  ;;  %506 = vst.msk [vmem:[#allocation3 + $0x78] sm:$0xff] %vm490_vm3, %v5597_v28 }
 0x3d2   : > { %v1561_v0 = vpack.i.b16 %v1557_v63, %v1507_v61  ;;  %v1563_v3 = vshrl.u32 %v1557_v63, 16  ;;  %v1569_v12 = vshrl.u32 %v1558_v6, 16  ;;  %v1567_v13 = vpack.i.b16 %v1558_v6, %v1508_v9  ;;  %v6319_v6 = vld [vmem:[#allocation3 + $0x10] sm:$0xff] }
 0x3d4   : > { %v1852_v7 = vsel %vm523_vm2, %v1561_v0, 0  ;;  %v1564_v8 = vpack.i.b16 %v1563_v3, %v1562_v1  ;;  %v1570_v16 = vpack.i.b16 %v1569_v12, %v1568_v15  ;;  %v1946_v22 = vsel %vm523_vm2, %v1567_v13, 0  ;;  %v6314_v3 = vld [vmem:[#allocation3 + $0x8] sm:$0xff]  ;;  %v6337_v13 = vld [vmem:[#allocation3 + $0x18] sm:$0xff] }
 0x3d5   : > { %4892 = vmatpush3.bf16.xpose.msra.mxu0 %v1852_v7  ;;  %v6656_v30 = vld [vmem:[#allocation3 + $0x48] sm:$0xff] }
 0x3d6   : > { %v1899_v10 = vsel %vm523_vm2, %v1564_v8, 0  ;;  %4903 = vmatprep.subr.bf16.mxu0 %v7104_v32  ;;  %v1993_v24 = vsel %vm523_vm2, %v1570_v16, 0 }
 0x3d7   : > { %4898 = vmatpush3.bf16.xpose.msra.mxu1 %v1899_v10 }
 0x3d8   : > { %4909 = vmatprep.subr.bf16.mxu1 %v7104_v32 }
 0x3dc   : > { %4894 = vmatmul.mubr.msk.bf16.vlgmr.msra.gmra.mrb[4].mxu0 %vm523_vm2, %v1843_v18  ;;  %v6343_v18 = vld [vmem:[#allocation3 + $0x28] sm:$0xff] }
 0x3dd   : > { %4904 = vmatpush3.bf16.xpose.msra.mxu0 %v1946_v22  ;;  %4905 = vmatprep.mubr.msk.bf16.mxu0 %vm5590_vm1, %v7104_v32 }
 0x3de   : > { %4900 = vmatmul.mubr.msk.bf16.vlgmr.msra.gmra.mrb[4].mxu1 %vm523_vm2, %v1844_v23  ;;  %4915 = vmatprep.subr.bf16.mxu0 %v7104_v32 }
 0x3df   : > { %4910 = vmatpush3.bf16.xpose.msra.mxu1 %v1993_v24  ;;  %4911 = vmatprep.mubr.msk.bf16.mxu1 %vm5590_vm1, %v7104_v32  ;;  %v6349_v24 = vld [vmem:[#allocation3 + $0x20] sm:$0xff] }
 0x3e0   : > { %4921 = vmatprep.subr.bf16.mxu1 %v7104_v32 }
 0x3e4   : > { %4906 = vmatmul.mubr.msk.bf16.vlgmr.msra.gmra.mrb[8].mxu0 %vm523_vm2, %v1845_v26 }
 0x3e5   : > { %4917 = vmatprep.mubr.msk.bf16.mxu0 %vm5590_vm1, %v7104_v32 }
 0x3e6   : > { %4912 = vmatmul.mubr.msk.bf16.vlgmr.msra.gmra.mrb[8].mxu1 %vm523_vm2, %v1846_v27 }
 0x3e7   : > { %4923 = vmatprep.mubr.msk.bf16.mxu1 %vm5590_vm1, %v7104_v32 }
 0x4af   : > { %v1888_v33 = vpop.f32.mrb[4].mxu0 }
 0x4b0   : > { %v6250_v34 = vsel %vm1297_vm4, %v1888_v33, -1e+30  ;;  %v4895_v35 = vpop.f32.mrb[5].mxu0  ;;  %v6359_v33 = vld [vmem:[#allocation3 + $0x38] sm:$0xff] }
 0x4b1   : > { %v1891_v37 = vpop.f32.mrb[6].mxu0  ;;  %v1935_v38 = vpop.f32.mrb[4].mxu1  ;;  %v2055_v39 = vsel %vm2054_vm5, %v6250_v34, -inf }
 0x4b2   : > { %v6256_v40 = vsel %vm1297_vm4, %v1891_v37, -1e+30  ;;  %v6260_v14 = vsel %vm1297_vm4, %v1935_v38, -1e+30  ;;  %v4901_v41 = vpop.f32.mrb[5].mxu1  ;;  %2056 = vmax.xlane.f32.xlu0 %v2055_v39  ;;  %v4896_v43 = vpop.f32.mrb[7].mxu0 }
 0x4b3   : > { %v1938_v44 = vpop.f32.mrb[6].mxu1  ;;  %v2058_v45 = vsel %vm2054_vm5, %v6256_v40, -inf  ;;  %v2061_v47 = vsel %vm2054_vm5, %v6260_v14, -inf  ;;  %v6368_v39 = vld [vmem:[#allocation3 + $0x30] sm:$0xff] }
 0x4b4   : > { %v4902_v46 = vpop.f32.mrb[7].mxu1  ;;  %2059 = vmax.xlane.f32.xlu1 %v2058_v45  ;;  %v6268_v48 = vsel %vm1297_vm4, %v1938_v44, -1e+30 }
 0x4b5   : > { %v2064_v54 = vsel %vm2054_vm5, %v6268_v48, -inf }
 0x4b6   : > { %2062 = vmax.xlane.f32.xlu0 %v2061_v47 }
 0x4b7   : > { %v1982_v49 = vpop.f32.mrb[8].mxu0 }
 0x4b8   : > { %v4907_v51 = vpop.f32.mrb[9].mxu0  ;;  %v6274_v55 = vsel %vm1297_vm4, %v1982_v49, -1e+30 }
 0x4b9   : > { %v1985_v52 = vpop.f32.mrb[10].mxu0  ;;  %v2029_v53 = vpop.f32.mrb[8].mxu1  ;;  %v2067_v62 = vsel %vm2054_vm5, %v6274_v55, -inf }
 0x4ba   : > { %v6278_v56 = vsel %vm1297_vm4, %v1985_v52, -1e+30  ;;  %v4913_v57 = vpop.f32.mrb[9].mxu1  ;;  %2065 = vmax.xlane.f32.xlu0 %v2064_v54  ;;  %v4908_v58 = vpop.f32.mrb[11].mxu0  ;;  %v6290_v63 = vsel %vm1297_vm4, %v2029_v53, -1e+30 }
 0x4bb   : > { %v2032_v60 = vpop.f32.mrb[10].mxu1  ;;  %v2070_v50 = vsel %vm2054_vm5, %v6278_v56, -inf  ;;  %v2073_v1 = vsel %vm2054_vm5, %v6290_v63, -inf }
 0x4bc   : > { %v6284_v61 = vsel %vm1297_vm4, %v2032_v60, -1e+30  ;;  %v4914_v59 = vpop.f32.mrb[11].mxu1  ;;  %2071 = vmax.xlane.f32.xlu1 %v2070_v50 }
 0x4bd   : > { %v2076_v0 = vsel %vm2054_vm5, %v6284_v61, -inf }
 0x4be   : > { %2068 = vmax.xlane.f32.xlu0 %v2067_v62 }
 0x4c0   : > { %2077 = vmax.xlane.f32.xlu1 %v2076_v0 }
 0x4c2   : > { %2074 = vmax.xlane.f32.xlu0 %v2073_v1 }
 0x4d1   : > { %1573 = vrot.lane.b32.xlu1 %v6101_v42, %s5598_s7 }
 0x4d5   : > { %1575 = vrot.lane.b32.xlu1 %v6122_v17, %s5598_s7 }
 0x4d8   : > { %1571 = vrot.lane.b32.xlu0 %v6067_v11, %s5598_s7 }
 0x4d9   : > { %1577 = vrot.lane.b32.xlu1 %v6129_v31, %s5598_s7 }
 0x4dc   : > { %920 = vrot.lane.b32.xlu0 %v6078_v21, %s5598_s7  ;;  %v6312_v21 = vld [vmem:[#allocation3] sm:$0xff] }
 0x4dd   : > { %918 = vrot.lane.b32.xlu1 %v6063_v5, %s5598_s7 }
 0x4e0   : > { %924 = vrot.lane.b32.xlu0 %v6087_v29, %s5598_s7 }
 0x4e1   : > { %922 = vrot.lane.b32.xlu1 %v6074_v19, %s5598_s7 }
 0x4e4   : > { %2498 = vrot.lane.b32.xlu0 %v6101_v42, %s5599_s16 }
 0x4e5   : > { %2496 = vrot.lane.b32.xlu1 %v6067_v11, %s5599_s16 }
 0x4e8   : > { %2502 = vrot.lane.b32.xlu0 %v6129_v31, %s5599_s16 }
 0x4e9   : > { %2500 = vrot.lane.b32.xlu1 %v6122_v17, %s5599_s16 }
 0x53f   : > { %v2057_v5 = vpop.xlane.xlu0 %2056 }
 0x540   : > { %v6317_v19 = vmax.f32 %v6312_v21, %v2057_v5 }
 0x541   : > { %v2060_v29 = vpop.xlane.xlu1 %2059 }
 0x542   : > { %2488 = vst.msk [vmem:[#allocation3] sm:$0xff] %vm490_vm3, %v6317_v19  ;;  %v6326_v8 = vmax.f32 %v6314_v3, %v2060_v29  ;;  %2113 = vperm.xlu0 %5149, %v6317_v19  }
 0x543   : > { %v2063_v9 = vpop.xlane.xlu0 %2062 }
 0x544   : > { %2489 = vst.msk [vmem:[#allocation3 + $0x8] sm:$0xff] %vm490_vm3, %v6326_v8  ;;  %v6334_v12 = vmax.f32 %v6319_v6, %v2063_v9  ;;  %2118 = vperm.xlu1 %5150, %v6326_v8  }
 0x546   : > { %2490 = vst.msk [vmem:[#allocation3 + $0x10] sm:$0xff] %vm490_vm3, %v6334_v12 }
 0x547   : > { %v2066_v16 = vpop.xlane.xlu0 %2065 }
 0x548   : > { %v6346_v22 = vmax.f32 %v6337_v13, %v2066_v16  ;;  %2123 = vperm.xlu1 %5150, %v6334_v12  }
 0x549   : > { %v2072_v23 = vpop.xlane.xlu1 %2071 }
 0x54a   : > { %2491 = vst.msk [vmem:[#allocation3 + $0x18] sm:$0xff] %vm490_vm3, %v6346_v22  ;;  %v6356_v27 = vmax.f32 %v6343_v18, %v2072_v23  ;;  %2128 = vperm.xlu0 %5149, %v6346_v22  }
 0x54b   : > { %v2069_v28 = vpop.xlane.xlu0 %2068 }
 0x54c   : > { %2493 = vst.msk [vmem:[#allocation3 + $0x28] sm:$0xff] %vm490_vm3, %v6356_v27  ;;  %v6366_v37 = vmax.f32 %v6349_v24, %v2069_v28 }
 0x54d   : > { %v2078_v38 = vpop.xlane.xlu1 %2077 }
 0x54e   : > { %2492 = vst.msk [vmem:[#allocation3 + $0x20] sm:$0xff] %vm490_vm3, %v6366_v37  ;;  %v6375_v43 = vmax.f32 %v6359_v33, %v2078_v38  ;;  %2133 = vperm.xlu1 %5150, %v6366_v37   ;;  %2138 = vperm.xlu0 %5149, %v6356_v27  }
 0x54f   : > { %v2075_v44 = vpop.xlane.xlu0 %2074 }
 0x550   : > { %2495 = vst.msk [vmem:[#allocation3 + $0x38] sm:$0xff] %vm490_vm3, %v6375_v43  ;;  %v6384_v46 = vmax.f32 %v6368_v39, %v2075_v44 }
 0x551   : > { %v1574_v47 = vpop.permute.xlu1 %1573 }
 0x552   : > { %2494 = vst.msk [vmem:[#allocation3 + $0x30] sm:$0xff] %vm490_vm3, %v6384_v46  ;;  %2143 = vperm.xlu1 %5150, %v6384_v46   ;;  %2148 = vperm.xlu0 %5149, %v6375_v43   ;;  %v1584_v58 = vshrl.u32 %v1574_v47, 16 }
 0x553   : > { %v1572_v52 = vpop.permute.xlu0 %1571 }
 0x554   : > { %v1583_v54 = vshrl.u32 %v1572_v52, 16  ;;  %v1581_v60 = vpack.i.b16 %v1574_v47, %v1572_v52 }
 0x555   : > { %v1576_v51 = vpop.permute.xlu1 %1575 }
 0x556   : > { %v1585_v0 = vpack.i.b16 %v1584_v58, %v1583_v54  ;;  %v1591_v1 = vshrl.u32 %v1576_v51, 16  ;;  %v1595_v9 = vcombine.high %v1581_v60, %v6076_v20  ;;  %v1602_v16 = vrot.slane %v1581_v60, %v6084_v25 }
 0x557   : > { %v921_v50 = vpop.permute.xlu0 %920 }
 0x558   : > { %v1661_v44 = vcombine.high %v1585_v0, %v6076_v20  ;;  %v931_v45 = vshrl.u32 %v921_v50, 16  ;;  %v1609_v58 = vrot.slane %v1595_v9, %v6084_v25 }
 0x559   : > { %v1578_v53 = vpop.permute.xlu1 %1577 }
 0x55a   : > { %v1589_v57 = vpack.i.b16 %v1578_v53, %v1576_v51  ;;  %v1592_v59 = vshrl.u32 %v1578_v53, 16 }
 0x55b   : > { %v925_v54 = vpop.permute.xlu0 %924 }
 0x55c   : > { %v1610_v5 = vcombine.high %v1589_v57, %v6076_v20  ;;  %v1617_v29 = vrot.slane %v1589_v57, %v6084_v25  ;;  %v1593_v23 = vpack.i.b16 %v1592_v59, %v1591_v1  ;;  %v6400_v57 = vrot.slane %v1585_v0, %v6084_v25 }
 0x55d   : > { %v919_v62 = vpop.permute.xlu1 %918  ;;  %v939_v1 = vshrl.u32 %v925_v54, 16 }
 0x55e   : > { %v928_v28 = vpack.i.b16 %v921_v50, %v919_v62  ;;  %v930_v38 = vshrl.u32 %v919_v62, 16  ;;  %v1624_v47 = vrot.slane %v1610_v5, %v6084_v25  ;;  %v1625_v52 = vcombine.low %v1602_v16, %v1617_v29 }
 0x55f   : > { %v1626_v53 = vcombine.high %v1602_v16, %v1617_v29  ;;  %v1676_v49 = vcombine.high %v1593_v23, %v6076_v20  ;;  %v6404_v60 = vrot.slane %v1593_v23, %v6084_v25  ;;  %v6408_v50 = vrot.slane %v1661_v44, %v6084_v25 }
 0x560   : > { %v932_v59 = vpack.i.b16 %v931_v45, %v930_v38  ;;  %v942_v62 = vcombine.high %v928_v28, %v6076_v20  ;;  %v6411_v16 = vrot.slane %v1625_v52, %v6095_v36  ;;  %v1641_v9 = vcombine.low %v1609_v58, %v1624_v47 }
 0x561   : > { %v923_v51 = vpop.permute.xlu1 %922  ;;  %v6414_v0 = vrot.slane %v1626_v53, %v6095_v36  ;;  %v1642_v35 = vcombine.high %v1609_v58, %v1624_v47  ;;  %v949_v23 = vrot.slane %v928_v28, %v6084_v25  ;;  %v1690_v44 = vrot.slane %v1676_v49, %v6084_v25 }
 0x562   : > { %v936_v5 = vpack.i.b16 %v925_v54, %v923_v51  ;;  %v938_v29 = vshrl.u32 %v923_v51, 16  ;;  %v1691_v54 = vcombine.low %v6400_v57, %v6404_v60  ;;  %v956_v52 = vrot.slane %v942_v62, %v6084_v25 }
 0x563   : > { %v1008_v51 = vcombine.high %v932_v59, %v6076_v20  ;;  %v6427_v58 = vrot.slane %v1641_v9, %v6095_v36  ;;  %v1015_v49 = vrot.slane %v932_v59, %v6084_v25 }
 0x564   : > { %v940_v41 = vpack.i.b16 %v939_v1, %v938_v29  ;;  %v957_v45 = vcombine.high %v936_v5, %v6076_v20  ;;  %v964_v38 = vrot.slane %v936_v5, %v6084_v25  ;;  %v1692_v1 = vcombine.high %v6400_v57, %v6404_v60 }
 0x566   : > { %v971_v53 = vrot.slane %v957_v45, %v6084_v25  ;;  %v972_v26 = vcombine.low %v949_v23, %v964_v38  ;;  %v973_v47 = vcombine.high %v949_v23, %v964_v38  ;;  %v1023_v28 = vcombine.high %v940_v41, %v6076_v20 }
 0x567   : > { %v1030_v5 = vrot.slane %v940_v41, %v6084_v25  ;;  %v1022_v23 = vrot.slane %v1008_v51, %v6084_v25 }
 0x568   : > { %v980_v62 = vrot.slane %v972_v26, %v6095_v36  ;;  %v987_v29 = vrot.slane %v973_v47, %v6095_v36  ;;  %v988_v15 = vcombine.low %v956_v52, %v971_v53  ;;  %v989_v45 = vcombine.high %v956_v52, %v971_v53 }
 0x569   : > { %v1037_v38 = vrot.slane %v1023_v28, %v6084_v25  ;;  %v1038_v10 = vcombine.low %v1015_v49, %v1030_v5  ;;  %v1039_v9 = vcombine.high %v1015_v49, %v1030_v5 }
 0x56a   : > { %v996_v7 = vrot.slane %v988_v15, %v6095_v36  ;;  %v1003_v57 = vrot.slane %v989_v45, %v6095_v36  ;;  %v1074_v60 = vcombine.low %v980_v62, %v987_v29  ;;  %v4756_v59 = vcombine.high %v980_v62, %v987_v29 }
 0x56b   : > { %v1046_v41 = vrot.slane %v1038_v10, %v6095_v36  ;;  %v1053_v26 = vrot.slane %v1039_v9, %v6095_v36  ;;  %v1054_v32 = vcombine.low %v1022_v23, %v1037_v38  ;;  %v1055_v47 = vcombine.high %v1022_v23, %v1037_v38 }
 0x56c   : > { %v1081_v52 = vrot.slane %v1074_v60, %v6084_v25  ;;  %v1089_v51 = vrot.slane %v4756_v59, %v6084_v25  ;;  %v1090_v53 = vcombine.low %v996_v7, %v1003_v57  ;;  %v4757_v28 = vcombine.high %v996_v7, %v1003_v57 }
 0x56d   : > { %v1062_v49 = vrot.slane %v1054_v32, %v6095_v36  ;;  %v1069_v15 = vrot.slane %v1055_v47, %v6095_v36  ;;  %v1124_v5 = vcombine.low %v1046_v41, %v1053_v26  ;;  %v4758_v45 = vcombine.high %v1046_v41, %v1053_v26 }
 0x56e   : > { %v1656_v62 = vrot.slane %v1642_v35, %v6095_v36  ;;  %v1097_v10 = vrot.slane %v1090_v53, %v6084_v25  ;;  %v1105_v29 = vrot.slane %v4757_v28, %v6084_v25  ;;  %v1106_v9 = vcombine.low %v1081_v52, %v1089_v51 }
 0x56f   : > { %v1131_v23 = vrot.slane %v1124_v5, %v6084_v25  ;;  %v1139_v38 = vrot.slane %v4758_v45, %v6084_v25  ;;  %v1140_v60 = vcombine.low %v1062_v49, %v1069_v15  ;;  %v4759_v59 = vcombine.high %v1062_v49, %v1069_v15 }
 0x570   : > { %v1707_v7 = vcombine.low %v6408_v50, %v1690_v44  ;;  %v1708_v32 = vcombine.high %v6408_v50, %v1690_v44  ;;  %v1727_v57 = vcombine.low %v6411_v16, %v6414_v0  ;;  %v1114_v41 = vcombine.low %v1097_v10, %v1105_v29 }
 0x571   : > { %v4768_v35 = vcombine.high %v6411_v16, %v6414_v0  ;;  %v1147_v26 = vrot.slane %v1140_v60, %v6084_v25  ;;  %v1155_v47 = vrot.slane %v4759_v59, %v6084_v25  ;;  %v1156_v52 = vcombine.low %v1131_v23, %v1139_v38 }
 0x572   : > { %v1699_v51 = vrot.slane %v1691_v54, %v6095_v36  ;;  %v1706_v53 = vrot.slane %v1692_v1, %v6095_v36  ;;  %v1113_v28 = vrot.slane %v1106_v9, %v6095_v36  ;;  %v1121_v50 = vrot.slane %v1114_v41, %v6095_v36 }
 0x573   : > { %v1743_v44 = vcombine.low %v6427_v58, %v1656_v62  ;;  %v4769_v49 = vcombine.high %v6427_v58, %v1656_v62  ;;  %v1164_v15 = vcombine.low %v1147_v26, %v1155_v47  ;;  %v1715_v16 = vrot.slane %v1707_v7, %v6095_v36 }
 0x574   : > { %v1722_v0 = vrot.slane %v1708_v32, %v6095_v36  ;;  %v1122_v5 = vcombine.low %v1113_v28, %v1121_v50  ;;  %v1123_v45 = vcombine.high %v1113_v28, %v1121_v50  ;;  %v1163_v10 = vrot.slane %v1156_v52, %v6095_v36 }
 0x575   : > { %v1171_v54 = vrot.slane %v1164_v15, %v6095_v36  ;;  %v1734_v1 = vrot.slane %v1727_v57, %v6084_v25  ;;  %v1742_v29 = vrot.slane %v4768_v35, %v6084_v25  ;;  %v1777_v9 = vcombine.low %v1699_v51, %v1706_v53 }
 0x576   : > { %v4770_v23 = vcombine.high %v1699_v51, %v1706_v53  ;;  %v1750_v38 = vrot.slane %v1743_v44, %v6084_v25  ;;  %v1758_v58 = vrot.slane %v4769_v49, %v6084_v25  ;;  %v1793_v59 = vcombine.low %v1715_v16, %v1722_v0 }
 0x577   : > { %v1172_v62 = vcombine.low %v1163_v10, %v1171_v54  ;;  %v1173_v60 = vcombine.high %v1163_v10, %v1171_v54  ;;  %v4771_v7 = vcombine.high %v1715_v16, %v1722_v0  ;;  %v1178_v32 = vshrl.u32 %v1122_v5, 16 }
 0x578   : > { %v1186_v41 = vshrl.u32 %v1123_v45, 16  ;;  %v1784_v57 = vrot.slane %v1777_v9, %v6084_v25  ;;  %v1792_v35 = vrot.slane %v4770_v23, %v6084_v25  ;;  %v1759_v53 = vcombine.low %v1734_v1, %v1742_v29 }
 0x579   : > { %v1176_v26 = vpack.i.b16 %v1172_v62, %v1122_v5  ;;  %v1179_v47 = vshrl.u32 %v1172_v62, 16  ;;  %v1184_v52 = vpack.i.b16 %v1173_v60, %v1123_v45  ;;  %v1187_v28 = vshrl.u32 %v1173_v60, 16 }
 0x57a   : > { %v1767_v44 = vcombine.low %v1750_v38, %v1758_v58  ;;  %v1800_v49 = vrot.slane %v1793_v59, %v6084_v25  ;;  %v1808_v15 = vrot.slane %v4771_v7, %v6084_v25  ;;  %v1809_v16 = vcombine.low %v1784_v57, %v1792_v35 }
 0x57b   : > { %v1180_v50 = vpack.i.b16 %v1179_v47, %v1178_v32  ;;  %v1188_v51 = vpack.i.b16 %v1187_v28, %v1186_v41  ;;  %1191 = vst.msk [vmem:[#allocation2 + $0x20] sm:$0xff] %vm523_vm2, %v1176_v26  ;;  %1193 = vst.msk [vmem:[#allocation2 + $0x30] sm:$0xff] %vm523_vm2, %v1184_v52  ;;  %v1766_v0 = vrot.slane %v1759_v53, %v6095_v36  ;;  %v7154_v26 = vmov 0.0   ;;  %v2497_v47 = vpop.permute.xlu1 %2496  ;;  %v2499_v52 = vpop.permute.xlu0 %2498 }
 0x57c   : > { %v1774_v5 = vrot.slane %v1767_v44, %v6095_v36  ;;  %v1817_v45 = vcombine.low %v1800_v49, %v1808_v15  ;;  %v1816_v54 = vrot.slane %v1809_v16, %v6095_v36  ;;  %v2509_v53 = vshrl.u32 %v2499_v52, 16 }
 0x57d   : > { %1192 = vst.msk [vmem:[#allocation2 + $0x28] sm:$0xff] %vm523_vm2, %v1180_v50  ;;  %1194 = vst.msk [vmem:[#allocation2 + $0x38] sm:$0xff] %vm523_vm2, %v1188_v51  ;;  %v2508_v51 = vshrl.u32 %v2497_v47, 16  ;;  %v2506_v16 = vpack.i.b16 %v2499_v52, %v2497_v47 }
 0x57e   : > { %v1775_v10 = vcombine.low %v1766_v0, %v1774_v5  ;;  %v1824_v1 = vrot.slane %v1817_v45, %v6095_v36  ;;  %v6484_v29 = vcombine.high %v1766_v0, %v1774_v5 }
 0x57f   : > { %v2501_v28 = vpop.permute.xlu1 %2500  ;;  %v2503_v57 = vpop.permute.xlu0 %2502  ;;  %v2510_v15 = vpack.i.b16 %v2509_v53, %v2508_v51 }
 0x580   : > { %v1825_v9 = vcombine.low %v1816_v54, %v1824_v1  ;;  %v6486_v23 = vcombine.high %v1816_v54, %v1824_v1  ;;  %v1831_v38 = vshrl.u32 %v1775_v10, 16  ;;  %v1839_v58 = vshrl.u32 %v6484_v29, 16 }
 0x581   : > { %v2516_v35 = vshrl.u32 %v2501_v28, 16  ;;  %v2517_v50 = vshrl.u32 %v2503_v57, 16  ;;  %v2514_v49 = vpack.i.b16 %v2503_v57, %v2501_v28  ;;  %v2586_v45 = vcombine.high %v2510_v15, %v6076_v20 }
 0x582   : > { %v1829_v62 = vpack.i.b16 %v1825_v9, %v1775_v10  ;;  %v1832_v60 = vshrl.u32 %v1825_v9, 16  ;;  %v1837_v59 = vpack.i.b16 %v6486_v23, %v6484_v29  ;;  %v1840_v7 = vshrl.u32 %v6486_v23, 16 }
 0x583   : > { %v2518_v44 = vpack.i.b16 %v2517_v50, %v2516_v35  ;;  %v2535_v5 = vcombine.high %v2514_v49, %v6076_v20  ;;  %v2520_v10 = vcombine.high %v2506_v16, %v6076_v20 }
 0x584   : > { %4916 = vmatpush3.bf16.msra.mxu0 %v1829_v62  ;;  %v1833_v32 = vpack.i.b16 %v1832_v60, %v1831_v38  ;;  %v6492_v41 = vpack.i.b16 %v1840_v7, %v1839_v58  ;;  %v2600_v38 = vrot.slane %v2586_v45, %v6084_v25  ;;  %v2593_v62 = vrot.slane %v2510_v15, %v6084_v25 }
 0x585   : > { %4927 = vmatprep.subr.bf16.mxu0 %v7154_v26  ;;  %v2601_v0 = vcombine.high %v2518_v44, %v6076_v20  ;;  %v2549_v1 = vrot.slane %v2535_v5, %v6084_v25  ;;  %v2608_v9 = vrot.slane %v2518_v44, %v6084_v25  ;;  %v2534_v58 = vrot.slane %v2520_v10, %v6084_v25 }
 0x586   : > { %4922 = vmatpush3.bf16.msra.mxu1 %v1833_v32  ;;  %v2542_v60 = vrot.slane %v2514_v49, %v6084_v25  ;;  %v2527_v7 = vrot.slane %v2506_v16, %v6084_v25 }
 0x587   : > { %4933 = vmatprep.subr.bf16.mxu1 %v7154_v26  ;;  %v2615_v54 = vrot.slane %v2601_v0, %v6084_v25  ;;  %v2566_v52 = vcombine.low %v2534_v58, %v2549_v1  ;;  %v2567_v28 = vcombine.high %v2534_v58, %v2549_v1  ;;  %v2616_v57 = vcombine.low %v2593_v62, %v2608_v9 }
 0x588   : > { %v2617_v35 = vcombine.high %v2593_v62, %v2608_v9  ;;  %v2550_v51 = vcombine.low %v2527_v7, %v2542_v60  ;;  %v2551_v53 = vcombine.high %v2527_v7, %v2542_v60 }
 0x589   : > { %v2632_v32 = vcombine.low %v2600_v38, %v2615_v54  ;;  %v2633_v47 = vcombine.high %v2600_v38, %v2615_v54  ;;  %v2574_v16 = vrot.slane %v2566_v52, %v6095_v36  ;;  %v2581_v45 = vrot.slane %v2567_v28, %v6095_v36 }
 0x58a   : > { %v2624_v10 = vrot.slane %v2616_v57, %v6095_v36  ;;  %v2631_v54 = vrot.slane %v2617_v35, %v6095_v36  ;;  %v2558_v9 = vrot.slane %v2550_v51, %v6095_v36  ;;  %v2565_v38 = vrot.slane %v2551_v53, %v6095_v36 }
 0x58b   : > { %v2640_v0 = vrot.slane %v2632_v32, %v6095_v36  ;;  %v2647_v5 = vrot.slane %v2633_v47, %v6095_v36  ;;  %v4781_v32 = vcombine.high %v2574_v16, %v2581_v45 }
 0x58c   : > { %v4782_v52 = vcombine.high %v2624_v10, %v2631_v54  ;;  %v2652_v35 = vcombine.low %v2558_v9, %v2565_v38 }
 0x58d   : > { %v2718_v62 = vcombine.low %v2640_v0, %v2647_v5  ;;  %v4783_v60 = vcombine.high %v2640_v0, %v2647_v5 }
 0x58f   : > { %v2725_v51 = vrot.slane %v2718_v62, %v6084_v25  ;;  %v2733_v53 = vrot.slane %v4783_v60, %v6084_v25 }
 0x5c1   : > { %v2114_v50 = vpop.permute.xlu0 %2113 }
 0x5c2   : > { %v2151_v15 = vsub.f32 %v6250_v34, %v2114_v50  ;;  %v2668_v34 = vcombine.low %v2574_v16, %v2581_v45  ;;  %v4780_v50 = vcombine.high %v2558_v9, %v2565_v38  ;;  %v2742_v38 = vcombine.low %v2725_v51, %v2733_v53 }
 0x5c3   : > { %v2119_v44 = vpop.permute.xlu1 %2118 }
 0x5c4   : > { %v2152_v49 = vsub.f32 %v6256_v40, %v2119_v44  ;;  %v2702_v40 = vcombine.low %v2624_v10, %v2631_v54  ;;  %v2675_v5 = vrot.slane %v2668_v34, %v6084_v25  ;;  %v2717_v10 = vrot.slane %v4782_v52, %v6084_v25 }
 0x5c5   : > { %v2659_v54 = vrot.slane %v2652_v35, %v6084_v25 }
 0x5c6   : > { %v2159_v1 = vpack.c.bf16 %v2152_v49, %v2151_v15  ;;  %v2683_v49 = vrot.slane %v4781_v32, %v6084_v25  ;;  %v2709_v16 = vrot.slane %v2702_v40, %v6084_v25 }
 0x5c7   : > { %v2124_v58 = vpop.permute.xlu1 %2123 }
 0x5c8   : > { %v2164_v7 = vmul.bf16 1069105081, %v2159_v1  ;;  %v2153_v28 = vsub.f32 %v6260_v14, %v2124_v58  ;;  %v2667_v1 = vrot.slane %v4780_v50, %v6084_v25  ;;  %v2692_v60 = vcombine.low %v2675_v5, %v2683_v49 }
 0x5c9   : > { %v2129_v47 = vpop.permute.xlu0 %2128 }
 0x5ca   : > { %5167 = vpow.bf16 %v2164_v7  ;;  %v2154_v57 = vsub.f32 %v6268_v48, %v2129_v47  ;;  %v2684_v40 = vcombine.low %v2659_v54, %v2667_v1  ;;  %v2749_v47 = vrot.slane %v2742_v38, %v6095_v36  ;;  %v3038_v1 = vld [vmem:[#allocation2 + $0x28] sm:$0xff]  ;;  %v3039_v38 = vld [vmem:[#allocation2 + $0x30] sm:$0xff] }
 0x5cc   : > { %v2160_v44 = vpack.c.bf16 %v2154_v57, %v2153_v28  ;;  %v2699_v57 = vrot.slane %v2692_v60, %v6095_v36 }
 0x5cd   : > { %v2139_v15 = vpop.permute.xlu0 %2138  ;;  %v2134_v0 = vpop.permute.xlu1 %2133 }
 0x5ce   : > { %v2167_v45 = vmul.bf16 1069105081, %v2160_v44  ;;  %v2156_v14 = vsub.f32 %v6278_v56, %v2139_v15  ;;  %v2155_v48 = vsub.f32 %v6274_v55, %v2134_v0  ;;  %v2734_v56 = vcombine.low %v2709_v16, %v2717_v10 }
 0x5d0   : > { %5169 = vpow.bf16 %v2167_v45  ;;  %v2161_v9 = vpack.c.bf16 %v2156_v14, %v2155_v48  ;;  %v2741_v35 = vrot.slane %v2734_v56, %v6095_v36  ;;  %v3037_v14 = vld [vmem:[#allocation2 + $0x20] sm:$0xff] }
 0x5d1   : > { %v2149_v58 = vpop.permute.xlu0 %2148  ;;  %v2144_v62 = vpop.permute.xlu1 %2143 }
 0x5d2   : > { %v2170_v7 = vmul.bf16 1069105081, %v2161_v9  ;;  %v2158_v34 = vsub.f32 %v6284_v61, %v2149_v58  ;;  %v2157_v32 = vsub.f32 %v6290_v63, %v2144_v62  ;;  %v2691_v61 = vrot.slane %v2684_v40, %v6095_v36  ;;  %v3040_v58 = vld [vmem:[#allocation2 + $0x38] sm:$0xff] }
 0x5d3   : > { %v2750_v63 = vcombine.low %v2741_v35, %v2749_v47  ;;  %v2751_v15 = vcombine.high %v2741_v35, %v2749_v47 }
 0x5d4   : > { %5171 = vpow.bf16 %v2170_v7  ;;  %v2162_v55 = vpack.c.bf16 %v2158_v34, %v2157_v32  ;;  %v2700_v50 = vcombine.low %v2691_v61, %v2699_v57 }
 0x5d5   : > { %v6533_v52 = vpop.eup %5167  ;;  %v2756_v29 = vshrl.u32 %v2750_v63, 16  ;;  %v2762_v45 = vshrl.u32 %v2751_v15, 16 }
 0x5d6   : > { %v2173_v28 = vmul.bf16 1069105081, %v2162_v55  ;;  %4918 = vmatmul.mubr.msk.bf16.vlgmr.msra.gmra.mrb[12].mxu0 %vm2054_vm5, %v6533_v52  ;;  %v2754_v51 = vpack.i.b16 %v2750_v63, %v2700_v50 }
 0x5d7   : > { %4928 = vmatpush3.bf16.msra.mxu0 %v1837_v59  ;;  %4929 = vmatprep.mubr.msk.bf16.mxu0 %vm5590_vm1, %v7154_v26  ;;  %v2755_v59 = vshrl.u32 %v2700_v50, 16 }
 0x5d8   : > { %5173 = vpow.bf16 %v2173_v28  ;;  %4939 = vmatprep.subr.bf16.mxu0 %v7154_v26  ;;  %v3045_v53 = vsel %vm523_vm2, %v2754_v51, 0 }
 0x5d9   : > { %v2757_v0 = vpack.i.b16 %v2756_v29, %v2755_v59 }
 0x5db   : > { %v6546_v44 = vpop.eup %5169  ;;  %v3092_v16 = vsel %vm523_vm2, %v2757_v0, 0 }
 0x5dc   : > { %4924 = vmatmul.mubr.msk.bf16.vlgmr.msra.gmra.mrb[12].mxu1 %vm2054_vm5, %v6546_v44 }
 0x5dd   : > { %4934 = vmatpush3.bf16.msra.mxu1 %v6492_v41  ;;  %4935 = vmatprep.mubr.msk.bf16.mxu1 %vm5590_vm1, %v7154_v26  ;;  %v2701_v41 = vcombine.high %v2691_v61, %v2699_v57 }
 0x5de   : > { %4945 = vmatprep.subr.bf16.mxu1 %v7154_v26 }
 0x5df   : > { %v6554_v23 = vpop.eup %5171  ;;  %v2760_v49 = vpack.i.b16 %v2751_v15, %v2701_v41  ;;  %v2761_v48 = vshrl.u32 %v2701_v41, 16 }
 0x5e0   : > { %4930 = vmatmul.mubr.msk.bf16.vlgmr.msra.gmra.mrb[16].mxu0 %vm2054_vm5, %v6554_v23 }
 0x5e1   : > { %4940 = vmatpush3.bf16.xpose.msra.mxu0 %v3045_v53  ;;  %4941 = vmatprep.mubr.msk.bf16.mxu0 %vm5590_vm1, %v7154_v26  ;;  %v3139_v10 = vsel %vm523_vm2, %v2760_v49, 0  ;;  %v2763_v54 = vpack.i.b16 %v2762_v45, %v2761_v48 }
 0x5e2   : > { %4951 = vmatprep.subr.bf16.mxu0 %v7154_v26 }
 0x5e3   : > { %v6562_v5 = vpop.eup %5173  ;;  %v3186_v9 = vsel %vm523_vm2, %v2763_v54, 0 }
 0x5e4   : > { %4936 = vmatmul.mubr.msk.bf16.vlgmr.msra.gmra.mrb[16].mxu1 %vm2054_vm5, %v6562_v5 }
 0x5e5   : > { %4947 = vmatprep.mubr.msk.bf16.mxu1 %vm5590_vm1, %v7154_v26 }
 0x5e6   : > { %4946 = vmatpush3.bf16.xpose.msra.mxu1 %v3092_v16 }
 0x5e7   : > { %4957 = vmatprep.subr.bf16.mxu1 %v7154_v26 }
 0x5e8   : > { %4942 = vmatmul.mubr.msk.bf16.vlgmr.msra.gmra.mrb[20].mxu0 %vm523_vm2, %v3037_v14 }
 0x5e9   : > { %4952 = vmatpush3.bf16.xpose.msra.mxu0 %v3139_v10  ;;  %4953 = vmatprep.mubr.msk.bf16.mxu0 %vm5590_vm1, %v7154_v26 }
 0x5ea   : > { %4963 = vmatprep.subr.bf16.mxu0 %v7154_v26 }
 0x5ed   : > { %4948 = vmatmul.mubr.msk.bf16.vlgmr.msra.gmra.mrb[20].mxu1 %vm523_vm2, %v3038_v1 }
 0x5ee   : > { %4958 = vmatpush3.bf16.xpose.msra.mxu1 %v3186_v9  ;;  %4959 = vmatprep.mubr.msk.bf16.mxu1 %vm5590_vm1, %v7154_v26 }
 0x5ef   : > { %4969 = vmatprep.subr.bf16.mxu1 %v7154_v26 }
 0x5f0   : > { %4954 = vmatmul.mubr.msk.bf16.vlgmr.msra.gmra.mrb[24].mxu0 %vm523_vm2, %v3039_v38 }
 0x5f1   : > { %4965 = vmatprep.mubr.msk.bf16.mxu0 %vm5590_vm1, %v7154_v26 }
 0x5f5   : > { %4960 = vmatmul.mubr.msk.bf16.vlgmr.msra.gmra.mrb[24].mxu1 %vm523_vm2, %v3040_v58 }
 0x5f6   : > { %4971 = vmatprep.mubr.msk.bf16.mxu1 %vm5590_vm1, %v7154_v26 }
 0x6a9   : > { %v6586_v62 = vpop.f32.mrb[12].mxu0 }
 0x6aa   : > { %7155 = vst [vmem:[#allocation32_spill] sm:$0xff] %v6586_v62  ;;  %v4919_v60 = vpop.f32.mrb[13].mxu0 }
 0x6ab   : > { %v6588_v7 = vpop.f32.mrb[14].mxu0 }
 0x6ac   : > { %7156 = vst [vmem:[#allocation33_spill] sm:$0xff] %v6588_v7  ;;  %v4920_v34 = vpop.f32.mrb[15].mxu0 }
 0x6af   : > { %v6590_v32 = vpop.f32.mrb[12].mxu1 }
 0x6b0   : > { %7157 = vst [vmem:[#allocation34_spill] sm:$0xff] %v6590_v32  ;;  %v4925_v56 = vpop.f32.mrb[13].mxu1 }
 0x6b1   : > { %v6592_v55 = vpop.f32.mrb[14].mxu1 }
 0x6b2   : > { %7158 = vst [vmem:[#allocation35_spill] sm:$0xff] %v6592_v55  ;;  %v4926_v40 = vpop.f32.mrb[15].mxu1 }
 0x6b3   : > { %v6594_v47 = vpop.f32.mrb[16].mxu0 }
 0x6b4   : > { %7159 = vst [vmem:[#allocation36_spill] sm:$0xff] %v6594_v47  ;;  %v4931_v28 = vpop.f32.mrb[17].mxu0 }
 0x6b5   : > { %v6596_v57 = vpop.f32.mrb[18].mxu0 }
 0x6b6   : > { %7160 = vst [vmem:[#allocation37_spill] sm:$0xff] %v6596_v57  ;;  %v4932_v35 = vpop.f32.mrb[19].mxu0 }
 0x6b7   : > { %v6598_v61 = vpop.f32.mrb[16].mxu1 }
 0x6b8   : > { %7161 = vst [vmem:[#allocation38_spill] sm:$0xff] %v6598_v61  ;;  %v4937_v63 = vpop.f32.mrb[17].mxu1 }
 0x6b9   : > { %v6600_v50 = vpop.f32.mrb[18].mxu1 }
 0x6ba   : > { %7162 = vst [vmem:[#allocation39_spill] sm:$0xff] %v6600_v50  ;;  %v4938_v51 = vpop.f32.mrb[19].mxu1 }
 0x6bb   : > { %v3081_v29 = vpop.f32.mrb[20].mxu0 }
 0x6bc   : > { %v6604_v59 = vsel %vm1297_vm4, %v3081_v29, -1e+30  ;;  %v4943_v53 = vpop.f32.mrb[21].mxu0 }
 0x6bd   : > { %v3084_v15 = vpop.f32.mrb[22].mxu0  ;;  %v3246_v0 = vsel %vm2054_vm5, %v6604_v59, -inf }
 0x6be   : > { %v6610_v41 = vsel %vm1297_vm4, %v3084_v15, -1e+30  ;;  %3247 = vmax.xlane.f32.xlu1 %v3246_v0  ;;  %v4944_v49 = vpop.f32.mrb[23].mxu0 }
 0x6bf   : > { %v3249_v16 = vsel %vm2054_vm5, %v6610_v41, -inf }
 0x6c0   : > { %v3128_v45 = vpop.f32.mrb[20].mxu1  ;;  %3250 = vmax.xlane.f32.xlu0 %v3249_v16 }
 0x6c1   : > { %v6616_v14 = vsel %vm1297_vm4, %v3128_v45, -1e+30  ;;  %v4949_v48 = vpop.f32.mrb[21].mxu1 }
 0x6c2   : > { %v3131_v10 = vpop.f32.mrb[22].mxu1  ;;  %v3252_v9 = vsel %vm2054_vm5, %v6616_v14, -inf  ;;  %v6654_v48 = vld [vmem:[#allocation3 + $0x40] sm:$0xff] }
 0x6c3   : > { %v4950_v54 = vpop.f32.mrb[23].mxu1  ;;  %v3175_v1 = vpop.f32.mrb[24].mxu0  ;;  %v6622_v38 = vsel %vm1297_vm4, %v3131_v10, -1e+30 }
 0x6c4   : > { %v6626_v58 = vsel %vm1297_vm4, %v3175_v1, -1e+30  ;;  %3253 = vmax.xlane.f32.xlu0 %v3252_v9  ;;  %v4955_v60 = vpop.f32.mrb[25].mxu0  ;;  %v3255_v28 = vsel %vm2054_vm5, %v6622_v38, -inf }
 0x6c5   : > { %v3178_v34 = vpop.f32.mrb[26].mxu0  ;;  %v3258_v56 = vsel %vm2054_vm5, %v6626_v58, -inf  ;;  %v6676_v60 = vld [vmem:[#allocation3 + $0x60] sm:$0xff] }
 0x6c6   : > { %3259 = vmax.xlane.f32.xlu1 %v3258_v56  ;;  %v4956_v40 = vpop.f32.mrb[27].mxu0  ;;  %v6634_v35 = vsel %vm1297_vm4, %v3178_v34, -1e+30 }
 0x6c7   : > { %v3261_v49 = vsel %vm2054_vm5, %v6634_v35, -inf  ;;  %v6681_v40 = vld [vmem:[#allocation3 + $0x58] sm:$0xff] }
 0x6c8   : > { %v3222_v63 = vpop.f32.mrb[24].mxu1  ;;  %3256 = vmax.xlane.f32.xlu0 %v3255_v28 }
 0x6c9   : > { %v6638_v51 = vsel %vm1297_vm4, %v3222_v63, -1e+30  ;;  %v4961_v29 = vpop.f32.mrb[25].mxu1 }
 0x6ca   : > { %v3225_v53 = vpop.f32.mrb[26].mxu1  ;;  %v3264_v15 = vsel %vm2054_vm5, %v6638_v51, -inf }
 0x6cb   : > { %v4962_v0 = vpop.f32.mrb[27].mxu1  ;;  %3265 = vmax.xlane.f32.xlu1 %v3264_v15  ;;  %v6646_v16 = vsel %vm1297_vm4, %v3225_v53, -1e+30  ;;  %v6718_v53 = vld [vmem:[#allocation3 + $0x78] sm:$0xff] }
 0x6cc   : > { %3262 = vmax.xlane.f32.xlu0 %v3261_v49  ;;  %v3267_v45 = vsel %vm2054_vm5, %v6646_v16, -inf  ;;  %v6698_v0 = vld [vmem:[#allocation3 + $0x70] sm:$0xff]  ;;  %v6700_v49 = vld [vmem:[#allocation3 + $0x68] sm:$0xff]  ;;  %7166 = vst [vmem:[#allocation43_spill] sm:$0xff] %v6718_v53 }
 0x6cd   : > { %7164 = vst [vmem:[#allocation41_spill] sm:$0xff] %v6698_v0 }
 0x6d0   : > { %3268 = vmax.xlane.f32.xlu0 %v3267_v45 }
 0x6dc   : > { %2764 = vrot.lane.b32.xlu1 %v6067_v11, %s5600_s25 }
 0x6e0   : > { %2768 = vrot.lane.b32.xlu1 %v6122_v17, %s5600_s25 }
 0x6e4   : > { %2770 = vrot.lane.b32.xlu1 %v6129_v31, %s5600_s25 }
 0x6e6   : > { %2766 = vrot.lane.b32.xlu0 %v6101_v42, %s5600_s25  ;;  %v6669_v42 = vld [vmem:[#allocation3 + $0x50] sm:$0xff] }
 0x74b   : > { %v3248_v10 = vpop.xlane.xlu1 %3247 }
 0x74c   : > { %v6659_v54 = vmax.f32 %v6654_v48, %v3248_v10 }
 0x74d   : > { %v3251_v1 = vpop.xlane.xlu0 %3250 }
 0x74e   : > { %3680 = vst.msk [vmem:[#allocation3 + $0x40] sm:$0xff] %vm490_vm3, %v6659_v54  ;;  %v6666_v11 = vmax.f32 %v6656_v30, %v3251_v1  ;;  %3304 = vperm.xlu1 %5150, %v6659_v54  }
 0x750   : > { %3681 = vst.msk [vmem:[#allocation3 + $0x48] sm:$0xff] %vm490_vm3, %v6666_v11  ;;  %3309 = vperm.xlu0 %5149, %v6666_v11  }
 0x751   : > { %v3254_v31 = vpop.xlane.xlu0 %3253 }
 0x752   : > { %v6679_v34 = vmax.f32 %v6669_v42, %v3254_v31 }
 0x753   : > { %v3260_v56 = vpop.xlane.xlu1 %3259 }
 0x754   : > { %3682 = vst.msk [vmem:[#allocation3 + $0x50] sm:$0xff] %vm490_vm3, %v6679_v34  ;;  %v6688_v63 = vmax.f32 %v6676_v60, %v3260_v56  ;;  %3314 = vperm.xlu1 %5150, %v6679_v34  }
 0x755   : > { %v3257_v29 = vpop.xlane.xlu0 %3256 }
 0x756   : > { %7163 = vst [vmem:[#allocation40_spill] sm:$0xff] %v6688_v63  ;;  %3684 = vst.msk [vmem:[#allocation3 + $0x60] sm:$0xff] %vm490_vm3, %v6688_v63  ;;  %v6696_v15 = vmax.f32 %v6681_v40, %v3257_v29 }
 0x758   : > { %3683 = vst.msk [vmem:[#allocation3 + $0x58] sm:$0xff] %vm490_vm3, %v6696_v15  ;;  %v3266_v10 = vpop.xlane.xlu1 %3265  ;;  %3324 = vperm.xlu1 %5150, %v6688_v63   ;;  %3319 = vperm.xlu0 %5149, %v6696_v15  }
 0x759   : > { %v6709_v1 = vmax.f32 %v6698_v0, %v3266_v10  ;;  %v3263_v31 = vpop.xlane.xlu0 %3262 }
 0x75a   : > { %v6712_v56 = vmax.f32 %v6700_v49, %v3263_v31 }
 0x75b   : > { %7165 = vst [vmem:[#allocation42_spill] sm:$0xff] %v6709_v1  ;;  %3686 = vst.msk [vmem:[#allocation3 + $0x70] sm:$0xff] %vm490_vm3, %v6709_v1 }
 0x75c   : > { %3685 = vst.msk [vmem:[#allocation3 + $0x68] sm:$0xff] %vm490_vm3, %v6712_v56  ;;  %v2765_v10 = vpop.permute.xlu1 %2764  ;;  %3334 = vperm.xlu1 %5150, %v6709_v1   ;;  %3329 = vperm.xlu0 %5149, %v6712_v56  }
 0x75d   : > { %v3269_v31 = vpop.xlane.xlu0 %3268  ;;  %v2776_v17 = vshrl.u32 %v2765_v10, 16 }
 0x75e   : > { %v6727_v45 = vmax.f32 %v6718_v53, %v3269_v31 }
 0x760   : > { %7167 = vst [vmem:[#allocation44_spill] sm:$0xff] %v6727_v45  ;;  %3687 = vst.msk [vmem:[#allocation3 + $0x78] sm:$0xff] %vm490_vm3, %v6727_v45  ;;  %v2769_v9 = vpop.permute.xlu1 %2768  ;;  %3339 = vperm.xlu0 %5149, %v6727_v45  }
 0x761   : > { %v2767_v28 = vpop.permute.xlu0 %2766  ;;  %v2784_v57 = vshrl.u32 %v2769_v9, 16 }
 0x762   : > { %v2774_v4 = vpack.i.b16 %v2767_v28, %v2765_v10  ;;  %v2777_v2 = vshrl.u32 %v2767_v28, 16 }
 0x764   : > { %v2778_v61 = vpack.i.b16 %v2777_v2, %v2776_v17  ;;  %v2788_v50 = vcombine.high %v2774_v4, %v6076_v20  ;;  %v2771_v47 = vpop.permute.xlu1 %2770  ;;  %v2795_v7 = vrot.slane %v2774_v4, %v6084_v25 }
 0x765   : > { %v2782_v31 = vpack.i.b16 %v2771_v47, %v2769_v9  ;;  %v2785_v55 = vshrl.u32 %v2771_v47, 16 }
 0x766   : > { %v2802_v1 = vrot.slane %v2788_v50, %v6084_v25  ;;  %v2854_v0 = vcombine.high %v2778_v61, %v6076_v20  ;;  %v2861_v9 = vrot.slane %v2778_v61, %v6084_v25 }
 0x767   : > { %v2786_v29 = vpack.i.b16 %v2785_v55, %v2784_v57  ;;  %v2803_v32 = vcombine.high %v2782_v31, %v6076_v20  ;;  %v2810_v62 = vrot.slane %v2782_v31, %v6084_v25 }
 0x768   : > { %v2868_v50 = vrot.slane %v2854_v0, %v6084_v25 }
 0x769   : > { %v2817_v28 = vrot.slane %v2803_v32, %v6084_v25  ;;  %v2818_v2 = vcombine.low %v2795_v7, %v2810_v62  ;;  %v2819_v17 = vcombine.high %v2795_v7, %v2810_v62  ;;  %v2869_v10 = vcombine.high %v2786_v29, %v6076_v20 }
 0x76a   : > { %v2876_v47 = vrot.slane %v2786_v29, %v6084_v25 }
 0x76b   : > { %v2826_v4 = vrot.slane %v2818_v2, %v6095_v36  ;;  %v2833_v55 = vrot.slane %v2819_v17, %v6095_v36  ;;  %v2834_v57 = vcombine.low %v2802_v1, %v2817_v28  ;;  %v2835_v31 = vcombine.high %v2802_v1, %v2817_v28 }
 0x76c   : > { %v2883_v45 = vrot.slane %v2869_v10, %v6084_v25  ;;  %v2884_v53 = vcombine.low %v2861_v9, %v2876_v47  ;;  %v2885_v32 = vcombine.high %v2861_v9, %v2876_v47 }
 0x76d   : > { %v2842_v62 = vrot.slane %v2834_v57, %v6095_v36  ;;  %v2849_v7 = vrot.slane %v2835_v31, %v6095_v36  ;;  %v2920_v20 = vcombine.low %v2826_v4, %v2833_v55  ;;  %v4784_v61 = vcombine.high %v2826_v4, %v2833_v55 }
 0x76e   : > { %v2892_v29 = vrot.slane %v2884_v53, %v6095_v36  ;;  %v2899_v2 = vrot.slane %v2885_v32, %v6095_v36  ;;  %v2900_v63 = vcombine.low %v2868_v50, %v2883_v45  ;;  %v2901_v17 = vcombine.high %v2868_v50, %v2883_v45 }
 0x76f   : > { %v2927_v1 = vrot.slane %v2920_v20, %v6084_v25  ;;  %v2935_v0 = vrot.slane %v4784_v61, %v6084_v25  ;;  %v2936_v28 = vcombine.low %v2842_v62, %v2849_v7  ;;  %v4785_v10 = vcombine.high %v2842_v62, %v2849_v7 }
 0x770   : > { %v2908_v9 = vrot.slane %v2900_v63, %v6095_v36  ;;  %v2915_v47 = vrot.slane %v2901_v17, %v6095_v36  ;;  %v2970_v57 = vcombine.low %v2892_v29, %v2899_v2  ;;  %v4786_v31 = vcombine.high %v2892_v29, %v2899_v2 }
 0x771   : > { %v2943_v4 = vrot.slane %v2936_v28, %v6084_v25  ;;  %v2951_v53 = vrot.slane %v4785_v10, %v6084_v25  ;;  %v2952_v55 = vcombine.low %v2927_v1, %v2935_v0 }
 0x772   : > { %v2977_v32 = vrot.slane %v2970_v57, %v6084_v25  ;;  %v2985_v45 = vrot.slane %v4786_v31, %v6084_v25  ;;  %v2986_v20 = vcombine.low %v2908_v9, %v2915_v47  ;;  %v4787_v50 = vcombine.high %v2908_v9, %v2915_v47 }
 0x773   : > { %v2960_v61 = vcombine.low %v2943_v4, %v2951_v53  ;;  %v2959_v17 = vrot.slane %v2952_v55, %v6095_v36  ;;  %v2192_v9 = vunpack.c.h.bf16 %v6533_v52  ;;  %v2191_v4 = vunpack.c.l.bf16 %v6533_v52 }
 0x774   : > { %v2993_v62 = vrot.slane %v2986_v20, %v6084_v25  ;;  %v3001_v63 = vrot.slane %v4787_v50, %v6084_v25  ;;  %v3002_v7 = vcombine.low %v2977_v32, %v2985_v45 }
 0x775   : > { %v2967_v29 = vrot.slane %v2960_v61, %v6095_v36  ;;  %v2202_v61 = vsel %vm2054_vm5, %v2192_v9, 0.0  ;;  %v2199_v52 = vsel %vm2054_vm5, %v2191_v4, 0.0  ;;  %v2198_v9 = vunpack.c.h.bf16 %v6562_v5 }
 0x776   : > { %v3010_v2 = vcombine.low %v2993_v62, %v3001_v63  ;;  %v3009_v1 = vrot.slane %v3002_v7, %v6095_v36  ;;  %v2193_v62 = vunpack.c.l.bf16 %v6546_v44  ;;  %v2195_v7 = vunpack.c.l.bf16 %v6554_v23 }
 0x777   : > { %v2968_v28 = vcombine.low %v2959_v17, %v2967_v29  ;;  %v6764_v10 = vcombine.high %v2959_v17, %v2967_v29  ;;  %v2194_v29 = vunpack.c.h.bf16 %v6546_v44  ;;  %v2220_v44 = vsel %vm2054_vm5, %v2198_v9, 0.0 }
 0x778   : > { %v3017_v0 = vrot.slane %v3010_v2, %v6095_v36  ;;  %v2205_v17 = vsel %vm2054_vm5, %v2193_v62, 0.0  ;;  %v2211_v2 = vsel %vm2054_vm5, %v2195_v7, 0.0 }
 0x779   : > { %v3024_v31 = vshrl.u32 %v2968_v28, 16  ;;  %v3032_v53 = vshrl.u32 %v6764_v10, 16 }
 0x77a   : > { %v3018_v57 = vcombine.low %v3009_v1, %v3017_v0  ;;  %v6769_v47 = vcombine.high %v3009_v1, %v3017_v0  ;;  %v2196_v1 = vunpack.c.h.bf16 %v6554_v23 }
 0x77c   : > { %v3022_v55 = vpack.i.b16 %v3018_v57, %v2968_v28  ;;  %v3025_v32 = vshrl.u32 %v3018_v57, 16  ;;  %v3030_v45 = vpack.i.b16 %v6769_v47, %v6764_v10  ;;  %v3033_v20 = vshrl.u32 %v6769_v47, 16 }
 0x77d   : > { %v2197_v28 = vunpack.c.l.bf16 %v6562_v5  ;;  %v2208_v10 = vsel %vm2054_vm5, %v2194_v29, 0.0  ;;  %v2214_v57 = vsel %vm2054_vm5, %v2196_v1, 0.0 }
 0x77e   : > { %4964 = vmatpush3.bf16.msra.mxu0 %v3022_v55  ;;  %v3026_v50 = vpack.i.b16 %v3025_v32, %v3024_v31  ;;  %v6778_v63 = vpack.i.b16 %v3033_v20, %v3032_v53 }
 0x77f   : > { %2203 = vadd.xlane.f32.xlu0 %v2202_v61  ;;  %4975 = vmatprep.subr.bf16.mxu0 %v7154_v26  ;;  %v2217_v0 = vsel %vm2054_vm5, %v2197_v28, 0.0 }
 0x780   : > { %4970 = vmatpush3.bf16.msra.mxu1 %v3026_v50  ;;  %2200 = vadd.xlane.f32.xlu1 %v2199_v52 }
 0x781   : > { %4981 = vmatprep.subr.bf16.mxu1 %v7154_v26 }
 0x783   : > { %2206 = vadd.xlane.f32.xlu0 %v2205_v17 }
 0x784   : > { %2212 = vadd.xlane.f32.xlu1 %v2211_v2 }
 0x787   : > { %2209 = vadd.xlane.f32.xlu0 %v2208_v10 }
 0x788   : > { %2218 = vadd.xlane.f32.xlu1 %v2217_v0 }
 0x78b   : > { %2215 = vadd.xlane.f32.xlu0 %v2214_v57 }
 0x78f   : > { %2221 = vadd.xlane.f32.xlu0 %v2220_v44 }
 0x7cd   : > { %v3305_v47 = vpop.permute.xlu1 %3304 }
 0x7ce   : > { %v3342_v4 = vsub.f32 %v6604_v59, %v3305_v47 }
 0x7cf   : > { %v3310_v31 = vpop.permute.xlu0 %3309 }
 0x7d0   : > { %v3343_v53 = vsub.f32 %v6610_v41, %v3310_v31 }
 0x7d2   : > { %v3350_v55 = vpack.c.bf16 %v3343_v53, %v3342_v4 }
 0x7d3   : > { %v3315_v23 = vpop.permute.xlu1 %3314 }
 0x7d4   : > { %v3355_v32 = vmul.bf16 1069105081, %v3350_v55  ;;  %v3344_v61 = vsub.f32 %v6616_v14, %v3315_v23 }
 0x7d6   : > { %5175 = vpow.bf16 %v3355_v32 }
 0x7d7   : > { %v3325_v20 = vpop.permute.xlu1 %3324  ;;  %v3320_v50 = vpop.permute.xlu0 %3319 }
 0x7d8   : > { %v3345_v5 = vsub.f32 %v6622_v38, %v3320_v50  ;;  %v3346_v7 = vsub.f32 %v6626_v58, %v3325_v20 }
 0x7da   : > { %v3351_v62 = vpack.c.bf16 %v3345_v5, %v3344_v61  ;;  %v7168_v5 = vsub.f32 %v6312_v21, %v6317_v19  ;;  %v7173_v19 = vsub.f32 %v6343_v18, %v6356_v27  ;;  %v7176_v18 = vsub.f32 %v6656_v30, %v6666_v11  ;;  %v2177_v30 = vld [vmem:[#allocation4 + $0x10] sm:$0xff] }
 0x7db   : > { %v3330_v52 = vpop.permute.xlu0 %3329  ;;  %v3335_v59 = vpop.permute.xlu1 %3334 }
 0x7dc   : > { %v3358_v17 = vmul.bf16 1069105081, %v3351_v62  ;;  %v3347_v29 = vsub.f32 %v6634_v35, %v3330_v52  ;;  %v3348_v28 = vsub.f32 %v6638_v51, %v3335_v59  ;;  %v2095_v62 = vmul.f32 1.442695, %v7168_v5 }
 0x7dd   : > { %v7169_v52 = vsub.f32 %v6314_v3, %v6326_v8  ;;  %v7171_v59 = vsub.f32 %v6337_v13, %v6346_v22  ;;  %v2105_v3 = vmul.f32 1.442695, %v7173_v19  ;;  %v3288_v27 = vmul.f32 1.442695, %v7176_v18 }
 0x7de   : > { %5177 = vpow.bf16 %v3358_v17  ;;  %v3352_v41 = vpack.c.bf16 %v3347_v29, %v3346_v7  ;;  %v7170_v17 = vsub.f32 %v6319_v6, %v6334_v12  ;;  %v7174_v6 = vsub.f32 %v6368_v39, %v6384_v46 }
 0x7df   : > { %v3340_v2 = vpop.permute.xlu0 %3339  ;;  %v2097_v7 = vmul.f32 1.442695, %v7169_v52  ;;  %v7175_v12 = vsub.f32 %v6359_v33, %v6375_v43  ;;  %v7177_v39 = vsub.f32 %v6654_v48, %v6659_v54  ;;  %v7179_v48 = vsub.f32 %v6669_v42, %v6679_v34  ;;  %v2180_v52 = vld [vmem:[#allocation4 + $0x28] sm:$0xff] }
 0x7e0   : > { %v3361_v10 = vmul.bf16 1069105081, %v3352_v41  ;;  %v3349_v1 = vsub.f32 %v6646_v16, %v3340_v2  ;;  %v2099_v29 = vmul.f32 1.442695, %v7170_v17  ;;  %v2101_v41 = vmul.f32 1.442695, %v7171_v59 }
 0x7e1   : > { %v5176_v0 = vpop.eup %5175  ;;  %v7172_v2 = vsub.f32 %v6349_v24, %v6366_v37  ;;  %v2107_v8 = vmul.f32 1.442695, %v7174_v6  ;;  %v2109_v13 = vmul.f32 1.442695, %v7175_v12  ;;  %v2176_v37 = vld [vmem:[#allocation4 + $0x8] sm:$0xff]  ;;  %v7186_v59 = vld [vmem:[#allocation41_spill] sm:$0xff] }
 0x7e2   : > { %5179 = vpow.bf16 %v3361_v10  ;;  %v3353_v14 = vpack.c.bf16 %v3349_v1, %v3348_v28  ;;  %4966 = vmatmul.mubr.msk.bf16.vlgmr.msra.gmra.mrb[28].mxu0 %vm2054_vm5, %v5176_v0  ;;  %v3384_v38 = vunpack.c.h.bf16 %v5176_v0  ;;  %v3383_v57 = vunpack.c.l.bf16 %v5176_v0  ;;  %v2175_v10 = vld [vmem:[#allocation4] sm:$0xff]  ;;  %v2182_v6 = vld [vmem:[#allocation4 + $0x38] sm:$0xff] }
 0x7e3   : > { %4976 = vmatpush3.bf16.msra.mxu0 %v3030_v45  ;;  %4977 = vmatprep.mubr.msk.bf16.mxu0 %vm5590_vm1, %v7154_v26  ;;  %v2103_v21 = vmul.f32 1.442695, %v7172_v2  ;;  %v3286_v46 = vmul.f32 1.442695, %v7177_v39  ;;  %v7178_v1 = vsub.f32 %v6681_v40, %v6696_v15  ;;  %v3290_v54 = vmul.f32 1.442695, %v7179_v48 }
 0x7e4   : > { %v3364_v58 = vmul.bf16 1069105081, %v3353_v14  ;;  %v3394_v35 = vsel %vm2054_vm5, %v3384_v38, 0.0  ;;  %v3391_v9 = vsel %vm2054_vm5, %v3383_v57, 0.0  ;;  %4987 = vmatprep.subr.bf16.mxu0 %v7154_v26  ;;  %v7180_v15 = vsub.f32 %v6700_v49, %v6712_v56  ;;  %v7183_v56 = vld [vmem:[#allocation43_spill] sm:$0xff] }
 0x7e5   : > { %3395 = vadd.xlane.f32.xlu0 %v3394_v35  ;;  %3392 = vadd.xlane.f32.xlu1 %v3391_v9  ;;  %v3292_v0 = vmul.f32 1.442695, %v7178_v1  ;;  %v2179_v35 = vld [vmem:[#allocation4 + $0x20] sm:$0xff] }
 0x7e6   : > { %5181 = vpow.bf16 %v3364_v58 }
 0x7e7   : > { %5183 = vpow2.f32 %v2095_v62 }
 0x7e8   : > { %5185 = vpow2.f32 %v2097_v7 }
 0x7e9   : > { %v5178_v51 = vpop.eup %5177  ;;  %5187 = vpow2.f32 %v2099_v29 }
 0x7ea   : > { %4972 = vmatmul.mubr.msk.bf16.vlgmr.msra.gmra.mrb[28].mxu1 %vm2054_vm5, %v5178_v51  ;;  %v3386_v16 = vunpack.c.h.bf16 %v5178_v51  ;;  %v3385_v44 = vunpack.c.l.bf16 %v5178_v51  ;;  %5189 = vpow2.f32 %v2101_v41  ;;  %v7187_v41 = vld [vmem:[#allocation42_spill] sm:$0xff] }
 0x7eb   : > { %4982 = vmatpush3.bf16.msra.mxu1 %v6778_v63  ;;  %4983 = vmatprep.mubr.msk.bf16.mxu1 %vm5590_vm1, %v7154_v26  ;;  %5191 = vpow2.f32 %v2103_v21  ;;  %v7188_v2 = vsub.f32 %v7186_v59, %v7187_v41 }
 0x7ec   : > { %v3400_v45 = vsel %vm2054_vm5, %v3386_v16, 0.0  ;;  %v3397_v47 = vsel %vm2054_vm5, %v3385_v44, 0.0  ;;  %4995 = vmatprep.subr.bf16.mxu1 %v7154_v26  ;;  %5193 = vpow2.f32 %v2105_v3  ;;  %v3296_v16 = vmul.f32 1.442695, %v7180_v15  ;;  %v3368_v15 = vld [vmem:[#allocation4 + $0x48] sm:$0xff] }
 0x7ed   : > { %v5180_v31 = vpop.eup %5179  ;;  %3401 = vadd.xlane.f32.xlu0 %v3400_v45  ;;  %3398 = vadd.xlane.f32.xlu1 %v3397_v47  ;;  %5195 = vpow2.f32 %v2107_v8  ;;  %v2178_v47 = vld [vmem:[#allocation4 + $0x18] sm:$0xff]  ;;  %v3298_v21 = vmul.f32 1.442695, %v7188_v2 }
 0x7ee   : > { %4978 = vmatmul.mubr.msk.bf16.vlgmr.msra.gmra.mrb[32].mxu0 %vm2054_vm5, %v5180_v31  ;;  %v3388_v4 = vunpack.c.h.bf16 %v5180_v31  ;;  %v3387_v53 = vunpack.c.l.bf16 %v5180_v31  ;;  %5197 = vpow2.f32 %v2109_v13 }
 0x7ef   : > { %4991 = vmatprep.mubr.msk.bf16.mxu0 %vm5590_vm1, %v7154_v26  ;;  %5199 = vpow2.f32 %v3288_v27 }
 0x7f0   : > { %v3406_v63 = vsel %vm2054_vm5, %v3388_v4, 0.0  ;;  %v3403_v55 = vsel %vm2054_vm5, %v3387_v53, 0.0  ;;  %5201 = vpow2.f32 %v3286_v46 }
 0x7f1   : > { %v5182_v23 = vpop.eup %5181  ;;  %3407 = vadd.xlane.f32.xlu0 %v3406_v63  ;;  %3404 = vadd.xlane.f32.xlu1 %v3403_v55  ;;  %5203 = vpow2.f32 %v3292_v0  ;;  %v2181_v63 = vld [vmem:[#allocation4 + $0x30] sm:$0xff] }
 0x7f2   : > { %4984 = vmatmul.mubr.msk.bf16.vlgmr.msra.gmra.mrb[32].mxu1 %vm2054_vm5, %v5182_v23  ;;  %v3390_v32 = vunpack.c.h.bf16 %v5182_v23  ;;  %v3389_v20 = vunpack.c.l.bf16 %v5182_v23  ;;  %v5184_v22 = vpop.eup %5183  ;;  %5205 = vpow2.f32 %v3290_v54  ;;  %v7181_v55 = vld [vmem:[#allocation40_spill] sm:$0xff] }
 0x7f3   : > { %4999 = vmatprep.mubr.msk.bf16.mxu1 %vm5590_vm1, %v7154_v26  ;;  %v5186_v24 = vpop.eup %5185  ;;  %v2183_v38 = vmul.f32 %v5184_v22, %v2175_v10  ;;  %v7182_v23 = vsub.f32 %v6676_v60, %v7181_v55  ;;  %5207 = vpow2.f32 %v3296_v16 }
 0x7f4   : > { %v3412_v50 = vsel %vm2054_vm5, %v3390_v32, 0.0  ;;  %v3409_v61 = vsel %vm2054_vm5, %v3389_v20, 0.0  ;;  %v5188_v28 = vpop.eup %5187  ;;  %v2184_v33 = vmul.f32 %v5186_v24, %v2176_v37  ;;  %v7184_v20 = vld [vmem:[#allocation44_spill] sm:$0xff] }
 0x7f5   : > { %3413 = vadd.xlane.f32.xlu0 %v3412_v50  ;;  %3410 = vadd.xlane.f32.xlu1 %v3409_v61  ;;  %v5190_v43 = vpop.eup %5189  ;;  %v2185_v40 = vmul.f32 %v5188_v28, %v2177_v30  ;;  %v3294_v32 = vmul.f32 1.442695, %v7182_v23  ;;  %v7185_v50 = vsub.f32 %v7183_v56, %v7184_v20 }
 0x7f6   : > { %v5192_v11 = vpop.eup %5191  ;;  %v2186_v49 = vmul.f32 %v5190_v43, %v2178_v47 }
 0x7f7   : > { %v5194_v9 = vpop.eup %5193  ;;  %v2187_v45 = vmul.f32 %v5192_v11, %v2179_v35  ;;  %v3300_v61 = vmul.f32 1.442695, %v7185_v50  ;;  %5209 = vpow2.f32 %v3294_v32  ;;  %v3371_v32 = vld [vmem:[#allocation4 + $0x60] sm:$0xff] }
 0x7f8   : > { %v5196_v31 = vpop.eup %5195  ;;  %v2188_v19 = vmul.f32 %v5194_v9, %v2180_v52 }
 0x7f9   : > { %v5198_v42 = vpop.eup %5197  ;;  %v2189_v62 = vmul.f32 %v5196_v31, %v2181_v63  ;;  %5211 = vpow2.f32 %v3300_v61  ;;  %v3370_v63 = vld [vmem:[#allocation4 + $0x58] sm:$0xff] }
 0x7fa   : > { %v6874_v29 = vpop.eup %5199  ;;  %5213 = vpow2.f32 %v3298_v21 }
 0x7fb   : > { %v5202_v8 = vpop.eup %5201 }
 0x806   : > { %2250 = vperm.xlu1 %5150, %v5184_v22   ;;  %v6882_v22 = vpop.eup %5203 }
 0x807   : > { %v5206_v37 = vpop.eup %5205 }
 0x808   : > { %v6886_v10 = vpop.eup %5207 }
 0x80a   : > { %2260 = vperm.xlu1 %5150, %v5188_v28  }
 0x80b   : > { %2255 = vperm.xlu0 %5149, %v5186_v24   ;;  %v2190_v24 = vmul.f32 %v5198_v42, %v2182_v6 }
 0x80c   : > { %v2204_v14 = vpop.xlane.xlu0 %2203 }
 0x80d   : > { %v2224_v57 = vadd.f32 %v2204_v14, %v2184_v33  ;;  %v2201_v58 = vpop.xlane.xlu1 %2200  ;;  %v5210_v33 = vpop.eup %5209 }
 0x80e   : > { %v2223_v51 = vadd.f32 %v2201_v58, %v2183_v38  ;;  %2265 = vperm.xlu1 %5150, %v5190_v43   ;;  %v6890_v43 = vpop.eup %5211 }
 0x80f   : > { %2233 = vst.msk [vmem:[#allocation4 + $0x8] sm:$0xff] %vm490_vm3, %v2224_v57  ;;  %2275 = vperm.xlu0 %5149, %v5194_v9   ;;  %v5214_v14 = vpop.eup %5213 }
 0x810   : > { %2232 = vst.msk [vmem:[#allocation4] sm:$0xff] %vm490_vm3, %v2223_v51  ;;  %v2207_v44 = vpop.xlane.xlu0 %2206 }
 0x811   : > { %v2225_v4 = vadd.f32 %v2207_v44, %v2185_v40  ;;  %v2213_v53 = vpop.xlane.xlu1 %2212  ;;  %v3367_v40 = vld [vmem:[#allocation4 + $0x40] sm:$0xff]  ;;  %v3376_v44 = vmul.f32 %v6874_v29, %v3368_v15 }
 0x812   : > { %v2227_v34 = vadd.f32 %v2213_v53, %v2187_v45  ;;  %2270 = vperm.xlu1 %5150, %v5192_v11   ;;  %v3375_v16 = vmul.f32 %v5202_v8, %v3367_v40  ;;  %v3369_v53 = vld [vmem:[#allocation4 + $0x50] sm:$0xff] }
 0x813   : > { %2234 = vst.msk [vmem:[#allocation4 + $0x10] sm:$0xff] %vm490_vm3, %v2225_v4  ;;  %2285 = vperm.xlu0 %5149, %v5198_v42   ;;  %v3377_v42 = vmul.f32 %v5206_v37, %v3369_v53  ;;  %v7193_v53 = vld [vmem:[#allocation37_spill] sm:$0xff] }
 0x814   : > { %2236 = vst.msk [vmem:[#allocation4 + $0x20] sm:$0xff] %vm490_vm3, %v2227_v34  ;;  %v2210_v5 = vpop.xlane.xlu0 %2209  ;;  %v3378_v34 = vmul.f32 %v6882_v22, %v3370_v63 }
 0x815   : > { %v2226_v7 = vadd.f32 %v2210_v5, %v2186_v49  ;;  %v2219_v17 = vpop.xlane.xlu1 %2218  ;;  %v3372_v49 = vld [vmem:[#allocation4 + $0x68] sm:$0xff]  ;;  %v3379_v5 = vmul.f32 %v5210_v33, %v3371_v32 }
 0x816   : > { %v2229_v60 = vadd.f32 %v2219_v17, %v2189_v62  ;;  %2280 = vperm.xlu1 %5150, %v5196_v31   ;;  %v3692_v13 = vld [vmem:[#allocation4 + $0x8] sm:$0xff]  ;;  %v3380_v62 = vmul.f32 %v6886_v10, %v3372_v49  ;;  %v3373_v17 = vld [vmem:[#allocation4 + $0x70] sm:$0xff] }
 0x817   : > { %2235 = vst.msk [vmem:[#allocation4 + $0x18] sm:$0xff] %vm490_vm3, %v2226_v7  ;;  %3447 = vperm.xlu0 %5149, %v6874_v29   ;;  %v3691_v18 = vld [vmem:[#allocation4] sm:$0xff]  ;;  %5215 = vrcp.f32 %v3692_v13  ;;  %v3374_v29 = vld [vmem:[#allocation4 + $0x78] sm:$0xff]  ;;  %v3381_v41 = vmul.f32 %v5214_v14, %v3373_v17 }
 0x818   : > { %2238 = vst.msk [vmem:[#allocation4 + $0x30] sm:$0xff] %vm490_vm3, %v2229_v60  ;;  %v2216_v3 = vpop.xlane.xlu0 %2215  ;;  %5217 = vrcp.f32 %v3691_v18  ;;  %v3382_v2 = vmul.f32 %v6890_v43, %v3374_v29  ;;  %v2240_v13 = vld [vmem:[#allocation5] sm:$0xff] }
 0x819   : > { %v2228_v12 = vadd.f32 %v2216_v3, %v2188_v19 }
 0x81a   : > { %3442 = vperm.xlu1 %5150, %v5202_v8   ;;  %v3693_v46 = vld [vmem:[#allocation4 + $0x10] sm:$0xff] }
 0x81b   : > { %2237 = vst.msk [vmem:[#allocation4 + $0x28] sm:$0xff] %vm490_vm3, %v2228_v12  ;;  %3457 = vperm.xlu0 %5149, %v6882_v22   ;;  %v3695_v0 = vld [vmem:[#allocation4 + $0x20] sm:$0xff] }
 0x81c   : > { %v2222_v27 = vpop.xlane.xlu0 %2221 }
 0x81d   : > { %v2230_v28 = vadd.f32 %v2222_v27, %v2190_v24  ;;  %v2242_v27 = vld [vmem:[#allocation5 + $0x10] sm:$0xff] }
 0x81e   : > { %3452 = vperm.xlu1 %5150, %v5206_v37   ;;  %v3694_v39 = vld [vmem:[#allocation4 + $0x18] sm:$0xff] }
 0x81f   : > { %2239 = vst.msk [vmem:[#allocation4 + $0x38] sm:$0xff] %vm490_vm3, %v2230_v28  ;;  %3467 = vperm.xlu0 %5149, %v6886_v10   ;;  %5219 = vrcp.f32 %v3694_v39  ;;  %v3697_v57 = vld [vmem:[#allocation4 + $0x30] sm:$0xff]  ;;  %v2241_v39 = vld [vmem:[#allocation5 + $0x8] sm:$0xff] }
 0x820   : > { %5221 = vrcp.f32 %v3693_v46  ;;  %v7189_v46 = vld [vmem:[#allocation32_spill] sm:$0xff] }
 0x821   : > { %v5216_v38 = vpop.eup %5215 }
 0x822   : > { %3462 = vperm.xlu1 %5150, %v5210_v33   ;;  %v3696_v1 = vld [vmem:[#allocation4 + $0x28] sm:$0xff]  ;;  %v5218_v11 = vpop.eup %5217 }
 0x823   : > { %3477 = vperm.xlu0 %5149, %v6890_v43   ;;  %5223 = vrcp.f32 %v3696_v1 }
 0x824   : > { %5225 = vrcp.f32 %v3695_v0 }
 0x826   : > { %v3698_v30 = vld [vmem:[#allocation4 + $0x38] sm:$0xff]  ;;  %3472 = vperm.xlu1 %5150, %v5214_v14  }
 0x827   : > { %5227 = vrcp.f32 %v3698_v30  ;;  %3722 = vperm.xlu0 %5149, %v5216_v38   ;;  %v2243_v38 = vld [vmem:[#allocation5 + $0x18] sm:$0xff] }
 0x828   : > { %5229 = vrcp.f32 %v3697_v57  ;;  %v2245_v57 = vld [vmem:[#allocation5 + $0x28] sm:$0xff] }
 0x829   : > { %v5220_v58 = vpop.eup %5219 }
 0x82a   : > { %3717 = vperm.xlu1 %5150, %v5218_v11   ;;  %v5222_v35 = vpop.eup %5221 }
 0x82b   : > { %3732 = vperm.xlu0 %5149, %v5220_v58   ;;  %v7190_v58 = vld [vmem:[#allocation34_spill] sm:$0xff] }
 0x82d   : > { %v5224_v9 = vpop.eup %5223 }
 0x82e   : > { %3727 = vperm.xlu1 %5150, %v5222_v35   ;;  %v5226_v51 = vpop.eup %5225 }
 0x82f   : > { %3742 = vperm.xlu0 %5149, %v5224_v9   ;;  %v7191_v9 = vld [vmem:[#allocation33_spill] sm:$0xff] }
 0x831   : > { %v5228_v48 = vpop.eup %5227 }
 0x832   : > { %3737 = vperm.xlu1 %5150, %v5226_v51   ;;  %v5230_v54 = vpop.eup %5229 }
 0x833   : > { %3752 = vperm.xlu0 %5149, %v5228_v48  }
 0x836   : > { %3747 = vperm.xlu1 %5150, %v5230_v54  }
 0x872   : > { %v3393_v45 = vpop.xlane.xlu1 %3392  ;;  %v3396_v47 = vpop.xlane.xlu0 %3395 }
 0x873   : > { %v3415_v31 = vadd.f32 %v3393_v45, %v3375_v16  ;;  %v3416_v4 = vadd.f32 %v3396_v47, %v3376_v44  ;;  %v2244_v45 = vld [vmem:[#allocation5 + $0x20] sm:$0xff]  ;;  %v2247_v47 = vld [vmem:[#allocation5 + $0x38] sm:$0xff] }
 0x875   : > { %3423 = vst.msk [vmem:[#allocation4 + $0x40] sm:$0xff] %vm490_vm3, %v3415_v31  ;;  %3424 = vst.msk [vmem:[#allocation4 + $0x48] sm:$0xff] %vm490_vm3, %v3416_v4  ;;  %v7192_v31 = vld [vmem:[#allocation35_spill] sm:$0xff] }
 0x87a   : > { %v3399_v55 = vpop.xlane.xlu1 %3398  ;;  %v3402_v23 = vpop.xlane.xlu0 %3401 }
 0x87b   : > { %v3417_v56 = vadd.f32 %v3399_v55, %v3377_v42  ;;  %v3418_v20 = vadd.f32 %v3402_v23, %v3378_v34 }
 0x87c   : > { %v4102_v50 = vld [vmem:[#allocation4 + $0x40] sm:$0xff]  ;;  %v4103_v61 = vld [vmem:[#allocation4 + $0x48] sm:$0xff] }
 0x87d   : > { %5231 = vrcp.f32 %v4102_v50  ;;  %3425 = vst.msk [vmem:[#allocation4 + $0x50] sm:$0xff] %vm490_vm3, %v3417_v56  ;;  %3426 = vst.msk [vmem:[#allocation4 + $0x58] sm:$0xff] %vm490_vm3, %v3418_v20  ;;  %v2246_v56 = vld [vmem:[#allocation5 + $0x30] sm:$0xff] }
 0x87e   : > { %5233 = vrcp.f32 %v4103_v61  ;;  %v3405_v52 = vpop.xlane.xlu1 %3404  ;;  %v3408_v7 = vpop.xlane.xlu0 %3407  ;;  %v7194_v20 = vld [vmem:[#allocation36_spill] sm:$0xff]  ;;  %v7195_v61 = vld [vmem:[#allocation39_spill] sm:$0xff] }
 0x87f   : > { %v3419_v60 = vadd.f32 %v3405_v52, %v3379_v5  ;;  %v3420_v59 = vadd.f32 %v3408_v7, %v3380_v62 }
 0x881   : > { %3427 = vst.msk [vmem:[#allocation4 + $0x60] sm:$0xff] %vm490_vm3, %v3419_v60  ;;  %3428 = vst.msk [vmem:[#allocation4 + $0x68] sm:$0xff] %vm490_vm3, %v3420_v59  ;;  %v7196_v60 = vld [vmem:[#allocation38_spill] sm:$0xff] }
 0x882   : > { %v3411_v21 = vpop.xlane.xlu1 %3410  ;;  %v3414_v19 = vpop.xlane.xlu0 %3413 }
 0x883   : > { %v3421_v3 = vadd.f32 %v3411_v21, %v3381_v41  ;;  %v3422_v6 = vadd.f32 %v3414_v19, %v3382_v2 }
 0x884   : > { %v4104_v8 = vld [vmem:[#allocation4 + $0x50] sm:$0xff]  ;;  %v4105_v12 = vld [vmem:[#allocation4 + $0x58] sm:$0xff] }
 0x885   : > { %5235 = vrcp.f32 %v4104_v8  ;;  %3429 = vst.msk [vmem:[#allocation4 + $0x70] sm:$0xff] %vm490_vm3, %v3421_v3  ;;  %3430 = vst.msk [vmem:[#allocation4 + $0x78] sm:$0xff] %vm490_vm3, %v3422_v6 }
 0x886   : > { %5237 = vrcp.f32 %v4105_v12  ;;  %v2251_v22 = vpop.permute.xlu1 %2250 }
 0x887   : > { %v5232_v24 = vpop.eup %5231  ;;  %v2288_v18 = vmul.f32 %v2251_v22, %v2240_v13 }
 0x888   : > { %v5234_v37 = vpop.eup %5233  ;;  %v4106_v28 = vld [vmem:[#allocation4 + $0x60] sm:$0xff]  ;;  %v4107_v10 = vld [vmem:[#allocation4 + $0x68] sm:$0xff]  ;;  %4128 = vperm.xlu1 %5150, %v5232_v24  }
 0x889   : > { %5239 = vrcp.f32 %v4106_v28  ;;  %v2472_v33 = vadd.f32 %v7189_v46, %v2288_v18  ;;  %4133 = vperm.xlu0 %5149, %v5234_v37  }
 0x88a   : > { %5241 = vrcp.f32 %v4107_v10  ;;  %v2261_v43 = vpop.permute.xlu1 %2260  ;;  %v2256_v1 = vpop.permute.xlu0 %2255 }
 0x88b   : > { %2480 = vst.msk [vmem:[#allocation5] sm:$0xff] %vm523_vm2, %v2472_v33  ;;  %v2290_v0 = vmul.f32 %v2261_v43, %v2242_v27  ;;  %v2289_v14 = vmul.f32 %v2256_v1, %v2241_v39  ;;  %v3432_v43 = vld [vmem:[#allocation5 + $0x40] sm:$0xff] }
 0x88c   : > { %v4108_v30 = vld [vmem:[#allocation4 + $0x70] sm:$0xff]  ;;  %v4109_v11 = vld [vmem:[#allocation4 + $0x78] sm:$0xff] }
 0x88d   : > { %5243 = vrcp.f32 %v4108_v30  ;;  %v2474_v35 = vadd.f32 %v7190_v58, %v2290_v0  ;;  %v2473_v51 = vadd.f32 %v7191_v9, %v2289_v14 }
 0x88e   : > { %5245 = vrcp.f32 %v4109_v11  ;;  %v2266_v48 = vpop.permute.xlu1 %2265  ;;  %v2276_v54 = vpop.permute.xlu0 %2275 }
 0x88f   : > { %v5236_v40 = vpop.eup %5235  ;;  %2482 = vst.msk [vmem:[#allocation5 + $0x10] sm:$0xff] %vm523_vm2, %v2474_v35  ;;  %2481 = vst.msk [vmem:[#allocation5 + $0x8] sm:$0xff] %vm523_vm2, %v2473_v51  ;;  %v2291_v15 = vmul.f32 %v2266_v48, %v2243_v38  ;;  %v2293_v16 = vmul.f32 %v2276_v54, %v2245_v57  ;;  %v3433_v38 = vld [vmem:[#allocation5 + $0x48] sm:$0xff] }
 0x890   : > { %v5238_v44 = vpop.eup %5237  ;;  %4138 = vperm.xlu1 %5150, %v5236_v40  }
 0x891   : > { %v2475_v4 = vadd.f32 %v7192_v31, %v2291_v15  ;;  %v2477_v63 = vadd.f32 %v7193_v53, %v2293_v16  ;;  %4143 = vperm.xlu0 %5149, %v5238_v44  }
 0x892   : > { %v2271_v42 = vpop.permute.xlu1 %2270  ;;  %v2286_v34 = vpop.permute.xlu0 %2285  ;;  %v3707_v24 = vld [vmem:[#allocation5] sm:$0xff] }
 0x893   : > { %v5240_v55 = vpop.eup %5239  ;;  %2483 = vst.msk [vmem:[#allocation5 + $0x18] sm:$0xff] %vm523_vm2, %v2475_v4  ;;  %2485 = vst.msk [vmem:[#allocation5 + $0x28] sm:$0xff] %vm523_vm2, %v2477_v63  ;;  %v2292_v23 = vmul.f32 %v2271_v42, %v2244_v45  ;;  %v2295_v32 = vmul.f32 %v2286_v34, %v2247_v47 }
 0x894   : > { %v5242_v49 = vpop.eup %5241  ;;  %4148 = vperm.xlu1 %5150, %v5240_v55  }
 0x895   : > { %v2476_v50 = vadd.f32 %v7194_v20, %v2292_v23  ;;  %v2479_v5 = vadd.f32 %v7195_v61, %v2295_v32  ;;  %4153 = vperm.xlu0 %5149, %v5242_v49   ;;  %v3434_v32 = vld [vmem:[#allocation5 + $0x50] sm:$0xff]  ;;  %v3437_v20 = vld [vmem:[#allocation5 + $0x68] sm:$0xff] }
 0x896   : > { %v2281_v62 = vpop.permute.xlu1 %2280  ;;  %v3448_v52 = vpop.permute.xlu0 %3447  ;;  %v3709_v27 = vld [vmem:[#allocation5 + $0x10] sm:$0xff]  ;;  %v3708_v33 = vld [vmem:[#allocation5 + $0x8] sm:$0xff] }
 0x897   : > { %v5244_v7 = vpop.eup %5243  ;;  %2484 = vst.msk [vmem:[#allocation5 + $0x20] sm:$0xff] %vm523_vm2, %v2476_v50  ;;  %2487 = vst.msk [vmem:[#allocation5 + $0x38] sm:$0xff] %vm523_vm2, %v2479_v5  ;;  %v2294_v17 = vmul.f32 %v2281_v62, %v2246_v56  ;;  %v3481_v54 = vmul.f32 %v3448_v52, %v3433_v38  ;;  %v3435_v56 = vld [vmem:[#allocation5 + $0x58] sm:$0xff]  ;;  %v7197_v61 = vld [vmem:[#allocation31_spill] sm:$0xff] }
 0x898   : > { %v5246_v29 = vpop.eup %5245  ;;  %4158 = vperm.xlu1 %5150, %v5244_v7   ;;  %v3436_v52 = vld [vmem:[#allocation5 + $0x60] sm:$0xff]  ;;  %v3439_v7 = vld [vmem:[#allocation5 + $0x78] sm:$0xff] }
 0x899   : > { %v2478_v59 = vadd.f32 %v7196_v60, %v2294_v17  ;;  %4163 = vperm.xlu0 %5149, %v5246_v29   ;;  %v3438_v17 = vld [vmem:[#allocation5 + $0x70] sm:$0xff] }
 0x89a   : > { %v3443_v41 = vpop.permute.xlu1 %3442  ;;  %v3458_v2 = vpop.permute.xlu0 %3457  ;;  %v3710_v18 = vld [vmem:[#allocation5 + $0x18] sm:$0xff]  ;;  %v3712_v9 = vld [vmem:[#allocation5 + $0x28] sm:$0xff] }
 0x89b   : > { %2486 = vst.msk [vmem:[#allocation5 + $0x30] sm:$0xff] %vm523_vm2, %v2478_v59  ;;  %v3480_v57 = vmul.f32 %v3443_v41, %v3432_v43  ;;  %v3483_v41 = vmul.f32 %v3458_v2, %v3435_v56 }
 0x89e   : > { %v3453_v21 = vpop.permute.xlu1 %3452  ;;  %v3468_v19 = vpop.permute.xlu0 %3467  ;;  %v3711_v11 = vld [vmem:[#allocation5 + $0x20] sm:$0xff]  ;;  %v3714_v31 = vld [vmem:[#allocation5 + $0x38] sm:$0xff] }
 0x89f   : > { %v3482_v62 = vmul.f32 %v3453_v21, %v3434_v32 }
 0x8a2   : > { %v6921_v3 = vpop.permute.xlu1 %3462  ;;  %v6923_v6 = vpop.permute.xlu0 %3477  ;;  %v3713_v4 = vld [vmem:[#allocation5 + $0x30] sm:$0xff] }
 0x8a6   : > { %v6925_v8 = vpop.permute.xlu1 %3472  ;;  %v3723_v12 = vpop.permute.xlu0 %3722 }
 0x8a7   : > { %v3756_v1 = vmul.f32 %v3723_v12, %v3708_v33  ;;  %v3485_v12 = vmul.f32 %v3468_v19, %v3437_v20 }
 0x8aa   : > { %v3718_v13 = vpop.permute.xlu1 %3717  ;;  %v3733_v22 = vpop.permute.xlu0 %3732 }
 0x8ab   : > { %v3755_v28 = vmul.f32 %v3718_v13, %v3707_v24  ;;  %v3758_v10 = vmul.f32 %v3733_v22, %v3710_v18 }
 0x8ad   : > { %v3763_v30 = vpack.c.bf16 %v3756_v1, %v3755_v28 }
 0x8ae   : > { %v3728_v37 = vpop.permute.xlu1 %3727  ;;  %v3743_v46 = vpop.permute.xlu0 %3742 }
 0x8af   : > { %v3757_v39 = vmul.f32 %v3728_v37, %v3709_v27  ;;  %v3760_v40 = vmul.f32 %v3743_v46, %v3712_v9  ;;  %v3771_v45 = vshrl.u32 %v3763_v30, 16  ;;  %v3486_v46 = vmul.f32 %v6925_v8, %v3438_v17 }
 0x8b1   : > { %v3764_v0 = vpack.c.bf16 %v3758_v10, %v3757_v39  ;;  %v3484_v10 = vmul.f32 %v6921_v3, %v3436_v52  ;;  %v3487_v39 = vmul.f32 %v6923_v6, %v3439_v7  ;;  %v5155_v7 = vld [vmem:[#allocation17] sm:$0xff]  }
 0x8b2   : > { %v3738_v14 = vpop.permute.xlu1 %3737  ;;  %v3753_v51 = vpop.permute.xlu0 %3752  ;;  %4988 = vmatpush3.bf16.msra.mxu0 %v5155_v7 }
 0x8b3   : > { %v3759_v58 = vmul.f32 %v3738_v14, %v3711_v11  ;;  %v3772_v35 = vshrl.u32 %v3764_v0, 16  ;;  %v3769_v47 = vpack.i.b16 %v3764_v0, %v3763_v30  ;;  %v3762_v42 = vmul.f32 %v3753_v51, %v3714_v31  ;;  %4989 = vmatprep.subr.bf16.mxu0 %v7154_v26 }
 0x8b5   : > { %v3525_v48 = vpop.f32.mrb[28].mxu0  ;;  %v3765_v63 = vpack.c.bf16 %v3760_v40, %v3759_v58  ;;  %v3773_v49 = vpack.i.b16 %v3772_v35, %v3771_v45  ;;  %v3783_v5 = vcombine.high %v3769_v47, %v7197_v61  ;;  %v3790_v13 = vrot.slane %v3769_v47, %v6084_v25 }
 0x8b6   : > { %v3664_v15 = vadd.f32 %v3525_v48, %v3480_v57  ;;  %v3748_v16 = vpop.permute.xlu1 %3747  ;;  %v4967_v44 = vpop.f32.mrb[29].mxu0 }
 0x8b7   : > { %v3528_v53 = vpop.f32.mrb[30].mxu0  ;;  %v3761_v34 = vmul.f32 %v3748_v16, %v3713_v4  ;;  %v3779_v29 = vshrl.u32 %v3765_v63, 16  ;;  %v3849_v22 = vcombine.high %v3773_v49, %v7197_v61  ;;  %v3797_v2 = vrot.slane %v3783_v5, %v6084_v25 }
 0x8b8   : > { %3672 = vst.msk [vmem:[#allocation5 + $0x40] sm:$0xff] %vm523_vm2, %v3664_v15  ;;  %v3665_v55 = vadd.f32 %v3528_v53, %v3481_v54  ;;  %v4968_v23 = vpop.f32.mrb[31].mxu0  ;;  %v3856_v38 = vrot.slane %v3773_v49, %v6084_v25 }
 0x8b9   : > { %v3766_v50 = vpack.c.bf16 %v3762_v42, %v3761_v34  ;;  %v3863_v3 = vrot.slane %v3849_v22, %v6084_v25 }
 0x8ba   : > { %3673 = vst.msk [vmem:[#allocation5 + $0x48] sm:$0xff] %vm523_vm2, %v3665_v55 }
 0x8bb   : > { %v3777_v60 = vpack.i.b16 %v3766_v50, %v3765_v63  ;;  %v3780_v59 = vshrl.u32 %v3766_v50, 16 }
 0x8bd   : > { %v3569_v24 = vpop.f32.mrb[28].mxu1  ;;  %v3781_v18 = vpack.i.b16 %v3780_v59, %v3779_v29  ;;  %v3798_v27 = vcombine.high %v3777_v60, %v7197_v61  ;;  %v3805_v37 = vrot.slane %v3777_v60, %v6084_v25 }
 0x8be   : > { %v3666_v28 = vadd.f32 %v3569_v24, %v3482_v62  ;;  %v4973_v21 = vpop.f32.mrb[29].mxu1 }
 0x8bf   : > { %v3572_v19 = vpop.f32.mrb[30].mxu1  ;;  %v3812_v33 = vrot.slane %v3798_v27, %v6084_v25  ;;  %v3813_v43 = vcombine.low %v3790_v13, %v3805_v37  ;;  %v3814_v1 = vcombine.high %v3790_v13, %v3805_v37  ;;  %v3864_v0 = vcombine.high %v3781_v18, %v7197_v61  ;;  %v5156_v37 = vld [vmem:[#allocation17 + $0x8] sm:$0xff]  }
 0x8c0   : > { %3674 = vst.msk [vmem:[#allocation5 + $0x50] sm:$0xff] %vm523_vm2, %v3666_v28  ;;  %v4974_v14 = vpop.f32.mrb[31].mxu1  ;;  %v3871_v6 = vrot.slane %v3781_v18, %v6084_v25  ;;  %v3667_v30 = vadd.f32 %v3572_v19, %v3483_v41  ;;  %4990 = vmatpush3.bf16.msra.mxu0 %v5156_v37 }
 0x8c1   : > { %v3613_v8 = vpop.f32.mrb[32].mxu0  ;;  %v3821_v11 = vrot.slane %v3813_v43, %v6095_v36  ;;  %v3828_v57 = vrot.slane %v3814_v1, %v6095_v36  ;;  %v3829_v58 = vcombine.low %v3797_v2, %v3812_v33  ;;  %v3830_v35 = vcombine.high %v3797_v2, %v3812_v33 }
 0x8c2   : > { %v4979_v9 = vpop.f32.mrb[33].mxu0  ;;  %v3878_v51 = vrot.slane %v3864_v0, %v6084_v25  ;;  %v3879_v48 = vcombine.low %v3856_v38, %v3871_v6  ;;  %v3880_v54 = vcombine.high %v3856_v38, %v3871_v6  ;;  %3675 = vst.msk [vmem:[#allocation5 + $0x58] sm:$0xff] %vm523_vm2, %v3667_v30  ;;  %v3668_v40 = vadd.f32 %v3613_v8, %v3484_v10 }
 0x8c3   : > { %v3616_v15 = vpop.f32.mrb[34].mxu0  ;;  %v3837_v16 = vrot.slane %v3829_v58, %v6095_v36  ;;  %v3844_v44 = vrot.slane %v3830_v35, %v6095_v36  ;;  %v3915_v45 = vcombine.low %v3821_v11, %v3828_v57  ;;  %v4796_v47 = vcombine.high %v3821_v11, %v3828_v57 }
 0x8c4   : > { %v4980_v31 = vpop.f32.mrb[35].mxu0  ;;  %v3887_v4 = vrot.slane %v3879_v48, %v6095_v36  ;;  %v3894_v53 = vrot.slane %v3880_v54, %v6095_v36  ;;  %v3895_v63 = vcombine.low %v3863_v3, %v3878_v51  ;;  %v3896_v42 = vcombine.high %v3863_v3, %v3878_v51  ;;  %3676 = vst.msk [vmem:[#allocation5 + $0x60] sm:$0xff] %vm523_vm2, %v3668_v40 }
 0x8c5   : > { %v3657_v34 = vpop.f32.mrb[32].mxu1  ;;  %v3922_v55 = vrot.slane %v3915_v45, %v6084_v25  ;;  %v3930_v23 = vrot.slane %v4796_v47, %v6084_v25  ;;  %v3931_v32 = vcombine.low %v3837_v16, %v3844_v44  ;;  %v4797_v49 = vcombine.high %v3837_v16, %v3844_v44  ;;  %v4118_v45 = vld [vmem:[#allocation5 + $0x40] sm:$0xff]  ;;  %v4119_v47 = vld [vmem:[#allocation5 + $0x48] sm:$0xff] }
 0x8c6   : > { %v4985_v56 = vpop.f32.mrb[33].mxu1  ;;  %v3903_v20 = vrot.slane %v3895_v63, %v6095_v36  ;;  %v3910_v50 = vrot.slane %v3896_v42, %v6095_v36  ;;  %v3965_v5 = vcombine.low %v3887_v4, %v3894_v53  ;;  %v4798_v62 = vcombine.high %v3887_v4, %v3894_v53 }
 0x8c7   : > { %v3660_v52 = vpop.f32.mrb[34].mxu1  ;;  %v3669_v17 = vadd.f32 %v3616_v15, %v3485_v12  ;;  %v3670_v29 = vadd.f32 %v3657_v34, %v3486_v46  ;;  %v3938_v41 = vrot.slane %v3931_v32, %v6084_v25  ;;  %v3946_v24 = vrot.slane %v4797_v49, %v6084_v25  ;;  %v4120_v54 = vld [vmem:[#allocation5 + $0x50] sm:$0xff] }
 0x8c8   : > { %v3671_v60 = vadd.f32 %v3660_v52, %v3487_v39  ;;  %v4986_v59 = vpop.f32.mrb[35].mxu1  ;;  %v3981_v13 = vcombine.low %v3903_v20, %v3910_v50  ;;  %v4799_v22 = vcombine.high %v3903_v20, %v3910_v50  ;;  %v3947_v18 = vcombine.low %v3922_v55, %v3930_v23 }
 0x8c9   : > { %3677 = vst.msk [vmem:[#allocation5 + $0x68] sm:$0xff] %vm523_vm2, %v3669_v17  ;;  %3678 = vst.msk [vmem:[#allocation5 + $0x70] sm:$0xff] %vm523_vm2, %v3670_v29  ;;  %v3972_v27 = vrot.slane %v3965_v5, %v6084_v25  ;;  %v3980_v12 = vrot.slane %v4798_v62, %v6084_v25  ;;  %v3955_v28 = vcombine.low %v3938_v41, %v3946_v24  ;;  %v4121_v40 = vld [vmem:[#allocation5 + $0x58] sm:$0xff] }
 0x8ca   : > { %3679 = vst.msk [vmem:[#allocation5 + $0x78] sm:$0xff] %vm523_vm2, %v3671_v60  ;;  %v3988_v21 = vrot.slane %v3981_v13, %v6084_v25  ;;  %v3996_v10 = vrot.slane %v4799_v22, %v6084_v25  ;;  %v3954_v46 = vrot.slane %v3947_v18, %v6095_v36 }
 0x8cb   : > { %v3997_v39 = vcombine.low %v3972_v27, %v3980_v12  ;;  %v3962_v2 = vrot.slane %v3955_v28, %v6095_v36  ;;  %v4122_v34 = vld [vmem:[#allocation5 + $0x60] sm:$0xff] }
 0x8cc   : > { %v4005_v19 = vcombine.low %v3988_v21, %v3996_v10 }
 0x8cd   : > { %v4004_v33 = vrot.slane %v3997_v39, %v6095_v36  ;;  %v6971_v1 = vcombine.low %v3954_v46, %v3962_v2  ;;  %v3964_v0 = vcombine.high %v3954_v46, %v3962_v2 }
 0x8ce   : > { %v4012_v43 = vrot.slane %v4005_v19, %v6095_v36 }
 0x8cf   : > { %v4018_v6 = vshrl.u32 %v6971_v1, 16  ;;  %v4024_v58 = vshrl.u32 %v3964_v0, 16 }
 0x8d0   : > { %v4014_v14 = vcombine.high %v4004_v33, %v4012_v43  ;;  %v6973_v38 = vcombine.low %v4004_v33, %v4012_v43  ;;  %v4123_v55 = vld [vmem:[#allocation5 + $0x68] sm:$0xff]  ;;  %v4124_v56 = vld [vmem:[#allocation5 + $0x70] sm:$0xff] }
 0x8d1   : > { %v4125_v7 = vld [vmem:[#allocation5 + $0x78] sm:$0xff] }
 0x8d2   : > { %v4023_v3 = vpack.i.b16 %v4014_v14, %v3964_v0  ;;  %v4019_v30 = vshrl.u32 %v6973_v38, 16  ;;  %v4017_v8 = vpack.i.b16 %v6973_v38, %v6971_v1  ;;  %v4025_v57 = vshrl.u32 %v4014_v14, 16 }
 0x8d4   : > { %4029 = vrot.lane.b32.xlu0 %v4023_v3, %s5601_s2  ;;  %v4020_v11 = vpack.i.b16 %v4019_v30, %v4018_v6  ;;  %v4026_v35 = vpack.i.b16 %v4025_v57, %v4024_v58 }
 0x8d6   : > { %4027 = vrot.lane.b32.xlu1 %v4020_v11, %s5602_s19 }
 0x8da   : > { %4031 = vrot.lane.b32.xlu1 %v4026_v35, %s5603_s26 }
 0x907   : > { %v4129_v9 = vpop.permute.xlu1 %4128 }
 0x908   : > { %v4134_v51 = vpop.permute.xlu0 %4133  ;;  %v4166_v31 = vmul.f32 %v4129_v9, %v4118_v45 }
 0x909   : > { %v4167_v4 = vmul.f32 %v4134_v51, %v4119_v47 }
 0x90b   : > { %v4174_v49 = vpack.c.bf16 %v4167_v4, %v4166_v31 }
 0x90d   : > { %v4182_v60 = vshrl.u32 %v4174_v49, 16 }
 0x90f   : > { %v4139_v48 = vpop.permute.xlu1 %4138 }
 0x910   : > { %v4144_v15 = vpop.permute.xlu0 %4143  ;;  %v4168_v16 = vmul.f32 %v4139_v48, %v4120_v54 }
 0x911   : > { %v4169_v44 = vmul.f32 %v4144_v15, %v4121_v40 }
 0x913   : > { %v4149_v53 = vpop.permute.xlu1 %4148  ;;  %v4175_v42 = vpack.c.bf16 %v4169_v44, %v4168_v16 }
 0x914   : > { %v4154_v63 = vpop.permute.xlu0 %4153  ;;  %v4170_v23 = vmul.f32 %v4149_v53, %v4122_v34 }
 0x915   : > { %v4171_v32 = vmul.f32 %v4154_v63, %v4123_v55  ;;  %v4180_v62 = vpack.i.b16 %v4175_v42, %v4174_v49  ;;  %v4183_v52 = vshrl.u32 %v4175_v42, 16  ;;  %v5157_v42 = vld [vmem:[#allocation17 + $0x10] sm:$0xff]  }
 0x916   : > { %4996 = vmatpush3.bf16.msra.mxu1 %v5157_v42 }
 0x917   : > { %v4159_v20 = vpop.permute.xlu1 %4158  ;;  %v4176_v17 = vpack.c.bf16 %v4171_v32, %v4170_v23  ;;  %v4184_v41 = vpack.i.b16 %v4183_v52, %v4182_v60  ;;  %v4194_v13 = vcombine.high %v4180_v62, %v7197_v61  ;;  %v4201_v27 = vrot.slane %v4180_v62, %v6084_v25  ;;  %4997 = vmatprep.subr.bf16.mxu1 %v7154_v26 }
 0x918   : > { %v4172_v50 = vmul.f32 %v4159_v20, %v4124_v56  ;;  %v4164_v5 = vpop.permute.xlu0 %4163 }
 0x919   : > { %v4173_v29 = vmul.f32 %v4164_v5, %v4125_v7  ;;  %v4190_v22 = vshrl.u32 %v4176_v17, 16  ;;  %v4208_v21 = vrot.slane %v4194_v13, %v6084_v25  ;;  %v4260_v10 = vcombine.high %v4184_v41, %v7197_v61  ;;  %v5158_v5 = vld [vmem:[#allocation17 + $0x18] sm:$0xff]  }
 0x91a   : > { %v4267_v33 = vrot.slane %v4184_v41, %v6084_v25  ;;  %4998 = vmatpush3.bf16.msra.mxu1 %v5158_v5 }
 0x91b   : > { %v4177_v59 = vpack.c.bf16 %v4173_v29, %v4172_v50  ;;  %v4274_v30 = vrot.slane %v4260_v10, %v6084_v25 }
 0x91d   : > { %v4188_v24 = vpack.i.b16 %v4177_v59, %v4176_v17  ;;  %v4191_v18 = vshrl.u32 %v4177_v59, 16 }
 0x91f   : > { %v4192_v12 = vpack.i.b16 %v4191_v18, %v4190_v22  ;;  %v4209_v37 = vcombine.high %v4188_v24, %v7197_v61  ;;  %v4216_v28 = vrot.slane %v4188_v24, %v6084_v25 }
 0x921   : > { %v4223_v39 = vrot.slane %v4209_v37, %v6084_v25  ;;  %v4224_v46 = vcombine.low %v4201_v27, %v4216_v28  ;;  %v4225_v2 = vcombine.high %v4201_v27, %v4216_v28  ;;  %v4275_v19 = vcombine.high %v4192_v12, %v7197_v61 }
 0x922   : > { %v4282_v43 = vrot.slane %v4192_v12, %v6084_v25 }
 0x923   : > { %v4232_v0 = vrot.slane %v4224_v46, %v6095_v36  ;;  %v4239_v14 = vrot.slane %v4225_v2, %v6095_v36  ;;  %v4240_v3 = vcombine.low %v4208_v21, %v4223_v39  ;;  %v4241_v6 = vcombine.high %v4208_v21, %v4223_v39 }
 0x924   : > { %v4289_v11 = vrot.slane %v4275_v19, %v6084_v25  ;;  %v4290_v57 = vcombine.low %v4267_v33, %v4282_v43  ;;  %v4291_v58 = vcombine.high %v4267_v33, %v4282_v43 }
 0x925   : > { %v4248_v35 = vrot.slane %v4240_v3, %v6095_v36  ;;  %v4255_v61 = vrot.slane %v4241_v6, %v6095_v36  ;;  %v4326_v9 = vcombine.low %v4232_v0, %v4239_v14  ;;  %v4803_v51 = vcombine.high %v4232_v0, %v4239_v14 }
 0x926   : > { %v4298_v48 = vrot.slane %v4290_v57, %v6095_v36  ;;  %v4305_v54 = vrot.slane %v4291_v58, %v6095_v36  ;;  %v4306_v40 = vcombine.low %v4274_v30, %v4289_v11  ;;  %v4307_v15 = vcombine.high %v4274_v30, %v4289_v11  ;;  %v7199_v57 = vld [vmem:[#allocation29_spill] sm:$0xff] }
 0x927   : > { %v4333_v16 = vrot.slane %v4326_v9, %v6084_v25  ;;  %v4341_v44 = vrot.slane %v4803_v51, %v6084_v25  ;;  %v4342_v45 = vcombine.low %v4248_v35, %v4255_v61  ;;  %v4804_v47 = vcombine.high %v4248_v35, %v4255_v61  ;;  %v4810_v61 = vld [vmem:[#allocation18] ss:$0 sm:$0xff] }
 0x928   : > { %v4314_v31 = vrot.slane %v4306_v40, %v6095_v36  ;;  %v4321_v4 = vrot.slane %v4307_v15, %v6095_v36  ;;  %v4376_v53 = vcombine.low %v4298_v48, %v4305_v54  ;;  %v4805_v63 = vcombine.high %v4298_v48, %v4305_v54  ;;  %v7200_v9 = vld [vmem:[#allocation30_spill] sm:$0xff] }
 0x929   : > { %v4349_v34 = vrot.slane %v4342_v45, %v6084_v25  ;;  %v4357_v55 = vrot.slane %v4804_v47, %v6084_v25  ;;  %v4358_v23 = vcombine.low %v4333_v16, %v4341_v44 }
 0x92a   : > { %v4392_v32 = vcombine.low %v4314_v31, %v4321_v4  ;;  %v4806_v49 = vcombine.high %v4314_v31, %v4321_v4  ;;  %v4383_v56 = vrot.slane %v4376_v53, %v6084_v25  ;;  %v4391_v20 = vrot.slane %v4805_v63, %v6084_v25 }
 0x92b   : > { %v4366_v50 = vcombine.low %v4349_v34, %v4357_v55  ;;  %v4365_v29 = vrot.slane %v4358_v23, %v6095_v36 }
 0x92c   : > { %v4399_v62 = vrot.slane %v4392_v32, %v6084_v25  ;;  %v4407_v52 = vrot.slane %v4806_v49, %v6084_v25  ;;  %v4408_v7 = vcombine.low %v4383_v56, %v4391_v20 }
 0x92d   : > { %v4373_v17 = vrot.slane %v4366_v50, %v6095_v36 }
 0x92e   : > { %v4416_v60 = vcombine.low %v4399_v62, %v4407_v52  ;;  %v4415_v59 = vrot.slane %v4408_v7, %v6095_v36 }
 0x92f   : > { %v4374_v13 = vcombine.low %v4365_v29, %v4373_v17  ;;  %v4375_v22 = vcombine.high %v4365_v29, %v4373_v17 }
 0x930   : > { %v4423_v41 = vrot.slane %v4416_v60, %v6095_v36 }
 0x931   : > { %v4429_v27 = vshrl.u32 %v4374_v13, 16  ;;  %v4435_v21 = vshrl.u32 %v4375_v22, 16 }
 0x932   : > { %v4425_v24 = vcombine.high %v4415_v59, %v4423_v41  ;;  %v4424_v26 = vcombine.low %v4415_v59, %v4423_v41 }
 0x934   : > { %v4434_v18 = vpack.i.b16 %v4425_v24, %v4375_v22  ;;  %v4430_v12 = vshrl.u32 %v4424_v26, 16  ;;  %v4428_v37 = vpack.i.b16 %v4424_v26, %v4374_v13  ;;  %v4436_v28 = vshrl.u32 %v4425_v24, 16 }
 0x936   : > { %4440 = vrot.lane.b32.xlu1 %v4434_v18, %s5601_s2  ;;  %v4431_v25 = vpack.i.b16 %v4430_v12, %v4429_v27  ;;  %v4437_v10 = vpack.i.b16 %v4436_v28, %v4435_v21 }
 0x938   : > { %4438 = vrot.lane.b32.xlu0 %v4431_v25, %s5602_s19 }
 0x93c   : > { %4442 = vrot.lane.b32.xlu0 %v4437_v10, %s5603_s26 }
 0x946   : > { %v4030_v46 = vpop.permute.xlu0 %4029 }
 0x948   : > { %v4028_v39 = vpop.permute.xlu1 %4027 }
 0x949   : > { %v4035_v36 = vsel %vm523_vm2, %v4017_v8, %v4028_v39 }
 0x94a   : > { %v4037_v19 = vsel %vm2054_vm5, %v4035_v36, %v4030_v46 }
 0x94c   : > { %v4032_v2 = vpop.permute.xlu1 %4031 }
 0x94d   : > { %v4040_v33 = vsel %vm4038_vm6, %v4037_v19, %v4032_v2 }
 0x94e   : > { %4992 = vmatmul.mubr.msk.bf16.vlgmr.msra.gmra.mrb[36].mxu0 %vm540_vm0, %v4040_v33 }
 0x9a8   : > { %v4441_v14 = vpop.permute.xlu1 %4440 }
 0x9aa   : > { %v4439_v43 = vpop.permute.xlu0 %4438 }
 0x9ab   : > { %v4446_v0 = vsel %vm523_vm2, %v4428_v37, %v4439_v43 }
 0x9ac   : > { %v4448_v6 = vsel %vm2054_vm5, %v4446_v0, %v4441_v14 }
 0x9ae   : > { %v4443_v3 = vpop.permute.xlu0 %4442 }
 0x9af   : > { %v4450_v30 = vsel %vm4038_vm6, %v4448_v6, %v4443_v3 }
 0x9b0   : > { %5000 = vmatmul.mubr.msk.bf16.vlgmr.msra.gmra.mrb[36].mxu1 %vm540_vm0, %v4450_v30 }
 0xa21   : > { %v4093_v1 = vpop.f32.mrb[36].mxu0 }
 0xa22   : > { %v4993_v38 = vpop.f32.mrb[37].mxu0  ;;  %v4100_v58 = vadd.f32 %v7199_v57, %v4093_v1 }
 0xa23   : > { %v4096_v8 = vpop.f32.mrb[38].mxu0 }
 0xa24   : > { %v4994_v11 = vpop.f32.mrb[39].mxu0  ;;  %v4101_v51 = vadd.f32 %v7200_v9, %v4096_v8 }
 0xa83   : > { %v4504_v35 = vpop.f32.mrb[36].mxu1 }
 0xa84   : > { %v4511_v48 = vadd.f32 %v4504_v35, %v4100_v58  ;;  %v5001_v54 = vpop.f32.mrb[37].mxu1 }
 0xa85   : > { %v4507_v40 = vpop.f32.mrb[38].mxu1 }
 0xa86   : > { %v4520_v15 = vadd.f32 %v4810_v61, %v4511_v48  ;;  %v4512_v16 = vadd.f32 %v4507_v40, %v4101_v51  ;;  %v5002_v44 = vpop.f32.mrb[39].mxu1 }
 0xa88   : > { %v4820_v45 = vpack.c.bf16 %v4520_v15, %v4520_v15  ;;  %v4521_v47 = vadd.f32 %v4810_v61, %v4512_v16 }
 0xa8a   : > { %4531 = vst.msk [vmem:[%s473_s23] sm:$0xf] %vm4530_vm7, %v4820_v45  ;;  %v4821_v31 = vpack.c.bf16 %v4521_v47, %v4521_v47 }
 0xa8c   : > { %4532 = vst.msk [vmem:[%s473_s23 + $0x4] sm:$0xf] %vm4530_vm7, %v4821_v31 }
 0xa8d   : > { %5488 = shalt.err (!%p5485_p11)
}
 0xa8e   : > { %s5489_s4 = scalar_lea.hbm %s7034_s12, 128  ;;  %s5493_s2 = scalar_lea.hbm %s7201_s18, 256 }
 0xa8f   : > { %p5490_p8 = scmp.ne.s32.totalorder %s7034_s12, %s5489_s4  ;;  %p5494_p6 = scmp.lt.u32.totalorder %s7034_s12, %s7201_s18 }
 0xa90   : > { %p5495_p2 = scmp.lt.u32.totalorder %s5493_s2, %s5489_s4  ;;  %p5497_p4 = scmp.lt.u32.totalorder %s5489_s4, %s7034_s12 }
 0xa91   : > { %p5491_p3 = pnand %p5490_p8, %p7202_p9 }
 0xa92   : > { %p5496_p13 = por %p5495_p2, %p5494_p6 }
 0xa93   : > { %p5492_p12 = pneg %p5491_p3 }
 0xa94   : > { %p5498_p0 = por %p5497_p4, %p5496_p13 }
 0xa96   : > { %p5499_p7 = pnand %p5498_p0, %p5492_p12 }
 0xa98   : > { %5502 = shalt.err (!%p5499_p7)
}
 0xa99   : > { %s5605_s6 = smov 4  }
 0xa9a   : > { %5031 = dma.vmem_to_hbm [thread:$0]  (%p7202_p9), %s7036_s24, 128, %s7034_s12, %s4534_s30, %s5599_s16, %s5599_s16, %s5605_s6  }
 0xa9b PF: > { %s4564_s3 = sand.u32 1, %s5557_s27   ;;  %p7203_p5 = scmp.ne.s32.totalorder %s7138_s8, 0 }
 0xa9c   : > { %p7204_p1 = scmp.ge.s32.totalorder %s5577_s10, 2  ;;  %s4565_s23 = scalar_lea.sflag [#allocation8], %s4564_s3 }
 0xa9e   : > { %p5060_p10 = pnand %p7204_p1, %p7203_p5 }
 0xaa0   : > { %5552 = dma.done.wait (!%p5060_p10), %s4565_s23, 128  }
 0xaa1   : > { %5554 = vsyncadd (!%p5060_p10), %s4565_s23, 4294967168  ;;  %s30_s10 = sadd.s32 1, %s5577_s10   ;;  %s7205_s27 = smov %s5561_s28 }
 0xaa2   : > { %p27_p11 = scmp.ge.s32.totalorder %s30_s10, 4   ;;  %s7206_s28 = smov %s5565_s29 }
 0xaa3   : > { %s7207_s29 = smov %s5869_s17  ;;  %s7208_s30 = smov %s5573_s9 }
 0xaa4   : > { %s7209_s9 = smov %s7211_s13  ;;  %29 = sbr.rel (!%p27_p11) target bundleno = 20 (0x14), region = 148 }
 0xaab   :  { %4570 = vsyncpa [#allocation7], 1 }
 0xaac   :  { %4572 = vsyncpa [#allocation7 + $0x1], 1 }
 0xaad   :  { %4573 = vsyncpa [#allocation10], 1 }
 0xaae   :  { %4575 = vsyncpa [#allocation10 + $0x1], 1 }
 0xaaf   :  { %4576 = vsyncpa [#allocation13], 1 }
 0xab0   :  { %4577 = vsyncpa [#allocation16], 1 }
 0xab1   :  { %4578 = vsyncpa [#allocation19], 1 }
 0xab2   :  { %4579 = vsyncpa [#allocation8], 1 }
 0xab3   :  { %4581 = vsyncpa [#allocation8 + $0x1], 1 }

</bundles_post_ra>
